<compile_context>
chip_gen: v7x
topology: tpu7x:2x2x1
jax: 0.10.0
libtpu: 0.0.40
codegen_flags: <defaults>
</compile_context>

<pallas_src>
import functools
import math

import jax
import jax.numpy as jnp
from jax.experimental import pallas as pl
from jax.experimental.pallas import tpu as pltpu


# ----------------------------------------------------------------------------
# Exponential integral E1(y) = -Ei(-y), y > 0  (A&S 5.1.53 / 5.1.56).
# Pure jnp math, usable both inside the kernel and in the pure-JAX reference.
# ----------------------------------------------------------------------------
def _e1(y, exp_neg_y):
    small = -jnp.log(y) + (-0.57721566 + y * (0.99999193 + y * (-0.24991055
            + y * (0.05519968 + y * (-0.00976004 + y * 0.00107857)))))
    num = 0.2677737343 + y * (8.6347608925 + y * (18.0590169730
          + y * (8.5733287401 + y)))
    den = 3.9584969228 + y * (21.0996530827 + y * (25.6329561486
          + y * (9.5733223454 + y)))
    large = exp_neg_y * num / (den * y)
    return jnp.where(y <= 1.0, small, large)


# ----------------------------------------------------------------------------
# Fused PROSPECT-D kernel.
#   per-leaf params : (L, 1) VMEM blocks
#   spectra         : (1, bw) lane-dense VMEM blocks
#   outputs         : (L, bw) refl / tran blocks
# ----------------------------------------------------------------------------
def _prospectd_kernel(n_ref, cab_ref, car_ref, cant_ref, cw_ref, cm_ref,
                      nr_ref, kab_ref, kcar_ref, kant_ref, kw_ref, km_ref,
                      refl_ref, tran_ref,
                      *, sa2_alpha, inv_2sa2_alpha, alpha_is_90):
    # ---- per-leaf scalars (L, 1) ------------------------------------------
    N = n_ref[...]
    inv_N = 1.0 / N
    cab, car, cant = cab_ref[...], car_ref[...], cant_ref[...]
    cw, cm = cw_ref[...], cm_ref[...]

    # ---- per-wavelength spectra (1, bw) -----------------------------------
    nr = nr_ref[...]
    kab, kcar, kant = kab_ref[...], kcar_ref[...], kant_ref[...]
    kw, km = kw_ref[...], km_ref[...]

    # ---- total absorption & elementary-layer transmissivity tau -----------
    kall = (cab * kab + car * kcar + cant * kant + cw * kw + cm * km) * inv_N
    kall = jnp.maximum(kall, 1e-4)
    exp_neg = jnp.exp(-kall)
    t1 = (1.0 - kall) * exp_neg
    t2 = kall * kall * _e1(kall, exp_neg)      # kall^2 * (-Ei(-kall))
    tau = t1 + t2                              # (L, bw)

    # ---- getav: interface transmissivity ----------------------------------
    # nr-only subexpressions, shared between the alpha and the 90-deg call.
    n2 = nr * nr
    inv_n2 = 1.0 / n2
    npx = n2 + 1.0
    nm2 = (n2 - 1.0) * (n2 - 1.0)
    a_if = 0.5 * (nr + 1.0) * (nr + 1.0)
    k_if = -0.25 * nm2
    k2_if = k_if * k_if
    inv_a = 1.0 / a_if
    inv_npx = 1.0 / npx
    inv_nm2 = 1.0 / nm2
    inv_npx2 = inv_npx * inv_npx
    inv_npx3 = inv_npx2 * inv_npx
    n22 = n2 * n2
    npax_a = 2.0 * npx * a_if - nm2
    inv_npax_a = 1.0 / npax_a
    ts_a = (k2_if * (1.0 / 6.0) * (inv_a * inv_a * inv_a)
            + k_if * inv_a - 0.5 * a_if)
    c_tp2 = -2.0 * n2 * npx * inv_nm2
    c_tp4 = 16.0 * n22 * (n22 + 1.0) * inv_npx3 * inv_nm2
    c_tp5 = 16.0 * n2 * n22 * inv_npx3

    def tav_for(sa2, inv_2sa2, is_90):
        b2 = sa2 - 0.5 * npx
        if is_90:
            b = -b2                                  # b1 == 0 branch
        else:
            b = jnp.sqrt(b2 * b2 + k_if) - b2
        inv_b = 1.0 / b
        npx_b = 2.0 * npx * b - nm2
        inv_npx_b = 1.0 / npx_b
        ts = (k2_if * (1.0 / 6.0) * (inv_b * inv_b * inv_b)
              + k_if * inv_b - 0.5 * b - ts_a)
        tp = (-2.0 * n2 * (b - a_if) * inv_npx2
              + c_tp2 * jnp.log(b * inv_a)
              + 0.5 * n2 * (inv_b - inv_a)
              + c_tp4 * jnp.log(npx_b * inv_npax_a)
              + c_tp5 * (inv_npx_b - inv_npax_a))
        return (ts + tp) * inv_2sa2

    t12 = tav_for(1.0, 0.5, True)                    # alpha = 90 deg
    if alpha_is_90:
        talf = t12
    else:
        talf = tav_for(sa2_alpha, inv_2sa2_alpha, False)

    # ---- reflectance / transmittance of one elementary layer --------------
    ralf = 1.0 - talf
    r12 = 1.0 - t12
    t21 = t12 * inv_n2
    r21 = 1.0 - t21

    inv_den1 = 1.0 / (1.0 - (r21 * r21) * (tau * tau))   # (L, bw)
    x = tau * t21 * inv_den1
    Ta = talf * x
    Ra = ralf + r21 * tau * Ta
    tt = t12 * x
    rr = r12 + r21 * tau * tt

    # ---- Stokes system for the remaining N-1 layers ------------------------
    rpt = rr + tt
    rmt = rr - tt
    D = jnp.sqrt(jnp.maximum(
        (1.0 + rpt) * (1.0 + rmt) * (1.0 - rmt) * (1.0 - rpt), 0.0))
    rqmtq = rr * rr - tt * tt
    a_st = (1.0 + rqmtq + D) * (0.5 / rr)
    b_st = (1.0 - rqmtq + D) * (0.5 / tt)
    Nm1 = N - 1.0
    bnm1 = jnp.exp(Nm1 * jnp.log(jnp.maximum(b_st, 1e-9)))   # b ** (N - 1)
    bn2 = bnm1 * bnm1
    a2 = a_st * a_st
    inv_den2 = 1.0 / (a2 * bn2 - 1.0)
    Rsub = a_st * (bn2 - 1.0) * inv_den2
    Tsub = bnm1 * (a2 - 1.0) * inv_den2

    # r + t >= 1 limit (elementwise `where` == PyTorch's masked assignment)
    Tsub_lim = tt / (tt + (1.0 - tt) * Nm1)
    lim = rpt >= 1.0
    Tsub = jnp.where(lim, Tsub_lim, Tsub)
    Rsub = jnp.where(lim, 1.0 - Tsub_lim, Rsub)

    inv_den3 = 1.0 / (1.0 - Rsub * rr)
    z = Ta * inv_den3
    tran = z * Tsub
    refl = Ra + z * Rsub * tt

    refl_ref[...] = refl
    tran_ref[...] = tran


# ----------------------------------------------------------------------------
# Wrapper: pads the wavelength axis to lane-dense tiles and launches the kernel.
# ----------------------------------------------------------------------------
def _pad_row(x, wp, fill):
    x = jnp.asarray(x, jnp.float32).reshape(1, -1)
    w = x.shape[1]
    if wp > w:
        x = jnp.pad(x, ((0, 0), (0, wp - w)), constant_values=fill)
    return x


def prospectd(alpha, N, cab, car, cant, water, lma,
              nr, kab, kcar, kant, kw, km, *, block_w=4096):
    """Pallas equivalent of photorch prospectdcore.forward() -> (refl, tran)."""
    alpha_f = float(alpha)

    params = [jnp.asarray(p, jnp.float32).reshape(-1, 1)
              for p in (N, cab, car, cant, water, lma)]
    L = params[0].shape[0]
    W = jnp.shape(nr)[-1]

    # Lane-dense tiling: pad W to a multiple of 128; single block for small W,
    # block_w-wide blocks (multiple of 128) for large W.
    block_w = max(128, (int(block_w) // 128) * 128)
    w128 = -(-W // 128) * 128
    bw = w128 if w128 <= block_w else block_w
    wp = -(-w128 // bw) * bw
    nblk = wp // bw

    spectra = [_pad_row(nr, wp, 1.5)] + [_pad_row(s, wp, 0.0)
                                         for s in (kab, kcar, kant, kw, km)]

    # Constant-fold the alpha-dependent scalar math at trace time.
    sa2 = math.sin(math.radians(alpha_f)) ** 2
    inv_2sa2 = 1.0 / (2.0 * sa2)
    kernel = functools.partial(_prospectd_kernel,
                               sa2_alpha=sa2,
                               inv_2sa2_alpha=inv_2sa2,
                               alpha_is_90=(alpha_f == 90.0))

    param_spec = pl.BlockSpec((L, 1), lambda j: (0, 0))
    spec_spec = pl.BlockSpec((1, bw), lambda j: (0, j))
    out_spec = pl.BlockSpec((L, bw), lambda j: (0, j))

    refl, tran = pl.pallas_call(
        kernel,
        out_shape=(jax.ShapeDtypeStruct((L, wp), jnp.float32),
                   jax.ShapeDtypeStruct((L, wp), jnp.float32)),
        grid=(nblk,),
        in_specs=[param_spec] * 6 + [spec_spec] * 6,
        out_specs=(out_spec, out_spec),
        compiler_params=pltpu.CompilerParams(
            dimension_semantics=("parallel",)),
    )(*params, *spectra)

    return refl[:, :W], tran[:, :W]


# ----------------------------------------------------------------------------
# Pure-JAX reference mirroring the PyTorch module (same E1 approximation).
# ----------------------------------------------------------------------------
def _getav_ref(alpha, nr):
    n2 = nr ** 2
    npx = n2 + 1
    nm = n2 - 1
    a = (nr + 1) * (nr + 1) / 2.0
    k = -(n2 - 1) * (n2 - 1) / 4.0
    rd = alpha * (jnp.pi / 180)
    sa = jnp.sin(rd)
    sa2 = sa ** 2
    if alpha != 90:
        b1 = jnp.sqrt((sa2 - npx / 2) ** 2 + k)
    else:
        b1 = 0.0
    b2 = sa2 - npx / 2
    b = b1 - b2
    k2 = k ** 2
    ts = k2 / (6 * b ** 3) + k / b - b / 2 - (k2 / (6 * a ** 3) + k / a - a / 2)
    tp1 = -2 * n2 * (b - a) / npx ** 2
    nm2 = nm ** 2
    tp2 = -2 * n2 * npx * jnp.log(b / a) / nm2
    tp3 = n2 * (1 / b - 1 / a) / 2
    n22 = n2 ** 2
    npx3 = npx ** 3
    npax_a = 2 * npx * a - nm2
    npx_b = 2 * npx * b - nm2
    tp4 = 16 * n22 * (n22 + 1) * jnp.log(npx_b / npax_a) / (npx3 * nm2)
    tp5 = 16 * n2 ** 3 * (1.0 / npx_b - 1 / npax_a) / npx3
    tp = tp1 + tp2 + tp3 + tp4 + tp5
    return (ts + tp) / (2 * sa2)


def _prospectd_ref(alpha, N, cab, car, cant, water, lma,
                   nr, kab, kcar, kant, kw, km):
    kall = (cab * kab + car * kcar + cant * kant + water * kw + lma * km) / N
    kall = jnp.maximum(kall, 1e-4)
    t1 = (1 - kall) * jnp.exp(-kall)
    t2 = kall ** 2 * _e1(kall, jnp.exp(-kall))
    tau = t1 + t2
    talf = _getav_ref(alpha, nr)
    ralf = 1.0 - talf
    t12 = _getav_ref(90.0, nr)
    r12 = 1.0 - t12
    t21 = t12 / (nr * nr)
    r21 = 1 - t21
    denom = 1.0 - r21 * r21 * tau * tau
    Ta = talf * tau * t21 / denom
    Ra = ralf + r21 * tau * Ta
    t = t12 * tau * t21 / denom
    r = r12 + r21 * tau * t
    rpt = r + t
    rmt = r - t
    D = jnp.sqrt(jnp.maximum((1 + rpt) * (1 + rmt) * (1.0 - rmt) * (1.0 - rpt), 0.0))
    rq = r ** 2
    tq = t ** 2
    rqmtq = rq - tq
    a = (1 + rqmtq + D) / (2 * r)
    b = (1 - rqmtq + D) / (2 * t)
    bnm1 = b ** (N - 1)
    bn2 = bnm1 ** 2
    a2 = a * a
    denom = a2 * bn2 - 1
    Rsub = a * (bn2 - 1) / denom
    Tsub = bnm1 * (a2 - 1) / denom
    j = rpt >= 1.0
    Tsub_j = t / (t + (1 - t) * (N - 1))
    Tsub = jnp.where(j, Tsub_j, Tsub)
    Rsub = jnp.where(j, 1 - Tsub_j, Rsub)
    denom = 1 - Rsub * r
    tran = Ta * Tsub / denom
    refl = Ra + Ta * Rsub * t / denom
    return refl, tran


if __name__ == "__main__":
    key = jax.random.PRNGKey(0)
    L = 3          # num_leaves
    W = 2101       # PROSPECT-D wavelength grid, 400..2500 nm

    k0, k1, k2, k3, k4, k5 = jax.random.split(key, 6)
    # Physically plausible synthetic spectra (file prospectd_absc.txt cannot be
    # read in this sandbox).
    nr = 1.3 + 0.3 * jax.random.uniform(k0, (W,), dtype=jnp.float32)
    kab = 0.10 * jax.random.uniform(k1, (W,), dtype=jnp.float32)
    kcar = 0.20 * jax.random.uniform(k2, (W,), dtype=jnp.float32)
    kant = 0.20 * jax.random.uniform(k3, (W,), dtype=jnp.float32)
    kw = 60.0 * jax.random.uniform(k4, (W,), dtype=jnp.float32)
    km = 40.0 * jax.random.uniform(k5, (W,), dtype=jnp.float32)

    leaf = jnp.arange(L, dtype=jnp.float32).reshape(L, 1)
    N = 1.2 + 0.15 * leaf
    cab = 30.0 + 5.0 * leaf
    car = 10.0 + 1.0 * leaf
    cant = 1.0 + 0.5 * leaf
    water = 0.005 + 0.002 * leaf
    lma = 0.02 + 0.005 * leaf
    alpha = 40.0

    refl, tran = prospectd(alpha, N, cab, car, cant, water, lma,
                           nr, kab, kcar, kant, kw, km)
    refl = jax.block_until_ready(refl)
    tran = jax.block_until_ready(tran)

    refl_ref, tran_ref = _prospectd_ref(alpha, N, cab, car, cant, water, lma,
                                        nr, kab, kcar, kant, kw, km)

    assert refl.shape == (L, W) and tran.shape == (L, W)
    assert refl.dtype == jnp.float32 and tran.dtype == jnp.float32
    assert bool(jnp.all(jnp.isfinite(refl))) and bool(jnp.all(jnp.isfinite(tran)))
    assert jnp.allclose(refl, refl_ref, rtol=1e-3, atol=1e-5)
    assert jnp.allclose(tran, tran_ref, rtol=1e-3, atol=1e-5)

    print("KERNEL_OK")
</pallas_src>

<mosaic_0001>
module attributes {stable_mosaic.version = 11 : i64} {
  func.func @_prospectd_kernel(%arg0: i32, %arg1: memref<3x1xf32, #tpu.memory_space<vmem>>, %arg2: memref<3x1xf32, #tpu.memory_space<vmem>>, %arg3: memref<3x1xf32, #tpu.memory_space<vmem>>, %arg4: memref<3x1xf32, #tpu.memory_space<vmem>>, %arg5: memref<3x1xf32, #tpu.memory_space<vmem>>, %arg6: memref<3x1xf32, #tpu.memory_space<vmem>>, %arg7: memref<1x2176xf32, #tpu.memory_space<vmem>>, %arg8: memref<1x2176xf32, #tpu.memory_space<vmem>>, %arg9: memref<1x2176xf32, #tpu.memory_space<vmem>>, %arg10: memref<1x2176xf32, #tpu.memory_space<vmem>>, %arg11: memref<1x2176xf32, #tpu.memory_space<vmem>>, %arg12: memref<1x2176xf32, #tpu.memory_space<vmem>>, %arg13: memref<3x2176xf32, #tpu.memory_space<vmem>>, %arg14: memref<3x2176xf32, #tpu.memory_space<vmem>>) attributes {dimension_semantics = [#tpu.dimension_semantics<parallel>], iteration_bounds = array<i64: 1>, scalar_prefetch = 0 : i64, scratch_operands = 0 : i64, tpu.core_type = #tpu.core_type<tc>, window_params = [{pipeline_mode = #tpu.pipeline_mode<synchronous>, transform_indices = @transform_0, window_bounds = array<i64: 3, 1>}, {pipeline_mode = #tpu.pipeline_mode<synchronous>, transform_indices = @transform_1, window_bounds = array<i64: 3, 1>}, {pipeline_mode = #tpu.pipeline_mode<synchronous>, transform_indices = @transform_2, window_bounds = array<i64: 3, 1>}, {pipeline_mode = #tpu.pipeline_mode<synchronous>, transform_indices = @transform_3, window_bounds = array<i64: 3, 1>}, {pipeline_mode = #tpu.pipeline_mode<synchronous>, transform_indices = @transform_4, window_bounds = array<i64: 3, 1>}, {pipeline_mode = #tpu.pipeline_mode<synchronous>, transform_indices = @transform_5, window_bounds = array<i64: 3, 1>}, {transform_indices = @transform_6, window_bounds = array<i64: 1, 2176>}, {transform_indices = @transform_7, window_bounds = array<i64: 1, 2176>}, {transform_indices = @transform_8, window_bounds = array<i64: 1, 2176>}, {transform_indices = @transform_9, window_bounds = array<i64: 1, 2176>}, {transform_indices = @transform_10, window_bounds = array<i64: 1, 2176>}, {transform_indices = @transform_11, window_bounds = array<i64: 1, 2176>}, {transform_indices = @transform_12, window_bounds = array<i64: 3, 2176>}, {transform_indices = @transform_13, window_bounds = array<i64: 3, 2176>}]} {
    %c0 = arith.constant 0 : index
    %c0_0 = arith.constant 0 : index
    %0 = vector.load %arg1[%c0, %c0_0] : memref<3x1xf32, #tpu.memory_space<vmem>>, vector<3x1xf32>
    %cst = arith.constant 1.000000e+00 : f32
    %1 = vector.broadcast %cst : f32 to vector<3x1xf32>
    %2 = arith.divf %1, %0 : vector<3x1xf32>
    %c0_1 = arith.constant 0 : index
    %c0_2 = arith.constant 0 : index
    %3 = vector.load %arg2[%c0_1, %c0_2] : memref<3x1xf32, #tpu.memory_space<vmem>>, vector<3x1xf32>
    %c0_3 = arith.constant 0 : index
    %c0_4 = arith.constant 0 : index
    %4 = vector.load %arg3[%c0_3, %c0_4] : memref<3x1xf32, #tpu.memory_space<vmem>>, vector<3x1xf32>
    %c0_5 = arith.constant 0 : index
    %c0_6 = arith.constant 0 : index
    %5 = vector.load %arg4[%c0_5, %c0_6] : memref<3x1xf32, #tpu.memory_space<vmem>>, vector<3x1xf32>
    %c0_7 = arith.constant 0 : index
    %c0_8 = arith.constant 0 : index
    %6 = vector.load %arg5[%c0_7, %c0_8] : memref<3x1xf32, #tpu.memory_space<vmem>>, vector<3x1xf32>
    %c0_9 = arith.constant 0 : index
    %c0_10 = arith.constant 0 : index
    %7 = vector.load %arg6[%c0_9, %c0_10] : memref<3x1xf32, #tpu.memory_space<vmem>>, vector<3x1xf32>
    %c0_11 = arith.constant 0 : index
    %c0_12 = arith.constant 0 : index
    %8 = vector.load %arg7[%c0_11, %c0_12] : memref<1x2176xf32, #tpu.memory_space<vmem>>, vector<1x2176xf32>
    %c0_13 = arith.constant 0 : index
    %c0_14 = arith.constant 0 : index
    %9 = vector.load %arg8[%c0_13, %c0_14] : memref<1x2176xf32, #tpu.memory_space<vmem>>, vector<1x2176xf32>
    %c0_15 = arith.constant 0 : index
    %c0_16 = arith.constant 0 : index
    %10 = vector.load %arg9[%c0_15, %c0_16] : memref<1x2176xf32, #tpu.memory_space<vmem>>, vector<1x2176xf32>
    %c0_17 = arith.constant 0 : index
    %c0_18 = arith.constant 0 : index
    %11 = vector.load %arg10[%c0_17, %c0_18] : memref<1x2176xf32, #tpu.memory_space<vmem>>, vector<1x2176xf32>
    %c0_19 = arith.constant 0 : index
    %c0_20 = arith.constant 0 : index
    %12 = vector.load %arg11[%c0_19, %c0_20] : memref<1x2176xf32, #tpu.memory_space<vmem>>, vector<1x2176xf32>
    %c0_21 = arith.constant 0 : index
    %c0_22 = arith.constant 0 : index
    %13 = vector.load %arg12[%c0_21, %c0_22] : memref<1x2176xf32, #tpu.memory_space<vmem>>, vector<1x2176xf32>
    %14 = vector.broadcast %3 : vector<3x1xf32> to vector<3x2176xf32>
    %15 = vector.broadcast %9 : vector<1x2176xf32> to vector<3x2176xf32>
    %16 = arith.mulf %14, %15 : vector<3x2176xf32>
    %17 = vector.broadcast %4 : vector<3x1xf32> to vector<3x2176xf32>
    %18 = vector.broadcast %10 : vector<1x2176xf32> to vector<3x2176xf32>
    %19 = arith.mulf %17, %18 : vector<3x2176xf32>
    %20 = arith.addf %16, %19 : vector<3x2176xf32>
    %21 = vector.broadcast %5 : vector<3x1xf32> to vector<3x2176xf32>
    %22 = vector.broadcast %11 : vector<1x2176xf32> to vector<3x2176xf32>
    %23 = arith.mulf %21, %22 : vector<3x2176xf32>
    %24 = arith.addf %20, %23 : vector<3x2176xf32>
    %25 = vector.broadcast %6 : vector<3x1xf32> to vector<3x2176xf32>
    %26 = vector.broadcast %12 : vector<1x2176xf32> to vector<3x2176xf32>
    %27 = arith.mulf %25, %26 : vector<3x2176xf32>
    %28 = arith.addf %24, %27 : vector<3x2176xf32>
    %29 = vector.broadcast %7 : vector<3x1xf32> to vector<3x2176xf32>
    %30 = vector.broadcast %13 : vector<1x2176xf32> to vector<3x2176xf32>
    %31 = arith.mulf %29, %30 : vector<3x2176xf32>
    %32 = arith.addf %28, %31 : vector<3x2176xf32>
    %33 = vector.broadcast %2 : vector<3x1xf32> to vector<3x2176xf32>
    %34 = arith.mulf %32, %33 : vector<3x2176xf32>
    %cst_23 = arith.constant 9.99999974E-5 : f32
    %35 = vector.broadcast %cst_23 : f32 to vector<3x2176xf32>
    %36 = arith.maximumf %34, %35 : vector<3x2176xf32>
    %cst_24 = arith.constant 0.000000e+00 : f32
    %37 = vector.broadcast %cst_24 : f32 to vector<3x2176xf32>
    %38 = arith.subf %37, %36 : vector<3x2176xf32>
    %39 = math.exp %38 : vector<3x2176xf32>
    %cst_25 = arith.constant 1.000000e+00 : f32
    %40 = vector.broadcast %cst_25 : f32 to vector<3x2176xf32>
    %41 = arith.subf %40, %36 : vector<3x2176xf32>
    %42 = arith.mulf %41, %39 : vector<3x2176xf32>
    %43 = arith.mulf %36, %36 : vector<3x2176xf32>
    %44 = math.log %36 : vector<3x2176xf32>
    %cst_26 = arith.constant 0.000000e+00 : f32
    %45 = vector.broadcast %cst_26 : f32 to vector<3x2176xf32>
    %46 = arith.subf %45, %44 : vector<3x2176xf32>
    %cst_27 = arith.constant 1.078570e-03 : f32
    %47 = vector.broadcast %cst_27 : f32 to vector<3x2176xf32>
    %48 = arith.mulf %36, %47 : vector<3x2176xf32>
    %cst_28 = arith.constant -9.760040e-03 : f32
    %49 = vector.broadcast %cst_28 : f32 to vector<3x2176xf32>
    %50 = arith.addf %49, %48 : vector<3x2176xf32>
    %51 = arith.mulf %36, %50 : vector<3x2176xf32>
    %cst_29 = arith.constant 0.055199679 : f32
    %52 = vector.broadcast %cst_29 : f32 to vector<3x2176xf32>
    %53 = arith.addf %52, %51 : vector<3x2176xf32>
    %54 = arith.mulf %36, %53 : vector<3x2176xf32>
    %cst_30 = arith.constant -0.249910548 : f32
    %55 = vector.broadcast %cst_30 : f32 to vector<3x2176xf32>
    %56 = arith.addf %55, %54 : vector<3x2176xf32>
    %57 = arith.mulf %36, %56 : vector<3x2176xf32>
    %cst_31 = arith.constant 0.999991953 : f32
    %58 = vector.broadcast %cst_31 : f32 to vector<3x2176xf32>
    %59 = arith.addf %58, %57 : vector<3x2176xf32>
    %60 = arith.mulf %36, %59 : vector<3x2176xf32>
    %cst_32 = arith.constant -0.577215672 : f32
    %61 = vector.broadcast %cst_32 : f32 to vector<3x2176xf32>
    %62 = arith.addf %61, %60 : vector<3x2176xf32>
    %63 = arith.addf %46, %62 : vector<3x2176xf32>
    %cst_33 = arith.constant 8.57332897 : f32
    %64 = vector.broadcast %cst_33 : f32 to vector<3x2176xf32>
    %65 = arith.addf %64, %36 : vector<3x2176xf32>
    %66 = arith.mulf %36, %65 : vector<3x2176xf32>
    %cst_34 = arith.constant 18.0590172 : f32
    %67 = vector.broadcast %cst_34 : f32 to vector<3x2176xf32>
    %68 = arith.addf %67, %66 : vector<3x2176xf32>
    %69 = arith.mulf %36, %68 : vector<3x2176xf32>
    %cst_35 = arith.constant 8.63476085 : f32
    %70 = vector.broadcast %cst_35 : f32 to vector<3x2176xf32>
    %71 = arith.addf %70, %69 : vector<3x2176xf32>
    %72 = arith.mulf %36, %71 : vector<3x2176xf32>
    %cst_36 = arith.constant 0.267773747 : f32
    %73 = vector.broadcast %cst_36 : f32 to vector<3x2176xf32>
    %74 = arith.addf %73, %72 : vector<3x2176xf32>
    %cst_37 = arith.constant 9.57332229 : f32
    %75 = vector.broadcast %cst_37 : f32 to vector<3x2176xf32>
    %76 = arith.addf %75, %36 : vector<3x2176xf32>
    %77 = arith.mulf %36, %76 : vector<3x2176xf32>
    %cst_38 = arith.constant 25.6329556 : f32
    %78 = vector.broadcast %cst_38 : f32 to vector<3x2176xf32>
    %79 = arith.addf %78, %77 : vector<3x2176xf32>
    %80 = arith.mulf %36, %79 : vector<3x2176xf32>
    %cst_39 = arith.constant 21.0996532 : f32
    %81 = vector.broadcast %cst_39 : f32 to vector<3x2176xf32>
    %82 = arith.addf %81, %80 : vector<3x2176xf32>
    %83 = arith.mulf %36, %82 : vector<3x2176xf32>
    %cst_40 = arith.constant 3.95849681 : f32
    %84 = vector.broadcast %cst_40 : f32 to vector<3x2176xf32>
    %85 = arith.addf %84, %83 : vector<3x2176xf32>
    %86 = arith.mulf %39, %74 : vector<3x2176xf32>
    %87 = arith.mulf %85, %36 : vector<3x2176xf32>
    %88 = arith.divf %86, %87 : vector<3x2176xf32>
    %cst_41 = arith.constant 1.000000e+00 : f32
    %89 = vector.broadcast %cst_41 : f32 to vector<3x2176xf32>
    %90 = arith.cmpf ole, %36, %89 : vector<3x2176xf32>
    %91 = arith.select %90, %63, %88 : vector<3x2176xi1>, vector<3x2176xf32>
    %92 = arith.mulf %43, %91 : vector<3x2176xf32>
    %93 = arith.addf %42, %92 : vector<3x2176xf32>
    %94 = arith.mulf %8, %8 : vector<1x2176xf32>
    %cst_42 = arith.constant 1.000000e+00 : f32
    %95 = vector.broadcast %cst_42 : f32 to vector<1x2176xf32>
    %96 = arith.divf %95, %94 : vector<1x2176xf32>
    %cst_43 = arith.constant 1.000000e+00 : f32
    %97 = vector.broadcast %cst_43 : f32 to vector<1x2176xf32>
    %98 = arith.addf %94, %97 : vector<1x2176xf32>
    %cst_44 = arith.constant 1.000000e+00 : f32
    %99 = vector.broadcast %cst_44 : f32 to vector<1x2176xf32>
    %100 = arith.subf %94, %99 : vector<1x2176xf32>
    %cst_45 = arith.constant 1.000000e+00 : f32
    %101 = vector.broadcast %cst_45 : f32 to vector<1x2176xf32>
    %102 = arith.subf %94, %101 : vector<1x2176xf32>
    %103 = arith.mulf %100, %102 : vector<1x2176xf32>
    %cst_46 = arith.constant 1.000000e+00 : f32
    %104 = vector.broadcast %cst_46 : f32 to vector<1x2176xf32>
    %105 = arith.addf %8, %104 : vector<1x2176xf32>
    %cst_47 = arith.constant 5.000000e-01 : f32
    %106 = vector.broadcast %cst_47 : f32 to vector<1x2176xf32>
    %107 = arith.mulf %106, %105 : vector<1x2176xf32>
    %cst_48 = arith.constant 1.000000e+00 : f32
    %108 = vector.broadcast %cst_48 : f32 to vector<1x2176xf32>
    %109 = arith.addf %8, %108 : vector<1x2176xf32>
    %110 = arith.mulf %107, %109 : vector<1x2176xf32>
    %cst_49 = arith.constant -2.500000e-01 : f32
    %111 = vector.broadcast %cst_49 : f32 to vector<1x2176xf32>
    %112 = arith.mulf %111, %103 : vector<1x2176xf32>
    %113 = arith.mulf %112, %112 : vector<1x2176xf32>
    %cst_50 = arith.constant 1.000000e+00 : f32
    %114 = vector.broadcast %cst_50 : f32 to vector<1x2176xf32>
    %115 = arith.divf %114, %110 : vector<1x2176xf32>
    %cst_51 = arith.constant 1.000000e+00 : f32
    %116 = vector.broadcast %cst_51 : f32 to vector<1x2176xf32>
    %117 = arith.divf %116, %98 : vector<1x2176xf32>
    %cst_52 = arith.constant 1.000000e+00 : f32
    %118 = vector.broadcast %cst_52 : f32 to vector<1x2176xf32>
    %119 = arith.divf %118, %103 : vector<1x2176xf32>
    %120 = arith.mulf %117, %117 : vector<1x2176xf32>
    %121 = arith.mulf %120, %117 : vector<1x2176xf32>
    %122 = arith.mulf %94, %94 : vector<1x2176xf32>
    %cst_53 = arith.constant 2.000000e+00 : f32
    %123 = vector.broadcast %cst_53 : f32 to vector<1x2176xf32>
    %124 = arith.mulf %123, %98 : vector<1x2176xf32>
    %125 = arith.mulf %124, %110 : vector<1x2176xf32>
    %126 = arith.subf %125, %103 : vector<1x2176xf32>
    %cst_54 = arith.constant 1.000000e+00 : f32
    %127 = vector.broadcast %cst_54 : f32 to vector<1x2176xf32>
    %128 = arith.divf %127, %126 : vector<1x2176xf32>
    %cst_55 = arith.constant 0.166666672 : f32
    %129 = vector.broadcast %cst_55 : f32 to vector<1x2176xf32>
    %130 = arith.mulf %113, %129 : vector<1x2176xf32>
    %131 = arith.mulf %115, %115 : vector<1x2176xf32>
    %132 = arith.mulf %131, %115 : vector<1x2176xf32>
    %133 = arith.mulf %130, %132 : vector<1x2176xf32>
    %134 = arith.mulf %112, %115 : vector<1x2176xf32>
    %135 = arith.addf %133, %134 : vector<1x2176xf32>
    %cst_56 = arith.constant 5.000000e-01 : f32
    %136 = vector.broadcast %cst_56 : f32 to vector<1x2176xf32>
    %137 = arith.mulf %136, %110 : vector<1x2176xf32>
    %138 = arith.subf %135, %137 : vector<1x2176xf32>
    %cst_57 = arith.constant -2.000000e+00 : f32
    %139 = vector.broadcast %cst_57 : f32 to vector<1x2176xf32>
    %140 = arith.mulf %139, %94 : vector<1x2176xf32>
    %141 = arith.mulf %140, %98 : vector<1x2176xf32>
    %142 = arith.mulf %141, %119 : vector<1x2176xf32>
    %cst_58 = arith.constant 1.600000e+01 : f32
    %143 = vector.broadcast %cst_58 : f32 to vector<1x2176xf32>
    %144 = arith.mulf %143, %122 : vector<1x2176xf32>
    %cst_59 = arith.constant 1.000000e+00 : f32
    %145 = vector.broadcast %cst_59 : f32 to vector<1x2176xf32>
    %146 = arith.addf %122, %145 : vector<1x2176xf32>
    %147 = arith.mulf %144, %146 : vector<1x2176xf32>
    %148 = arith.mulf %147, %121 : vector<1x2176xf32>
    %149 = arith.mulf %148, %119 : vector<1x2176xf32>
    %cst_60 = arith.constant 1.600000e+01 : f32
    %150 = vector.broadcast %cst_60 : f32 to vector<1x2176xf32>
    %151 = arith.mulf %150, %94 : vector<1x2176xf32>
    %152 = arith.mulf %151, %122 : vector<1x2176xf32>
    %153 = arith.mulf %152, %121 : vector<1x2176xf32>
    %cst_61 = arith.constant 5.000000e-01 : f32
    %154 = vector.broadcast %cst_61 : f32 to vector<1x2176xf32>
    %155 = arith.mulf %154, %98 : vector<1x2176xf32>
    %cst_62 = arith.constant 1.000000e+00 : f32
    %156 = vector.broadcast %cst_62 : f32 to vector<1x2176xf32>
    %157 = arith.subf %156, %155 : vector<1x2176xf32>
    %cst_63 = arith.constant 0.000000e+00 : f32
    %158 = vector.broadcast %cst_63 : f32 to vector<1x2176xf32>
    %159 = arith.subf %158, %157 : vector<1x2176xf32>
    %cst_64 = arith.constant 1.000000e+00 : f32
    %160 = vector.broadcast %cst_64 : f32 to vector<1x2176xf32>
    %161 = arith.divf %160, %159 : vector<1x2176xf32>
    %cst_65 = arith.constant 2.000000e+00 : f32
    %162 = vector.broadcast %cst_65 : f32 to vector<1x2176xf32>
    %163 = arith.mulf %162, %98 : vector<1x2176xf32>
    %164 = arith.mulf %163, %159 : vector<1x2176xf32>
    %165 = arith.subf %164, %103 : vector<1x2176xf32>
    %cst_66 = arith.constant 1.000000e+00 : f32
    %166 = vector.broadcast %cst_66 : f32 to vector<1x2176xf32>
    %167 = arith.divf %166, %165 : vector<1x2176xf32>
    %cst_67 = arith.constant 0.166666672 : f32
    %168 = vector.broadcast %cst_67 : f32 to vector<1x2176xf32>
    %169 = arith.mulf %113, %168 : vector<1x2176xf32>
    %170 = arith.mulf %161, %161 : vector<1x2176xf32>
    %171 = arith.mulf %170, %161 : vector<1x2176xf32>
    %172 = arith.mulf %169, %171 : vector<1x2176xf32>
    %173 = arith.mulf %112, %161 : vector<1x2176xf32>
    %174 = arith.addf %172, %173 : vector<1x2176xf32>
    %cst_68 = arith.constant 5.000000e-01 : f32
    %175 = vector.broadcast %cst_68 : f32 to vector<1x2176xf32>
    %176 = arith.mulf %175, %159 : vector<1x2176xf32>
    %177 = arith.subf %174, %176 : vector<1x2176xf32>
    %178 = arith.subf %177, %138 : vector<1x2176xf32>
    %cst_69 = arith.constant -2.000000e+00 : f32
    %179 = vector.broadcast %cst_69 : f32 to vector<1x2176xf32>
    %180 = arith.mulf %179, %94 : vector<1x2176xf32>
    %181 = arith.subf %159, %110 : vector<1x2176xf32>
    %182 = arith.mulf %180, %181 : vector<1x2176xf32>
    %183 = arith.mulf %182, %120 : vector<1x2176xf32>
    %184 = arith.mulf %159, %115 : vector<1x2176xf32>
    %185 = math.log %184 : vector<1x2176xf32>
    %186 = arith.mulf %142, %185 : vector<1x2176xf32>
    %187 = arith.addf %183, %186 : vector<1x2176xf32>
    %cst_70 = arith.constant 5.000000e-01 : f32
    %188 = vector.broadcast %cst_70 : f32 to vector<1x2176xf32>
    %189 = arith.mulf %188, %94 : vector<1x2176xf32>
    %190 = arith.subf %161, %115 : vector<1x2176xf32>
    %191 = arith.mulf %189, %190 : vector<1x2176xf32>
    %192 = arith.addf %187, %191 : vector<1x2176xf32>
    %193 = arith.mulf %165, %128 : vector<1x2176xf32>
    %194 = math.log %193 : vector<1x2176xf32>
    %195 = arith.mulf %149, %194 : vector<1x2176xf32>
    %196 = arith.addf %192, %195 : vector<1x2176xf32>
    %197 = arith.subf %167, %128 : vector<1x2176xf32>
    %198 = arith.mulf %153, %197 : vector<1x2176xf32>
    %199 = arith.addf %196, %198 : vector<1x2176xf32>
    %200 = arith.addf %178, %199 : vector<1x2176xf32>
    %cst_71 = arith.constant 5.000000e-01 : f32
    %201 = vector.broadcast %cst_71 : f32 to vector<1x2176xf32>
    %202 = arith.mulf %200, %201 : vector<1x2176xf32>
    %cst_72 = arith.constant 5.000000e-01 : f32
    %203 = vector.broadcast %cst_72 : f32 to vector<1x2176xf32>
    %204 = arith.mulf %203, %98 : vector<1x2176xf32>
    %cst_73 = arith.constant 0.413175911 : f32
    %205 = vector.broadcast %cst_73 : f32 to vector<1x2176xf32>
    %206 = arith.subf %205, %204 : vector<1x2176xf32>
    %207 = arith.mulf %206, %206 : vector<1x2176xf32>
    %208 = arith.addf %207, %112 : vector<1x2176xf32>
    %209 = math.sqrt %208 : vector<1x2176xf32>
    %210 = arith.subf %209, %206 : vector<1x2176xf32>
    %cst_74 = arith.constant 1.000000e+00 : f32
    %211 = vector.broadcast %cst_74 : f32 to vector<1x2176xf32>
    %212 = arith.divf %211, %210 : vector<1x2176xf32>
    %cst_75 = arith.constant 2.000000e+00 : f32
    %213 = vector.broadcast %cst_75 : f32 to vector<1x2176xf32>
    %214 = arith.mulf %213, %98 : vector<1x2176xf32>
    %215 = arith.mulf %214, %210 : vector<1x2176xf32>
    %216 = arith.subf %215, %103 : vector<1x2176xf32>
    %cst_76 = arith.constant 1.000000e+00 : f32
    %217 = vector.broadcast %cst_76 : f32 to vector<1x2176xf32>
    %218 = arith.divf %217, %216 : vector<1x2176xf32>
    %cst_77 = arith.constant 0.166666672 : f32
    %219 = vector.broadcast %cst_77 : f32 to vector<1x2176xf32>
    %220 = arith.mulf %113, %219 : vector<1x2176xf32>
    %221 = arith.mulf %212, %212 : vector<1x2176xf32>
    %222 = arith.mulf %221, %212 : vector<1x2176xf32>
    %223 = arith.mulf %220, %222 : vector<1x2176xf32>
    %224 = arith.mulf %112, %212 : vector<1x2176xf32>
    %225 = arith.addf %223, %224 : vector<1x2176xf32>
    %cst_78 = arith.constant 5.000000e-01 : f32
    %226 = vector.broadcast %cst_78 : f32 to vector<1x2176xf32>
    %227 = arith.mulf %226, %210 : vector<1x2176xf32>
    %228 = arith.subf %225, %227 : vector<1x2176xf32>
    %229 = arith.subf %228, %138 : vector<1x2176xf32>
    %cst_79 = arith.constant -2.000000e+00 : f32
    %230 = vector.broadcast %cst_79 : f32 to vector<1x2176xf32>
    %231 = arith.mulf %230, %94 : vector<1x2176xf32>
    %232 = arith.subf %210, %110 : vector<1x2176xf32>
    %233 = arith.mulf %231, %232 : vector<1x2176xf32>
    %234 = arith.mulf %233, %120 : vector<1x2176xf32>
    %235 = arith.mulf %210, %115 : vector<1x2176xf32>
    %236 = math.log %235 : vector<1x2176xf32>
    %237 = arith.mulf %142, %236 : vector<1x2176xf32>
    %238 = arith.addf %234, %237 : vector<1x2176xf32>
    %cst_80 = arith.constant 5.000000e-01 : f32
    %239 = vector.broadcast %cst_80 : f32 to vector<1x2176xf32>
    %240 = arith.mulf %239, %94 : vector<1x2176xf32>
    %241 = arith.subf %212, %115 : vector<1x2176xf32>
    %242 = arith.mulf %240, %241 : vector<1x2176xf32>
    %243 = arith.addf %238, %242 : vector<1x2176xf32>
    %244 = arith.mulf %216, %128 : vector<1x2176xf32>
    %245 = math.log %244 : vector<1x2176xf32>
    %246 = arith.mulf %149, %245 : vector<1x2176xf32>
    %247 = arith.addf %243, %246 : vector<1x2176xf32>
    %248 = arith.subf %218, %128 : vector<1x2176xf32>
    %249 = arith.mulf %153, %248 : vector<1x2176xf32>
    %250 = arith.addf %247, %249 : vector<1x2176xf32>
    %251 = arith.addf %229, %250 : vector<1x2176xf32>
    %cst_81 = arith.constant 1.21013832 : f32
    %252 = vector.broadcast %cst_81 : f32 to vector<1x2176xf32>
    %253 = arith.mulf %251, %252 : vector<1x2176xf32>
    %cst_82 = arith.constant 1.000000e+00 : f32
    %254 = vector.broadcast %cst_82 : f32 to vector<1x2176xf32>
    %255 = arith.subf %254, %253 : vector<1x2176xf32>
    %cst_83 = arith.constant 1.000000e+00 : f32
    %256 = vector.broadcast %cst_83 : f32 to vector<1x2176xf32>
    %257 = arith.subf %256, %202 : vector<1x2176xf32>
    %258 = arith.mulf %202, %96 : vector<1x2176xf32>
    %cst_84 = arith.constant 1.000000e+00 : f32
    %259 = vector.broadcast %cst_84 : f32 to vector<1x2176xf32>
    %260 = arith.subf %259, %258 : vector<1x2176xf32>
    %261 = arith.mulf %260, %260 : vector<1x2176xf32>
    %262 = arith.mulf %93, %93 : vector<3x2176xf32>
    %263 = vector.broadcast %261 : vector<1x2176xf32> to vector<3x2176xf32>
    %264 = arith.mulf %263, %262 : vector<3x2176xf32>
    %cst_85 = arith.constant 1.000000e+00 : f32
    %265 = vector.broadcast %cst_85 : f32 to vector<3x2176xf32>
    %266 = arith.subf %265, %264 : vector<3x2176xf32>
    %cst_86 = arith.constant 1.000000e+00 : f32
    %267 = vector.broadcast %cst_86 : f32 to vector<3x2176xf32>
    %268 = arith.divf %267, %266 : vector<3x2176xf32>
    %269 = vector.broadcast %258 : vector<1x2176xf32> to vector<3x2176xf32>
    %270 = arith.mulf %93, %269 : vector<3x2176xf32>
    %271 = arith.mulf %270, %268 : vector<3x2176xf32>
    %272 = vector.broadcast %253 : vector<1x2176xf32> to vector<3x2176xf32>
    %273 = arith.mulf %272, %271 : vector<3x2176xf32>
    %274 = vector.broadcast %260 : vector<1x2176xf32> to vector<3x2176xf32>
    %275 = arith.mulf %274, %93 : vector<3x2176xf32>
    %276 = arith.mulf %275, %273 : vector<3x2176xf32>
    %277 = vector.broadcast %255 : vector<1x2176xf32> to vector<3x2176xf32>
    %278 = arith.addf %277, %276 : vector<3x2176xf32>
    %279 = vector.broadcast %202 : vector<1x2176xf32> to vector<3x2176xf32>
    %280 = arith.mulf %279, %271 : vector<3x2176xf32>
    %281 = vector.broadcast %260 : vector<1x2176xf32> to vector<3x2176xf32>
    %282 = arith.mulf %281, %93 : vector<3x2176xf32>
    %283 = arith.mulf %282, %280 : vector<3x2176xf32>
    %284 = vector.broadcast %257 : vector<1x2176xf32> to vector<3x2176xf32>
    %285 = arith.addf %284, %283 : vector<3x2176xf32>
    %286 = arith.addf %285, %280 : vector<3x2176xf32>
    %287 = arith.subf %285, %280 : vector<3x2176xf32>
    %cst_87 = arith.constant 1.000000e+00 : f32
    %288 = vector.broadcast %cst_87 : f32 to vector<3x2176xf32>
    %289 = arith.addf %288, %286 : vector<3x2176xf32>
    %cst_88 = arith.constant 1.000000e+00 : f32
    %290 = vector.broadcast %cst_88 : f32 to vector<3x2176xf32>
    %291 = arith.addf %290, %287 : vector<3x2176xf32>
    %292 = arith.mulf %289, %291 : vector<3x2176xf32>
    %cst_89 = arith.constant 1.000000e+00 : f32
    %293 = vector.broadcast %cst_89 : f32 to vector<3x2176xf32>
    %294 = arith.subf %293, %287 : vector<3x2176xf32>
    %295 = arith.mulf %292, %294 : vector<3x2176xf32>
    %cst_90 = arith.constant 1.000000e+00 : f32
    %296 = vector.broadcast %cst_90 : f32 to vector<3x2176xf32>
    %297 = arith.subf %296, %286 : vector<3x2176xf32>
    %298 = arith.mulf %295, %297 : vector<3x2176xf32>
    %cst_91 = arith.constant 0.000000e+00 : f32
    %299 = vector.broadcast %cst_91 : f32 to vector<3x2176xf32>
    %300 = arith.maximumf %298, %299 : vector<3x2176xf32>
    %301 = math.sqrt %300 : vector<3x2176xf32>
    %302 = arith.mulf %285, %285 : vector<3x2176xf32>
    %303 = arith.mulf %280, %280 : vector<3x2176xf32>
    %304 = arith.subf %302, %303 : vector<3x2176xf32>
    %cst_92 = arith.constant 1.000000e+00 : f32
    %305 = vector.broadcast %cst_92 : f32 to vector<3x2176xf32>
    %306 = arith.addf %305, %304 : vector<3x2176xf32>
    %307 = arith.addf %306, %301 : vector<3x2176xf32>
    %cst_93 = arith.constant 5.000000e-01 : f32
    %308 = vector.broadcast %cst_93 : f32 to vector<3x2176xf32>
    %309 = arith.divf %308, %285 : vector<3x2176xf32>
    %310 = arith.mulf %307, %309 : vector<3x2176xf32>
    %cst_94 = arith.constant 1.000000e+00 : f32
    %311 = vector.broadcast %cst_94 : f32 to vector<3x2176xf32>
    %312 = arith.subf %311, %304 : vector<3x2176xf32>
    %313 = arith.addf %312, %301 : vector<3x2176xf32>
    %cst_95 = arith.constant 5.000000e-01 : f32
    %314 = vector.broadcast %cst_95 : f32 to vector<3x2176xf32>
    %315 = arith.divf %314, %280 : vector<3x2176xf32>
    %316 = arith.mulf %313, %315 : vector<3x2176xf32>
    %cst_96 = arith.constant 1.000000e+00 : f32
    %317 = vector.broadcast %cst_96 : f32 to vector<3x1xf32>
    %318 = arith.subf %0, %317 : vector<3x1xf32>
    %cst_97 = arith.constant 9.99999971E-10 : f32
    %319 = vector.broadcast %cst_97 : f32 to vector<3x2176xf32>
    %320 = arith.maximumf %316, %319 : vector<3x2176xf32>
    %321 = math.log %320 : vector<3x2176xf32>
    %322 = vector.broadcast %318 : vector<3x1xf32> to vector<3x2176xf32>
    %323 = arith.mulf %322, %321 : vector<3x2176xf32>
    %324 = math.exp %323 : vector<3x2176xf32>
    %325 = arith.mulf %324, %324 : vector<3x2176xf32>
    %326 = arith.mulf %310, %310 : vector<3x2176xf32>
    %327 = arith.mulf %326, %325 : vector<3x2176xf32>
    %cst_98 = arith.constant 1.000000e+00 : f32
    %328 = vector.broadcast %cst_98 : f32 to vector<3x2176xf32>
    %329 = arith.subf %327, %328 : vector<3x2176xf32>
    %cst_99 = arith.constant 1.000000e+00 : f32
    %330 = vector.broadcast %cst_99 : f32 to vector<3x2176xf32>
    %331 = arith.divf %330, %329 : vector<3x2176xf32>
    %cst_100 = arith.constant 1.000000e+00 : f32
    %332 = vector.broadcast %cst_100 : f32 to vector<3x2176xf32>
    %333 = arith.subf %325, %332 : vector<3x2176xf32>
    %334 = arith.mulf %310, %333 : vector<3x2176xf32>
    %335 = arith.mulf %334, %331 : vector<3x2176xf32>
    %cst_101 = arith.constant 1.000000e+00 : f32
    %336 = vector.broadcast %cst_101 : f32 to vector<3x2176xf32>
    %337 = arith.subf %326, %336 : vector<3x2176xf32>
    %338 = arith.mulf %324, %337 : vector<3x2176xf32>
    %339 = arith.mulf %338, %331 : vector<3x2176xf32>
    %cst_102 = arith.constant 1.000000e+00 : f32
    %340 = vector.broadcast %cst_102 : f32 to vector<3x2176xf32>
    %341 = arith.subf %340, %280 : vector<3x2176xf32>
    %342 = vector.broadcast %318 : vector<3x1xf32> to vector<3x2176xf32>
    %343 = arith.mulf %341, %342 : vector<3x2176xf32>
    %344 = arith.addf %280, %343 : vector<3x2176xf32>
    %345 = arith.divf %280, %344 : vector<3x2176xf32>
    %cst_103 = arith.constant 1.000000e+00 : f32
    %346 = vector.broadcast %cst_103 : f32 to vector<3x2176xf32>
    %347 = arith.cmpf oge, %286, %346 : vector<3x2176xf32>
    %348 = arith.select %347, %345, %339 : vector<3x2176xi1>, vector<3x2176xf32>
    %cst_104 = arith.constant 1.000000e+00 : f32
    %349 = vector.broadcast %cst_104 : f32 to vector<3x2176xf32>
    %350 = arith.subf %349, %345 : vector<3x2176xf32>
    %351 = arith.select %347, %350, %335 : vector<3x2176xi1>, vector<3x2176xf32>
    %352 = arith.mulf %351, %285 : vector<3x2176xf32>
    %cst_105 = arith.constant 1.000000e+00 : f32
    %353 = vector.broadcast %cst_105 : f32 to vector<3x2176xf32>
    %354 = arith.subf %353, %352 : vector<3x2176xf32>
    %cst_106 = arith.constant 1.000000e+00 : f32
    %355 = vector.broadcast %cst_106 : f32 to vector<3x2176xf32>
    %356 = arith.divf %355, %354 : vector<3x2176xf32>
    %357 = arith.mulf %273, %356 : vector<3x2176xf32>
    %358 = arith.mulf %357, %348 : vector<3x2176xf32>
    %359 = arith.mulf %357, %351 : vector<3x2176xf32>
    %360 = arith.mulf %359, %280 : vector<3x2176xf32>
    %361 = arith.addf %278, %360 : vector<3x2176xf32>
    %c0_107 = arith.constant 0 : index
    %c0_108 = arith.constant 0 : index
    %362 = vector.load %arg13[%c0_107, %c0_108] : memref<3x2176xf32, #tpu.memory_space<vmem>>, vector<3x2176xf32>
    tpu.vector_store %arg13[%c0_107, %c0_108], %361 {strides = array<i32>} : memref<3x2176xf32, #tpu.memory_space<vmem>>, vector<3x2176xf32>,
    %c0_109 = arith.constant 0 : index
    %c0_110 = arith.constant 0 : index
    %363 = vector.load %arg14[%c0_109, %c0_110] : memref<3x2176xf32, #tpu.memory_space<vmem>>, vector<3x2176xf32>
    tpu.vector_store %arg14[%c0_109, %c0_110], %358 {strides = array<i32>} : memref<3x2176xf32, #tpu.memory_space<vmem>>, vector<3x2176xf32>,
    return
  }
  func.func @transform_0(%arg0: i32) -> (i32, i32) {
    %c0_i32 = arith.constant 0 : i32
    %c0_i32_0 = arith.constant 0 : i32
    %c0_i32_1 = arith.constant 0 : i32
    return %c0_i32, %c0_i32_0 : i32, i32
  }
  func.func @transform_1(%arg0: i32) -> (i32, i32) {
    %c0_i32 = arith.constant 0 : i32
    %c0_i32_0 = arith.constant 0 : i32
    %c0_i32_1 = arith.constant 0 : i32
    return %c0_i32, %c0_i32_0 : i32, i32
  }
  func.func @transform_2(%arg0: i32) -> (i32, i32) {
    %c0_i32 = arith.constant 0 : i32
    %c0_i32_0 = arith.constant 0 : i32
    %c0_i32_1 = arith.constant 0 : i32
    return %c0_i32, %c0_i32_0 : i32, i32
  }
  func.func @transform_3(%arg0: i32) -> (i32, i32) {
    %c0_i32 = arith.constant 0 : i32
    %c0_i32_0 = arith.constant 0 : i32
    %c0_i32_1 = arith.constant 0 : i32
    return %c0_i32, %c0_i32_0 : i32, i32
  }
  func.func @transform_4(%arg0: i32) -> (i32, i32) {
    %c0_i32 = arith.constant 0 : i32
    %c0_i32_0 = arith.constant 0 : i32
    %c0_i32_1 = arith.constant 0 : i32
    return %c0_i32, %c0_i32_0 : i32, i32
  }
  func.func @transform_5(%arg0: i32) -> (i32, i32) {
    %c0_i32 = arith.constant 0 : i32
    %c0_i32_0 = arith.constant 0 : i32
    %c0_i32_1 = arith.constant 0 : i32
    return %c0_i32, %c0_i32_0 : i32, i32
  }
  func.func @transform_6(%arg0: i32) -> (i32, i32) {
    %c0_i32 = arith.constant 0 : i32
    %c0_i32_0 = arith.constant 0 : i32
    return %c0_i32, %arg0 : i32, i32
  }
  func.func @transform_7(%arg0: i32) -> (i32, i32) {
    %c0_i32 = arith.constant 0 : i32
    %c0_i32_0 = arith.constant 0 : i32
    return %c0_i32, %arg0 : i32, i32
  }
  func.func @transform_8(%arg0: i32) -> (i32, i32) {
    %c0_i32 = arith.constant 0 : i32
    %c0_i32_0 = arith.constant 0 : i32
    return %c0_i32, %arg0 : i32, i32
  }
  func.func @transform_9(%arg0: i32) -> (i32, i32) {
    %c0_i32 = arith.constant 0 : i32
    %c0_i32_0 = arith.constant 0 : i32
    return %c0_i32, %arg0 : i32, i32
  }
  func.func @transform_10(%arg0: i32) -> (i32, i32) {
    %c0_i32 = arith.constant 0 : i32
    %c0_i32_0 = arith.constant 0 : i32
    return %c0_i32, %arg0 : i32, i32
  }
  func.func @transform_11(%arg0: i32) -> (i32, i32) {
    %c0_i32 = arith.constant 0 : i32
    %c0_i32_0 = arith.constant 0 : i32
    return %c0_i32, %arg0 : i32, i32
  }
  func.func @transform_12(%arg0: i32) -> (i32, i32) {
    %c0_i32 = arith.constant 0 : i32
    %c0_i32_0 = arith.constant 0 : i32
    return %c0_i32, %arg0 : i32, i32
  }
  func.func @transform_13(%arg0: i32) -> (i32, i32) {
    %c0_i32 = arith.constant 0 : i32
    %c0_i32_0 = arith.constant 0 : i32
    return %c0_i32, %arg0 : i32, i32
  }
}

</mosaic_0001>

<bundles_post_ra>
// kernel: tpu_custom_call.1
= control target key start
LH: loop header
LB: loop body
LE: loop exit
PB: predicated region body
PF: predicated region fallthrough
CT: control target
= control target key end

     0   :  { %19 = vsyncpa [#allocation3], 0  ;;  %s9025_s0 = inlined_call_operand.vmem [shape: f32[3,1], index: 0, kind: input, shape index: {}]   ;;  %s9026_s1 = inlined_call_operand.vmem [shape: f32[3,1], index: 1, kind: input, shape index: {}]   ;;  %s9027_s2 = inlined_call_operand.vmem [shape: f32[3,1], index: 2, kind: input, shape index: {}]   ;;  %s9028_s3 = inlined_call_operand.vmem [shape: f32[3,1], index: 3, kind: input, shape index: {}]   ;;  %s9029_s4 = inlined_call_operand.vmem [shape: f32[3,1], index: 4, kind: input, shape index: {}]   ;;  %s9030_s5 = inlined_call_operand.vmem [shape: f32[3,1], index: 5, kind: input, shape index: {}]   ;;  %s9031_s6 = inlined_call_operand.vmem [shape: f32[1,2176], index: 6, kind: input, shape index: {}]   ;;  %s9032_s7 = inlined_call_operand.vmem [shape: f32[1,2176], index: 7, kind: input, shape index: {}]   ;;  %s9033_s8 = inlined_call_operand.vmem [shape: f32[1,2176], index: 8, kind: input, shape index: {}]   ;;  %s9034_s9 = inlined_call_operand.hbm [shape: f32[1,2176], index: 9, kind: input, shape index: {}]   ;;  %s9035_s10 = inlined_call_operand.hbm [shape: f32[1,2176], index: 10, kind: input, shape index: {}]   ;;  %s9036_s11 = inlined_call_operand.vmem [shape: f32[1,2176], index: 11, kind: input, shape index: {}]   ;;  %s9037_s12 = inlined_call_operand.hbm [shape: f32[3,2176], index: 12, kind: output, shape index: {0}]   ;;  %s9038_s13 = inlined_call_operand.hbm [shape: f32[3,2176], index: 13, kind: output, shape index: {1}]  }
   0x1   :  { %20 = vsyncpa [#allocation6], 0 }
   0x2   :  { %21 = vsyncpa [#allocation4], 0 }
   0x3   :  { %22 = vsyncpa [#allocation9], 0  ;;  %s4619_s25 = smov [#allocation2]   ;;  %s4620_s27 = smov [#allocation5]  }
   0x4   :  { %s47_s26 = sshll.u32 %s4619_s25, 4  ;;  %s57_s28 = sshll.u32 %s4620_s27, 4  ;;  %s48_s26 = int_to_ptr.vmem [resolvable:$true] %s47_s26  ;;  %s58_s28 = int_to_ptr.vmem [resolvable:$true] %s57_s28 }
   0x5   :  { %s4523_s14 = scalar_lea.hbm %s9034_s9, 272 }
   0x6   :  { %p4524_p0 = scmp.ne.s32.totalorder %s9034_s9, %s4523_s14  ;;  %p4527_p1 = scmp.lt.u32.totalorder %s4523_s14, %s9034_s9 }
   0x8   :  { %p4529_p2 = pnand %p4527_p1, %p4524_p0 }
   0xa   :  { %4532 = shalt.err (!%p4529_p2)
}
   0xb   :  { %s4533_s19 = scalar_lea.vmem %s48_s26, 272  ;;  %s4537_s20 = scalar_lea.vmem %s48_s26, 288 }
   0xc   :  { %p4534_p3 = scmp.ne.s32.totalorder %s48_s26, %s4533_s19  ;;  %p4538_p4 = scmp.lt.s32.totalorder %s48_s26, %s48_s26 }
   0xd   :  { %p4539_p5 = scmp.lt.s32.totalorder %s4537_s20, %s4533_s19 }
   0xf   :  { %p4540_p6 = por %p4539_p5, %p4538_p4 }
  0x11   :  { %p4541_p7 = pnand %p4540_p6, %p4534_p3 }
  0x13   :  { %4544 = shalt.err (!%p4541_p7)
}
  0x14   :  { %50 = dma.hbm_to_vmem [thread:$0]  %s9034_s9, 272, %s48_s26, [#allocation3]  }
  0x15   :  { %s4545_s25 = scalar_lea.hbm %s9035_s10, 272 }
  0x16   :  { %p4546_p8 = scmp.ne.s32.totalorder %s9035_s10, %s4545_s25  ;;  %p4549_p9 = scmp.lt.u32.totalorder %s4545_s25, %s9035_s10 }
  0x18   :  { %p4551_p10 = pnand %p4549_p9, %p4546_p8 }
  0x1a   :  { %4554 = shalt.err (!%p4551_p10)
}
  0x1b   :  { %s4555_s15 = scalar_lea.vmem %s58_s28, 272  ;;  %s4559_s16 = scalar_lea.vmem %s58_s28, 288 }
  0x1c   :  { %p4556_p11 = scmp.ne.s32.totalorder %s58_s28, %s4555_s15  ;;  %p4560_p12 = scmp.lt.s32.totalorder %s58_s28, %s58_s28 }
  0x1d   :  { %p4561_p13 = scmp.lt.s32.totalorder %s4559_s16, %s4555_s15 }
  0x1f   :  { %p4562_p0 = por %p4561_p13, %p4560_p12 }
  0x21   :  { %p4563_p1 = pnand %p4562_p0, %p4556_p11 }
  0x23   :  { %4566 = shalt.err (!%p4563_p1)
}
  0x24   :  { %60 = dma.hbm_to_vmem [thread:$0]  %s9035_s10, 272, %s58_s28, [#allocation6]  }
  0x25   :  { %4611 = dma.done.wait [#allocation3], 272  }
  0x26   :  { %4612 = vsyncadd [#allocation3], 4294967024 }
  0x27   :  { %4613 = dma.done.wait [#allocation6], 272  }
  0x28   :  { %4614 = vsyncadd [#allocation6], 4294967024  ;;  %v4621_v0 = vmov 0   ;;  %v74_v1 = vld [vmem:[%s9028_s3] sm:$0x7]  ;;  %v103_v9 = vlaneseq  ;;  %v4760_v20 = vld [vmem:[%s9032_s7 + $0x8] sm:$0xff] }
  0x29   :  { %4028 = vset.pattern.permute.xlu1 %v4621_v0  ;;  %4027 = vset.pattern.permute.xlu0 %v4621_v0  ;;  %v72_v2 = vld [vmem:[%s9026_s1] sm:$0x7]  ;;  %v4792_v33 = vld [vmem:[%s9033_s8 + $0x8] sm:$0xff]  ;;  %v4810_v42 = vld [vmem:[#allocation2] sm:$0xff]  ;;  %s4623_s24 = smov [#allocation8]  }
  0x2a   :  { %334 = vperm.xlu1 %4028, %v74_v1   ;;  %97 = vperm.xlu0 %4027, %v72_v2   ;;  %v69_v3 = vld [vmem:[%s9025_s0] sm:$0x7]  ;;  %v104_v10 = vshrl.u32 %v103_v9, 7  ;;  %v4828_v51 = vld [vmem:[#allocation2 + $0x8] sm:$0xff]  ;;  %s3948_s3 = sshll.u32 %s4623_s24, 4  ;;  %s8989_s3 = int_to_ptr.vmem [resolvable:$true] %s3948_s3 }
  0x2b   :  { %v75_v4 = vld [vmem:[%s9029_s4] sm:$0x7]  ;;  %4029 = vrcp.f32 %v69_v3  ;;  %v3970_v7 = vadd.f32 -1.0, %v69_v3  ;;  %9390 = vst [vmem:[#allocation22_spill] sm:$0xff] %v4828_v51 }
  0x2c   :  { %v73_v5 = vld [vmem:[%s9027_s2] sm:$0x7]  ;;  %v4736_v11 = vsub.s32 0, %v104_v10  ;;  %v4738_v12 = vsub.s32 1, %v104_v10  ;;  %v4740_v13 = vsub.s32 2, %v104_v10  ;;  %v4747_v15 = vsub.s32 3, %v104_v10 }
  0x2d   :  { %v76_v6 = vld [vmem:[%s9030_s5] sm:$0x7]  ;;  %v4749_v16 = vsub.s32 4, %v104_v10  ;;  %v4751_v17 = vsub.s32 5, %v104_v10  ;;  %v4753_v18 = vsub.s32 6, %v104_v10  ;;  %v4755_v19 = vsub.s32 7, %v104_v10 }
  0x2e   :  { %461 = vperm.xlu1 %4028, %v75_v4   ;;  %207 = vperm.xlu0 %4027, %v73_v5   ;;  %9382 = vst [vmem:[#allocation14_spill] sm:$0xff] %v4736_v11  ;;  %9383 = vst [vmem:[#allocation15_spill] sm:$0xff] %v4738_v12  ;;  %v4745_v14 = vld [vmem:[%s9032_s7] sm:$0xff]  ;;  %v138_v30 = vrot.slane %v4760_v20, %v4736_v11  ;;  %v142_v31 = vrot.slane %v4760_v20, %v4738_v12  ;;  %v4864_v5 = vld [vmem:[#allocation5 + $0x8] sm:$0xff] }
  0x2f   :  { %9384 = vst [vmem:[#allocation16_spill] sm:$0xff] %v4740_v13  ;;  %9385 = vst [vmem:[#allocation17_spill] sm:$0xff] %v4747_v15  ;;  %v106_v21 = vrot.slane %v4745_v14, %v4736_v11  ;;  %v110_v22 = vrot.slane %v4745_v14, %v4738_v12  ;;  %v114_v23 = vrot.slane %v4745_v14, %v4740_v13  ;;  %v4771_v24 = vld [vmem:[%s9033_s8] sm:$0xff]  ;;  %v4906_v4 = vld [vmem:[%s9036_s11 + $0x8] sm:$0xff] }
  0x30   :  { %9386 = vst [vmem:[#allocation18_spill] sm:$0xff] %v4749_v16  ;;  %9387 = vst [vmem:[#allocation19_spill] sm:$0xff] %v4751_v17  ;;  %v118_v25 = vrot.slane %v4745_v14, %v4747_v15  ;;  %v122_v26 = vrot.slane %v4745_v14, %v4749_v16  ;;  %v126_v27 = vrot.slane %v4745_v14, %v4751_v17  ;;  %v4846_v60 = vld [vmem:[#allocation5] sm:$0xff]  ;;  %v3962_v10 = vld [vmem:[%s9032_s7 + $0x10] ss:$0 sm:$0xff] }
  0x31   :  { %9388 = vst [vmem:[#allocation20_spill] sm:$0xff] %v4753_v18  ;;  %9389 = vst [vmem:[#allocation21_spill] sm:$0xff] %v4755_v19  ;;  %v130_v28 = vrot.slane %v4745_v14, %v4753_v18  ;;  %v134_v29 = vrot.slane %v4745_v14, %v4755_v19  ;;  %v146_v32 = vrot.slane %v4760_v20, %v4740_v13 }
  0x32   :  { %588 = vperm.xlu0 %4027, %v76_v6   ;;  %v150_v34 = vrot.slane %v4760_v20, %v4747_v15  ;;  %v154_v35 = vrot.slane %v4760_v20, %v4749_v16  ;;  %v158_v36 = vrot.slane %v4760_v20, %v4751_v17  ;;  %v162_v37 = vrot.slane %v4760_v20, %v4753_v18 }
  0x33   :  { %v166_v38 = vrot.slane %v4760_v20, %v4755_v19  ;;  %v216_v39 = vrot.slane %v4771_v24, %v4736_v11  ;;  %v220_v40 = vrot.slane %v4771_v24, %v4738_v12  ;;  %v224_v41 = vrot.slane %v4771_v24, %v4740_v13  ;;  %9391 = vst [vmem:[#allocation23_spill] sm:$0xff] %v4846_v60 }
  0x34   :  { %v228_v43 = vrot.slane %v4771_v24, %v4747_v15  ;;  %v232_v44 = vrot.slane %v4771_v24, %v4749_v16  ;;  %v236_v45 = vrot.slane %v4771_v24, %v4751_v17  ;;  %v240_v46 = vrot.slane %v4771_v24, %v4753_v18  ;;  %9392 = vst [vmem:[#allocation24_spill] sm:$0xff] %v4864_v5 }
  0x35   :  { %v4030_v8 = vpop.eup %4029  ;;  %v244_v47 = vrot.slane %v4771_v24, %v4755_v19  ;;  %v248_v48 = vrot.slane %v4792_v33, %v4736_v11  ;;  %v252_v49 = vrot.slane %v4792_v33, %v4738_v12  ;;  %v256_v50 = vrot.slane %v4792_v33, %v4740_v13  ;;  %9394 = vst [vmem:[#allocation26_spill] sm:$0xff] %v4906_v4 }
  0x36   :  { %715 = vperm.xlu1 %4028, %v4030_v8   ;;  %3286 = vperm.xlu0 %4027, %v3970_v7   ;;  %v260_v52 = vrot.slane %v4792_v33, %v4747_v15  ;;  %v264_v53 = vrot.slane %v4792_v33, %v4749_v16  ;;  %v268_v54 = vrot.slane %v4792_v33, %v4751_v17  ;;  %v4885_v7 = vld [vmem:[%s9036_s11] sm:$0xff] }
  0x37   :  { %v272_v55 = vrot.slane %v4792_v33, %v4753_v18  ;;  %v276_v56 = vrot.slane %v4792_v33, %v4755_v19  ;;  %9393 = vst [vmem:[#allocation25_spill] sm:$0xff] %v4885_v7 }
  0xa9   :  { %v98_v1 = vpop.permute.xlu0 %97  ;;  %v335_v5 = vpop.permute.xlu1 %334 }
  0xaa   :  { %v188_v0 = vmul.f32 %v106_v21, %v98_v1  ;;  %v189_v6 = vmul.f32 %v110_v22, %v98_v1  ;;  %v190_v8 = vmul.f32 %v114_v23, %v98_v1  ;;  %v191_v21 = vmul.f32 %v118_v25, %v98_v1 }
  0xab   :  { %v192_v22 = vmul.f32 %v122_v26, %v98_v1  ;;  %v193_v23 = vmul.f32 %v126_v27, %v98_v1  ;;  %v194_v2 = vmul.f32 %v130_v28, %v98_v1  ;;  %v195_v9 = vmul.f32 %v134_v29, %v98_v1 }
  0xac   :  { %v196_v25 = vmul.f32 %v138_v30, %v98_v1  ;;  %v197_v26 = vmul.f32 %v142_v31, %v98_v1  ;;  %v198_v27 = vmul.f32 %v146_v32, %v98_v1  ;;  %v199_v28 = vmul.f32 %v150_v34, %v98_v1 }
  0xad   :  { %v208_v3 = vpop.permute.xlu0 %207  ;;  %v200_v14 = vmul.f32 %v154_v35, %v98_v1  ;;  %v201_v29 = vmul.f32 %v158_v36, %v98_v1  ;;  %v202_v30 = vmul.f32 %v162_v37, %v98_v1  ;;  %v203_v31 = vmul.f32 %v166_v38, %v98_v1  ;;  %v3963_v36 = vld [vmem:[%s9033_s8 + $0x10] ss:$0 sm:$0xff] }
  0xae   :  { %v204_v32 = vmul.f32 %v3962_v10, %v98_v1  ;;  %v298_v34 = vmul.f32 %v216_v39, %v208_v3  ;;  %v299_v35 = vmul.f32 %v220_v40, %v208_v3  ;;  %v300_v37 = vmul.f32 %v224_v41, %v208_v3 }
  0xaf   :  { %v301_v20 = vmul.f32 %v228_v43, %v208_v3  ;;  %v302_v38 = vmul.f32 %v232_v44, %v208_v3  ;;  %v303_v39 = vmul.f32 %v236_v45, %v208_v3  ;;  %v304_v40 = vmul.f32 %v240_v46, %v208_v3 }
  0xb0   :  { %v305_v41 = vmul.f32 %v244_v47, %v208_v3  ;;  %v306_v43 = vmul.f32 %v248_v48, %v208_v3  ;;  %v307_v44 = vmul.f32 %v252_v49, %v208_v3  ;;  %v308_v45 = vmul.f32 %v256_v50, %v208_v3 }
  0xb1   :  { %v309_v46 = vmul.f32 %v260_v52, %v208_v3  ;;  %v310_v24 = vmul.f32 %v264_v53, %v208_v3  ;;  %v311_v47 = vmul.f32 %v268_v54, %v208_v3  ;;  %v312_v48 = vmul.f32 %v272_v55, %v208_v3 }
  0xb2   :  { %v313_v49 = vmul.f32 %v276_v56, %v208_v3  ;;  %v314_v50 = vmul.f32 %v3963_v36, %v208_v3  ;;  %v315_v1 = vadd.f32 %v298_v34, %v188_v0  ;;  %v316_v10 = vadd.f32 %v299_v35, %v189_v6 }
  0xb3   :  { %v317_v52 = vadd.f32 %v300_v37, %v190_v8  ;;  %v318_v63 = vadd.f32 %v301_v20, %v191_v21  ;;  %v319_v62 = vadd.f32 %v302_v38, %v192_v22  ;;  %v320_v61 = vadd.f32 %v303_v39, %v193_v23  ;;  %v3964_v22 = vld [vmem:[#allocation2 + $0x10] ss:$0 sm:$0xff] }
  0xb4   :  { %v321_v53 = vadd.f32 %v304_v40, %v194_v2  ;;  %v322_v59 = vadd.f32 %v305_v41, %v195_v9  ;;  %v323_v58 = vadd.f32 %v306_v43, %v196_v25  ;;  %v324_v57 = vadd.f32 %v307_v44, %v197_v26 }
  0xb5   :  { %v325_v54 = vadd.f32 %v308_v45, %v198_v27  ;;  %v326_v4 = vadd.f32 %v309_v46, %v199_v28  ;;  %v327_v7 = vadd.f32 %v310_v24, %v200_v14  ;;  %v328_v55 = vadd.f32 %v311_v47, %v201_v29 }
  0xb6   :  { %v329_v60 = vadd.f32 %v312_v48, %v202_v30  ;;  %v330_v51 = vadd.f32 %v313_v49, %v203_v31  ;;  %v331_v33 = vadd.f32 %v314_v50, %v204_v32  ;;  %v9395_v56 = vrot.slane %v4810_v42, %v4736_v11  ;;  %v9403_v31 = vld [vmem:[#allocation22_spill] sm:$0xff] }
  0xb7   :  { %v9396_v3 = vrot.slane %v4810_v42, %v4738_v12  ;;  %v9397_v2 = vrot.slane %v4810_v42, %v4740_v13  ;;  %v9398_v9 = vrot.slane %v4810_v42, %v4747_v15  ;;  %v9399_v23 = vrot.slane %v4810_v42, %v4749_v16 }
  0xb8   :  { %v425_v0 = vmul.f32 %v9395_v56, %v335_v5  ;;  %v9400_v26 = vrot.slane %v4810_v42, %v4751_v17  ;;  %v9401_v28 = vrot.slane %v4810_v42, %v4753_v18  ;;  %v9402_v29 = vrot.slane %v4810_v42, %v4755_v19  ;;  %v462_v56 = vpop.permute.xlu1 %461 }
  0xb9   :  { %v426_v6 = vmul.f32 %v9396_v3, %v335_v5  ;;  %v427_v8 = vmul.f32 %v9397_v2, %v335_v5  ;;  %v428_v21 = vmul.f32 %v9398_v9, %v335_v5  ;;  %v429_v25 = vmul.f32 %v9399_v23, %v335_v5 }
  0xba   :  { %v430_v27 = vmul.f32 %v9400_v26, %v335_v5  ;;  %v431_v14 = vmul.f32 %v9401_v28, %v335_v5  ;;  %v432_v30 = vmul.f32 %v9402_v29, %v335_v5  ;;  %v9404_v32 = vrot.slane %v9403_v31, %v4736_v11 }
  0xbb   :  { %v9405_v35 = vrot.slane %v9403_v31, %v4738_v12  ;;  %v9406_v37 = vrot.slane %v9403_v31, %v4740_v13  ;;  %v9407_v38 = vrot.slane %v9403_v31, %v4747_v15  ;;  %v9408_v42 = vrot.slane %v9403_v31, %v4749_v16 }
  0xbc   :  { %v433_v34 = vmul.f32 %v9404_v32, %v335_v5  ;;  %v9409_v41 = vrot.slane %v9403_v31, %v4751_v17  ;;  %v9410_v44 = vrot.slane %v9403_v31, %v4753_v18  ;;  %v9411_v46 = vrot.slane %v9403_v31, %v4755_v19 }
  0xbd   :  { %v434_v36 = vmul.f32 %v9405_v35, %v335_v5  ;;  %v435_v20 = vmul.f32 %v9406_v37, %v335_v5  ;;  %v436_v39 = vmul.f32 %v9407_v38, %v335_v5  ;;  %v437_v40 = vmul.f32 %v9408_v42, %v335_v5 }
  0xbe   :  { %v438_v43 = vmul.f32 %v9409_v41, %v335_v5  ;;  %v439_v45 = vmul.f32 %v9410_v44, %v335_v5  ;;  %v440_v24 = vmul.f32 %v9411_v46, %v335_v5  ;;  %v441_v47 = vmul.f32 %v3964_v22, %v335_v5  ;;  %v9412_v44 = vld [vmem:[#allocation23_spill] sm:$0xff] }
  0xbf   :  { %v442_v48 = vadd.f32 %v425_v0, %v315_v1  ;;  %v443_v49 = vadd.f32 %v426_v6, %v316_v10  ;;  %v444_v50 = vadd.f32 %v427_v8, %v317_v52  ;;  %v445_v3 = vadd.f32 %v428_v21, %v318_v63 }
  0xc0   :  { %v446_v2 = vadd.f32 %v429_v25, %v319_v62  ;;  %v447_v9 = vadd.f32 %v430_v27, %v320_v61  ;;  %v448_v23 = vadd.f32 %v431_v14, %v321_v53  ;;  %v449_v26 = vadd.f32 %v432_v30, %v322_v59  ;;  %v3965_v61 = vld [vmem:[#allocation5 + $0x10] ss:$0 sm:$0xff] }
  0xc1   :  { %v450_v28 = vadd.f32 %v433_v34, %v323_v58  ;;  %v451_v29 = vadd.f32 %v434_v36, %v324_v57  ;;  %v452_v32 = vadd.f32 %v435_v20, %v325_v54  ;;  %v453_v35 = vadd.f32 %v436_v39, %v326_v4  ;;  %v589_v39 = vpop.permute.xlu0 %588 }
  0xc2   :  { %v454_v37 = vadd.f32 %v437_v40, %v327_v7  ;;  %v455_v38 = vadd.f32 %v438_v43, %v328_v55  ;;  %v456_v42 = vadd.f32 %v439_v45, %v329_v60  ;;  %v457_v41 = vadd.f32 %v440_v24, %v330_v51 }
  0xc3   :  { %v458_v31 = vadd.f32 %v441_v47, %v331_v33  ;;  %v9413_v5 = vrot.slane %v9412_v44, %v4736_v11  ;;  %v9414_v63 = vrot.slane %v9412_v44, %v4738_v12  ;;  %v9415_v58 = vrot.slane %v9412_v44, %v4740_v13  ;;  %v9421_v33 = vld [vmem:[#allocation24_spill] sm:$0xff] }
  0xc4   :  { %v9416_v59 = vrot.slane %v9412_v44, %v4747_v15  ;;  %v9417_v51 = vrot.slane %v9412_v44, %v4749_v16  ;;  %v9418_v7 = vrot.slane %v9412_v44, %v4751_v17  ;;  %v9419_v52 = vrot.slane %v9412_v44, %v4753_v18 }
  0xc5   :  { %v552_v1 = vmul.f32 %v9413_v5, %v462_v56  ;;  %v553_v62 = vmul.f32 %v9414_v63, %v462_v56  ;;  %v554_v57 = vmul.f32 %v9415_v58, %v462_v56  ;;  %v9420_v54 = vrot.slane %v9412_v44, %v4755_v19 }
  0xc6   :  { %v555_v4 = vmul.f32 %v9416_v59, %v462_v56  ;;  %v556_v60 = vmul.f32 %v9417_v51, %v462_v56  ;;  %v557_v10 = vmul.f32 %v9418_v7, %v462_v56  ;;  %v558_v53 = vmul.f32 %v9419_v52, %v462_v56 }
  0xc7   :  { %v559_v55 = vmul.f32 %v9420_v54, %v462_v56  ;;  %v9422_v0 = vrot.slane %v9421_v33, %v4736_v11  ;;  %v9423_v8 = vrot.slane %v9421_v33, %v4738_v12  ;;  %v9424_v22 = vrot.slane %v9421_v33, %v4740_v13 }
  0xc8   :  { %v9425_v27 = vrot.slane %v9421_v33, %v4747_v15  ;;  %v9426_v30 = vrot.slane %v9421_v33, %v4749_v16  ;;  %v9427_v36 = vrot.slane %v9421_v33, %v4751_v17  ;;  %v9428_v40 = vrot.slane %v9421_v33, %v4753_v18 }
  0xc9   :  { %v560_v6 = vmul.f32 %v9422_v0, %v462_v56  ;;  %v561_v21 = vmul.f32 %v9423_v8, %v462_v56  ;;  %v562_v25 = vmul.f32 %v9424_v22, %v462_v56  ;;  %v9429_v45 = vrot.slane %v9421_v33, %v4755_v19  ;;  %v9430_v8 = vld [vmem:[#allocation25_spill] sm:$0xff] }
  0xca   :  { %v563_v14 = vmul.f32 %v9425_v27, %v462_v56  ;;  %v564_v34 = vmul.f32 %v9426_v30, %v462_v56  ;;  %v565_v20 = vmul.f32 %v9427_v36, %v462_v56  ;;  %v566_v43 = vmul.f32 %v9428_v40, %v462_v56 }
  0xcb   :  { %v567_v46 = vmul.f32 %v9429_v45, %v462_v56  ;;  %v568_v24 = vmul.f32 %v3965_v61, %v462_v56  ;;  %v569_v47 = vadd.f32 %v552_v1, %v442_v48  ;;  %v570_v44 = vadd.f32 %v553_v62, %v443_v49  ;;  %v3966_v45 = vld [vmem:[%s9036_s11 + $0x10] ss:$0 sm:$0xff] }
  0xcc   :  { %v571_v5 = vadd.f32 %v554_v57, %v444_v50  ;;  %v572_v63 = vadd.f32 %v555_v4, %v445_v3  ;;  %v573_v58 = vadd.f32 %v556_v60, %v446_v2  ;;  %v574_v59 = vadd.f32 %v557_v10, %v447_v9 }
  0xcd   :  { %v575_v51 = vadd.f32 %v558_v53, %v448_v23  ;;  %v576_v7 = vadd.f32 %v559_v55, %v449_v26  ;;  %v577_v52 = vadd.f32 %v560_v6, %v450_v28  ;;  %v578_v54 = vadd.f32 %v561_v21, %v451_v29 }
  0xce   :  { %v579_v0 = vadd.f32 %v562_v25, %v452_v32  ;;  %v9431_v22 = vrot.slane %v9430_v8, %v4736_v11  ;;  %v9432_v33 = vrot.slane %v9430_v8, %v4738_v12  ;;  %v580_v56 = vadd.f32 %v563_v14, %v453_v35 }
  0xcf   :  { %v581_v48 = vadd.f32 %v564_v34, %v454_v37  ;;  %v582_v49 = vadd.f32 %v565_v20, %v455_v38  ;;  %v9433_v50 = vrot.slane %v9430_v8, %v4740_v13  ;;  %v583_v2 = vadd.f32 %v566_v43, %v456_v42 }
  0xd0   :  { %v679_v27 = vmul.f32 %v9431_v22, %v589_v39  ;;  %v680_v30 = vmul.f32 %v9432_v33, %v589_v39  ;;  %v9434_v9 = vrot.slane %v9430_v8, %v4747_v15  ;;  %v584_v29 = vadd.f32 %v567_v46, %v457_v41  ;;  %v716_v41 = vpop.permute.xlu1 %715 }
  0xd1   :  { %v681_v3 = vmul.f32 %v9433_v50, %v589_v39  ;;  %v585_v32 = vadd.f32 %v568_v24, %v458_v31  ;;  %v9435_v1 = vrot.slane %v9430_v8, %v4749_v16  ;;  %v9436_v37 = vrot.slane %v9430_v8, %v4751_v17  ;;  %v9439_v31 = vld [vmem:[#allocation26_spill] sm:$0xff] }
  0xd2   :  { %v682_v23 = vmul.f32 %v9434_v9, %v589_v39  ;;  %v696_v26 = vadd.f32 %v679_v27, %v569_v47  ;;  %v697_v28 = vadd.f32 %v680_v30, %v570_v44  ;;  %v9437_v42 = vrot.slane %v9430_v8, %v4753_v18 }
  0xd3   :  { %v683_v62 = vmul.f32 %v9435_v1, %v589_v39  ;;  %v698_v35 = vadd.f32 %v681_v3, %v571_v5  ;;  %v684_v38 = vmul.f32 %v9436_v37, %v589_v39  ;;  %v9438_v57 = vrot.slane %v9430_v8, %v4755_v19 }
  0xd4   :  { %v685_v61 = vmul.f32 %v9437_v42, %v589_v39  ;;  %v699_v60 = vadd.f32 %v682_v23, %v572_v63  ;;  %v9440_v10 = vrot.slane %v9439_v31, %v4736_v11  ;;  %v9441_v55 = vrot.slane %v9439_v31, %v4738_v12 }
  0xd5   :  { %v686_v4 = vmul.f32 %v9438_v57, %v589_v39  ;;  %v9442_v21 = vrot.slane %v9439_v31, %v4740_v13  ;;  %v700_v14 = vadd.f32 %v683_v62, %v573_v58  ;;  %v9443_v34 = vrot.slane %v9439_v31, %v4747_v15 }
  0xd6   :  { %v687_v53 = vmul.f32 %v9440_v10, %v589_v39  ;;  %v688_v6 = vmul.f32 %v9441_v55, %v589_v39  ;;  %v701_v20 = vadd.f32 %v684_v38, %v574_v59  ;;  %v718_v40 = vmul.f32 %v716_v41, %v696_v26 }
  0xd7   :  { %v689_v25 = vmul.f32 %v9442_v21, %v589_v39  ;;  %v690_v36 = vmul.f32 %v9443_v34, %v589_v39  ;;  %v719_v43 = vmul.f32 %v716_v41, %v697_v28  ;;  %v9444_v46 = vrot.slane %v9439_v31, %v4749_v16 }
  0xd8   :  { %v9445_v47 = vrot.slane %v9439_v31, %v4751_v17  ;;  %v702_v5 = vadd.f32 %v685_v61, %v575_v51  ;;  %v720_v63 = vmul.f32 %v716_v41, %v698_v35  ;;  %v9446_v58 = vrot.slane %v9439_v31, %v4753_v18 }
  0xd9   :  { %v691_v24 = vmul.f32 %v9444_v46, %v589_v39  ;;  %v703_v8 = vadd.f32 %v686_v4, %v576_v7  ;;  %v704_v22 = vadd.f32 %v687_v53, %v577_v52  ;;  %v721_v27 = vmul.f32 %v716_v41, %v699_v60 }
  0xda   :  { %v692_v44 = vmul.f32 %v9445_v47, %v589_v39  ;;  %v693_v59 = vmul.f32 %v9446_v58, %v589_v39  ;;  %v9447_v33 = vrot.slane %v9439_v31, %v4755_v19  ;;  %v705_v50 = vadd.f32 %v688_v6, %v578_v54 }
  0xdb   :  { %v706_v3 = vadd.f32 %v689_v25, %v579_v0  ;;  %v722_v9 = vmul.f32 %v716_v41, %v700_v14  ;;  %v695_v23 = vmul.f32 %v3966_v45, %v589_v39  ;;  %v723_v26 = vmul.f32 %v716_v41, %v701_v20 }
  0xdc   :  { %v694_v30 = vmul.f32 %v9447_v33, %v589_v39  ;;  %v5199_v28 = vmax.f32 %v718_v40, 0.0001  ;;  %v5201_v51 = vmax.f32 %v719_v43, 0.0001  ;;  %v707_v1 = vadd.f32 %v690_v36, %v580_v56 }
  0xdd   :  { %v708_v62 = vadd.f32 %v691_v24, %v581_v48  ;;  %v724_v35 = vmul.f32 %v716_v41, %v702_v5  ;;  %v5203_v37 = vmax.f32 %v720_v63, 0.0001  ;;  %v709_v7 = vadd.f32 %v692_v44, %v582_v49 }
  0xde   :  { %v725_v52 = vmul.f32 %v716_v41, %v703_v8  ;;  %v726_v38 = vmul.f32 %v716_v41, %v704_v22  ;;  %v5205_v42 = vmax.f32 %v721_v27, 0.0001  ;;  %v710_v61 = vadd.f32 %v693_v59, %v583_v2 }
  0xdf   :  { %v727_v54 = vmul.f32 %v716_v41, %v705_v50  ;;  %v728_v0 = vmul.f32 %v716_v41, %v706_v3  ;;  %v5207_v57 = vmax.f32 %v722_v9, 0.0001  ;;  %v711_v39 = vadd.f32 %v694_v30, %v584_v29 }
  0xe0   :  { %v5209_v4 = vmax.f32 %v723_v26, 0.0001  ;;  %v752_v60 = vsub.f32 0.0, %v5199_v28  ;;  %v753_v56 = vsub.f32 0.0, %v5201_v51  ;;  %v712_v48 = vadd.f32 %v695_v23, %v585_v32 }
  0xe1   :  { %v729_v31 = vmul.f32 %v716_v41, %v707_v1  ;;  %v5213_v10 = vmax.f32 %v724_v35, 0.0001  ;;  %v754_v49 = vsub.f32 0.0, %v5203_v37  ;;  %v730_v53 = vmul.f32 %v716_v41, %v708_v62 }
  0xe2   :  { %v5216_v55 = vmax.f32 %v725_v52, 0.0001  ;;  %v5218_v2 = vmax.f32 %v726_v38, 0.0001  ;;  %v755_v6 = vsub.f32 0.0, %v5205_v42  ;;  %v731_v29 = vmul.f32 %v716_v41, %v709_v7 }
  0xe3   :  { %v5221_v21 = vmax.f32 %v727_v54, 0.0001  ;;  %v5223_v25 = vmax.f32 %v728_v0, 0.0001  ;;  %v756_v14 = vsub.f32 0.0, %v5207_v57  ;;  %v732_v32 = vmul.f32 %v716_v41, %v710_v61 }
  0xe4   :  { %v757_v34 = vsub.f32 0.0, %v5209_v4  ;;  %v769_v36 = vmul.f32 1.442695, %v752_v60  ;;  %v771_v20 = vmul.f32 1.442695, %v753_v56  ;;  %v733_v40 = vmul.f32 %v716_v41, %v711_v39 }
  0xe5   :  { %v5227_v43 = vmax.f32 %v729_v31, 0.0001  ;;  %v758_v45 = vsub.f32 0.0, %v5213_v10  ;;  %v773_v46 = vmul.f32 1.442695, %v754_v49  ;;  %v734_v24 = vmul.f32 %v716_v41, %v712_v48 }
  0xe6   :  { %v5230_v47 = vmax.f32 %v730_v53, 0.0001  ;;  %v759_v44 = vsub.f32 0.0, %v5216_v55  ;;  %v775_v5 = vmul.f32 1.442695, %v755_v6  ;;  %v760_v58 = vsub.f32 0.0, %v5218_v2 }
  0xe7   :  { %v5233_v63 = vmax.f32 %v731_v29, 0.0001  ;;  %4031 = vpow2.f32 %v769_v36  ;;  %v777_v59 = vmul.f32 1.442695, %v756_v14  ;;  %v5236_v8 = vmax.f32 %v732_v32, 0.0001 }
  0xe8   :  { %v761_v22 = vsub.f32 0.0, %v5221_v21  ;;  %4033 = vpow2.f32 %v771_v20  ;;  %v779_v27 = vmul.f32 1.442695, %v757_v34  ;;  %v5239_v33 = vmax.f32 %v733_v40, 0.0001 }
  0xe9   :  { %v762_v41 = vsub.f32 0.0, %v5223_v25  ;;  %4035 = vpow2.f32 %v773_v46  ;;  %v781_v30 = vmul.f32 1.442695, %v758_v45  ;;  %v5242_v50 = vmax.f32 %v734_v24, 0.0001 }
  0xea   :  { %v763_v3 = vsub.f32 0.0, %v5227_v43  ;;  %4037 = vpow2.f32 %v775_v5  ;;  %v783_v9 = vmul.f32 1.442695, %v759_v44  ;;  %v764_v23 = vsub.f32 0.0, %v5230_v47 }
  0xeb   :  { %4039 = vpow2.f32 %v777_v59  ;;  %v785_v26 = vmul.f32 1.442695, %v760_v58  ;;  %v765_v1 = vsub.f32 0.0, %v5233_v63  ;;  %v787_v62 = vmul.f32 1.442695, %v761_v22 }
  0xec   :  { %4041 = vpow2.f32 %v779_v27  ;;  %v766_v35 = vsub.f32 0.0, %v5236_v8  ;;  %v767_v7 = vsub.f32 0.0, %v5239_v33  ;;  %v789_v52 = vmul.f32 1.442695, %v762_v41 }
  0xed   :  { %4043 = vpow2.f32 %v781_v30  ;;  %v768_v38 = vsub.f32 0.0, %v5242_v50  ;;  %v791_v61 = vmul.f32 1.442695, %v763_v3  ;;  %v5252_v54 = vmul.f32 %v5199_v28, %v5199_v28 }
  0xee   :  { %4045 = vpow2.f32 %v783_v9  ;;  %v793_v0 = vmul.f32 1.442695, %v764_v23  ;;  %v5256_v39 = vmul.f32 %v5201_v51, %v5201_v51  ;;  %v5260_v60 = vmul.f32 %v5203_v37, %v5203_v37 }
  0xef   :  { %9448 = vst [vmem:[#allocation22_spill] sm:$0xff] %v5252_v54  ;;  %4047 = vpow2.f32 %v785_v26  ;;  %v795_v56 = vmul.f32 1.442695, %v765_v1  ;;  %v803_v48 = vsub.f32 1.0, %v5199_v28  ;;  %v5265_v31 = vmul.f32 %v5205_v42, %v5205_v42 }
  0xf0   :  { %9449 = vst [vmem:[#allocation23_spill] sm:$0xff] %v5256_v39  ;;  %9450 = vst [vmem:[#allocation24_spill] sm:$0xff] %v5260_v60  ;;  %4049 = vpow2.f32 %v787_v62  ;;  %v797_v53 = vmul.f32 1.442695, %v766_v35  ;;  %v799_v6 = vmul.f32 1.442695, %v767_v7  ;;  %v5271_v29 = vmul.f32 %v5207_v57, %v5207_v57 }
  0xf1   :  { %9451 = vst [vmem:[#allocation25_spill] sm:$0xff] %v5265_v31  ;;  %v5267_v49 = vpop.eup %4031  ;;  %4051 = vpow2.f32 %v789_v52  ;;  %v801_v32 = vmul.f32 1.442695, %v768_v38  ;;  %v804_v34 = vsub.f32 1.0, %v5201_v51  ;;  %v805_v36 = vsub.f32 1.0, %v5203_v37 }
  0xf2   :  { %9452 = vst [vmem:[#allocation26_spill] sm:$0xff] %v5267_v49  ;;  %9453 = vst [vmem:[#allocation27_spill] sm:$0xff] %v5271_v29  ;;  %v5273_v14 = vpop.eup %4033  ;;  %4053 = vpow2.f32 %v791_v61  ;;  %v806_v40 = vsub.f32 1.0, %v5205_v42  ;;  %v807_v45 = vsub.f32 1.0, %v5207_v57  ;;  %v808_v46 = vsub.f32 1.0, %v5209_v4 }
  0xf3   :  { %9454 = vst [vmem:[#allocation28_spill] sm:$0xff] %v5273_v14  ;;  %v5277_v20 = vpop.eup %4035  ;;  %4055 = vpow2.f32 %v793_v0  ;;  %v809_v44 = vsub.f32 1.0, %v5213_v10  ;;  %v810_v5 = vsub.f32 1.0, %v5216_v55  ;;  %v811_v58 = vsub.f32 1.0, %v5218_v2 }
  0xf4   :  { %9455 = vst [vmem:[#allocation29_spill] sm:$0xff] %v5277_v20  ;;  %v5282_v24 = vpop.eup %4037  ;;  %4057 = vpow2.f32 %v795_v56  ;;  %v5303_v35 = vmul.f32 %v5209_v4, %v5209_v4  ;;  %v5309_v52 = vmul.f32 %v5213_v10, %v5213_v10  ;;  %v5313_v38 = vmul.f32 %v5216_v55, %v5216_v55 }
  0xf5   :  { %9456 = vst [vmem:[#allocation30_spill] sm:$0xff] %v5282_v24  ;;  %v5287_v59 = vpop.eup %4039  ;;  %4059 = vpow2.f32 %v797_v53  ;;  %v5317_v61 = vmul.f32 %v5218_v2, %v5218_v2  ;;  %v5323_v56 = vmul.f32 %v5267_v49, %v803_v48  ;;  %v5327_v53 = vmul.f32 %v5221_v21, %v5221_v21 }
  0xf6   :  { %9457 = vst [vmem:[#allocation31_spill] sm:$0xff] %v5287_v59  ;;  %v5292_v30 = vpop.eup %4041  ;;  %4061 = vpow2.f32 %v799_v6  ;;  %9460 = vst [vmem:[#allocation34_spill] sm:$0xff] %v5303_v35  ;;  %v5331_v6 = vmul.f32 %v5223_v25, %v5223_v25  ;;  %v5337_v62 = vmul.f32 %v5273_v14, %v804_v34  ;;  %v5341_v1 = vmul.f32 %v5227_v43, %v5227_v43 }
  0xf7   :  { %9458 = vst [vmem:[#allocation32_spill] sm:$0xff] %v5292_v30  ;;  %v5297_v26 = vpop.eup %4043  ;;  %4063 = vpow2.f32 %v801_v32  ;;  %9462 = vst [vmem:[#allocation36_spill] sm:$0xff] %v5309_v52  ;;  %v5345_v48 = vmul.f32 %v5230_v47, %v5230_v47  ;;  %v5351_v9 = vmul.f32 %v5277_v20, %v805_v36  ;;  %v5355_v3 = vmul.f32 %v5233_v63, %v5233_v63 }
  0xf8   :  { %9459 = vst [vmem:[#allocation33_spill] sm:$0xff] %v5297_v26  ;;  %v5305_v7 = vpop.eup %4045  ;;  %9463 = vst [vmem:[#allocation37_spill] sm:$0xff] %v5313_v38  ;;  %4065 = vlog2.f32 %v5199_v28  ;;  %v5359_v34 = vmul.f32 %v5236_v8, %v5236_v8  ;;  %v5365_v27 = vmul.f32 %v5282_v24, %v806_v40  ;;  %v5369_v22 = vmul.f32 %v5239_v33, %v5239_v33 }
  0xf9   :  { %9461 = vst [vmem:[#allocation35_spill] sm:$0xff] %v5305_v7  ;;  %9464 = vst [vmem:[#allocation38_spill] sm:$0xff] %v5317_v61  ;;  %v5320_v0 = vpop.eup %4047  ;;  %4067 = vlog2.f32 %v5201_v51  ;;  %v5373_v36 = vmul.f32 %v5242_v50, %v5242_v50  ;;  %v5379_v18 = vmul.f32 %v5287_v59, %v807_v45  ;;  %v905_v40 = vmul.f32 0.00107857, %v5199_v28 }
  0xfa   :  { %9465 = vst [vmem:[#allocation39_spill] sm:$0xff] %v5320_v0  ;;  %9466 = vst [vmem:[#allocation40_spill] sm:$0xff] %v5323_v56  ;;  %v5334_v32 = vpop.eup %4049  ;;  %4069 = vlog2.f32 %v5203_v37  ;;  %v906_v17 = vmul.f32 0.00107857, %v5201_v51  ;;  %v5387_v15 = vmul.f32 %v5292_v30, %v808_v46  ;;  %v907_v13 = vmul.f32 0.00107857, %v5203_v37 }
  0xfb   :  { %9467 = vst [vmem:[#allocation41_spill] sm:$0xff] %v5327_v53  ;;  %9468 = vst [vmem:[#allocation42_spill] sm:$0xff] %v5331_v6  ;;  %v5348_v23 = vpop.eup %4051  ;;  %4071 = vlog2.f32 %v5205_v42  ;;  %v908_v12 = vmul.f32 0.00107857, %v5205_v42  ;;  %v5395_v45 = vmul.f32 %v5297_v26, %v809_v44  ;;  %v5403_v46 = vmul.f32 %v5305_v7, %v810_v5 }
  0xfc   :  { %9469 = vst [vmem:[#allocation43_spill] sm:$0xff] %v5334_v32  ;;  %9470 = vst [vmem:[#allocation44_spill] sm:$0xff] %v5337_v62  ;;  %v5362_v41 = vpop.eup %4053  ;;  %4073 = vlog2.f32 %v5207_v57  ;;  %v5411_v44 = vmul.f32 %v5320_v0, %v811_v58  ;;  %v914_v6 = vmul.f32 0.00107857, %v5221_v21  ;;  %v9491_v5 = vsub.f32 1.0, %v5221_v21 }
  0xfd   :  { %9471 = vst [vmem:[#allocation45_spill] sm:$0xff] %v5341_v1  ;;  %9472 = vst [vmem:[#allocation46_spill] sm:$0xff] %v5345_v48  ;;  %v5376_v19 = vpop.eup %4055  ;;  %4075 = vlog2.f32 %v5209_v4  ;;  %v912_v48 = vmul.f32 0.00107857, %v5216_v55  ;;  %v916_v53 = vmul.f32 0.00107857, %v5227_v43 }
  0xfe   :  { %9473 = vst [vmem:[#allocation47_spill] sm:$0xff] %v5348_v23  ;;  %9474 = vst [vmem:[#allocation48_spill] sm:$0xff] %v5351_v9  ;;  %v5384_v16 = vpop.eup %4057  ;;  %4077 = vlog2.f32 %v5213_v10  ;;  %v917_v38 = vmul.f32 0.00107857, %v5230_v47  ;;  %v919_v52 = vmul.f32 0.00107857, %v5236_v8 }
  0xff   :  { %9475 = vst [vmem:[#allocation49_spill] sm:$0xff] %v5355_v3  ;;  %9476 = vst [vmem:[#allocation50_spill] sm:$0xff] %v5359_v34  ;;  %v5392_v11 = vpop.eup %4059  ;;  %4079 = vlog2.f32 %v5216_v55  ;;  %v911_v3 = vmul.f32 0.00107857, %v5213_v10  ;;  %v920_v62 = vmul.f32 0.00107857, %v5239_v33 }
 0x100   :  { %9477 = vst [vmem:[#allocation51_spill] sm:$0xff] %v5362_v41  ;;  %9478 = vst [vmem:[#allocation52_spill] sm:$0xff] %v5365_v27  ;;  %v5400_v34 = vpop.eup %4061  ;;  %4081 = vlog2.f32 %v5218_v2  ;;  %v918_v27 = vmul.f32 0.00107857, %v5233_v63  ;;  %v921_v29 = vmul.f32 0.00107857, %v5242_v50 }
 0x101   :  { %9479 = vst [vmem:[#allocation53_spill] sm:$0xff] %v5369_v22  ;;  %9480 = vst [vmem:[#allocation54_spill] sm:$0xff] %v5373_v36  ;;  %v909_v36 = vmul.f32 0.00107857, %v5207_v57  ;;  %v910_v22 = vmul.f32 0.00107857, %v5209_v4  ;;  %v5408_v1 = vpop.eup %4063  ;;  %4083 = vlog2.f32 %v5221_v21 }
 0x102   :  { %9481 = vst [vmem:[#allocation55_spill] sm:$0xff] %v5376_v19  ;;  %9482 = vst [vmem:[#allocation56_spill] sm:$0xff] %v5379_v18  ;;  %4085 = vlog2.f32 %v5223_v25  ;;  %v915_v18 = vmul.f32 0.00107857, %v5223_v25  ;;  %v922_v56 = vadd.f32 -0.00976004, %v905_v40 }
 0x103   :  { %9483 = vst [vmem:[#allocation57_spill] sm:$0xff] %v5384_v16  ;;  %9484 = vst [vmem:[#allocation58_spill] sm:$0xff] %v5387_v15  ;;  %v4066_v15 = vpop.eup %4065  ;;  %4087 = vlog2.f32 %v5227_v43  ;;  %v925_v60 = vadd.f32 -0.00976004, %v908_v12  ;;  %v926_v54 = vadd.f32 -0.00976004, %v909_v36 }
 0x104   :  { %9485 = vst [vmem:[#allocation59_spill] sm:$0xff] %v5392_v11  ;;  %9486 = vst [vmem:[#allocation60_spill] sm:$0xff] %v5395_v45  ;;  %v913_v45 = vmul.f32 0.00107857, %v5218_v2  ;;  %v4068_v58 = vpop.eup %4067  ;;  %4089 = vlog2.f32 %v5230_v47  ;;  %v9499_v0 = vsub.f32 1.0, %v5233_v63  ;;  %v9503_v30 = vsub.f32 1.0, %v5239_v33 }
 0x105   :  { %9487 = vst [vmem:[#allocation61_spill] sm:$0xff] %v5400_v34  ;;  %9488 = vst [vmem:[#allocation62_spill] sm:$0xff] %v5403_v46  ;;  %v5419_v46 = vmul.f32 %v5334_v32, %v9491_v5  ;;  %v4070_v5 = vpop.eup %4069  ;;  %4091 = vlog2.f32 %v5233_v63  ;;  %v5457_v12 = vmul.f32 0.6931472, %v4068_v58  ;;  %v931_v36 = vadd.f32 -0.00976004, %v914_v6 }
 0x106   :  { %9489 = vst [vmem:[#allocation63_spill] sm:$0xff] %v5408_v1  ;;  %9490 = vst [vmem:[#allocation64_spill] sm:$0xff] %v5411_v44  ;;  %v9493_v44 = vsub.f32 1.0, %v5223_v25  ;;  %4093 = vlog2.f32 %v5236_v8  ;;  %v935_v6 = vadd.f32 -0.00976004, %v918_v27  ;;  %vm1398_vm0 = vcmp.le.f32.partialorder %v5199_v28, 1.0 }
 0x107   :  { %9492 = vst [vmem:[#allocation65_spill] sm:$0xff] %v5419_v46  ;;  %v9495_v46 = vsub.f32 1.0, %v5227_v43  ;;  %4095 = vlog2.f32 %v5239_v33  ;;  %vm1399_vm1 = vcmp.le.f32.partialorder %v5201_v51, 1.0  ;;  %vm1400_vm2 = vcmp.le.f32.partialorder %v5203_v37, 1.0 }
 0x108   :  { %v5427_v61 = vmul.f32 %v5348_v23, %v9493_v44  ;;  %v4072_v44 = vpop.eup %4071  ;;  %v928_v23 = vadd.f32 -0.00976004, %v911_v3  ;;  %4097 = vlog2.f32 %v5242_v50  ;;  %v9501_v3 = vsub.f32 1.0, %v5236_v8 }
 0x109   :  { %v5435_v9 = vmul.f32 %v5362_v41, %v9495_v46  ;;  %v4074_v31 = vpop.eup %4073  ;;  %v923_v46 = vadd.f32 -0.00976004, %v906_v17  ;;  %v927_v41 = vadd.f32 -0.00976004, %v910_v22  ;;  %v5455_v17 = vmul.f32 %v5384_v16, %v9499_v0 }
 0x10a   :  { %9494 = vst [vmem:[#allocation66_spill] sm:$0xff] %v5427_v61  ;;  %v9497_v61 = vsub.f32 1.0, %v5230_v47  ;;  %v4076_v39 = vpop.eup %4075  ;;  %v5466_v7 = vmul.f32 0.6931472, %v4072_v44  ;;  %v5471_v0 = vmul.f32 %v5400_v34, %v9503_v30  ;;  %v5473_v58 = vmul.f32 0.6931472, %v4074_v31 }
 0x10b   :  { %9496 = vst [vmem:[#allocation67_spill] sm:$0xff] %v5435_v9  ;;  %v924_v9 = vadd.f32 -0.00976004, %v907_v13  ;;  %v4078_v32 = vpop.eup %4077  ;;  %9500 = vst [vmem:[#allocation69_spill] sm:$0xff] %v5455_v17  ;;  %v5459_v13 = vmul.f32 0.6931472, %v4070_v5 }
 0x10c   :  { %v5443_v35 = vmul.f32 %v5376_v19, %v9497_v61  ;;  %v5449_v61 = vmul.f32 0.6931472, %v4066_v15  ;;  %v930_v19 = vadd.f32 -0.00976004, %v913_v45  ;;  %v4080_v40 = vpop.eup %4079  ;;  %v5464_v15 = vmul.f32 %v5392_v11, %v9501_v3  ;;  %9504 = vst [vmem:[#allocation71_spill] sm:$0xff] %v5471_v0 }
 0x10d   :  { %v4082_v22 = vpop.eup %4081  ;;  %v933_v45 = vadd.f32 -0.00976004, %v916_v53  ;;  %v934_v5 = vadd.f32 -0.00976004, %v917_v38  ;;  %v9505_v16 = vsub.f32 1.0, %v5242_v50  ;;  %v941_v30 = vmul.f32 %v924_v9, %v5203_v37 }
 0x10e   :  { %9498 = vst [vmem:[#allocation68_spill] sm:$0xff] %v5443_v35  ;;  %v929_v35 = vadd.f32 -0.00976004, %v912_v48  ;;  %9502 = vst [vmem:[#allocation70_spill] sm:$0xff] %v5464_v15  ;;  %v932_v48 = vadd.f32 -0.00976004, %v915_v18  ;;  %v4084_v26 = vpop.eup %4083 }
 0x10f   :  { %v4086_v17 = vpop.eup %4085  ;;  %v5478_v3 = vmul.f32 %v5408_v1, %v9505_v16  ;;  %v5480_v44 = vmul.f32 0.6931472, %v4076_v39  ;;  %v936_v53 = vadd.f32 -0.00976004, %v919_v52  ;;  %v5483_v11 = vmul.f32 0.6931472, %v4078_v32 }
 0x110   :  { %v4088_v15 = vpop.eup %4087  ;;  %v937_v38 = vadd.f32 -0.00976004, %v920_v62  ;;  %v5487_v0 = vmul.f32 0.6931472, %v4080_v40  ;;  %v938_v16 = vadd.f32 -0.00976004, %v921_v29  ;;  %v939_v39 = vmul.f32 %v922_v56, %v5199_v28 }
 0x111   :  { %9506 = vst [vmem:[#allocation72_spill] sm:$0xff] %v5478_v3  ;;  %v4090_v27 = vpop.eup %4089  ;;  %v5491_v1 = vmul.f32 0.6931472, %v4082_v22  ;;  %v940_v32 = vmul.f32 %v923_v46, %v5201_v51  ;;  %v5496_v31 = vmul.f32 0.6931472, %v4084_v26  ;;  %v942_v40 = vmul.f32 %v925_v60, %v5205_v42 }
 0x112   :  { %v4092_v3 = vpop.eup %4091  ;;  %v943_v29 = vmul.f32 %v926_v54, %v5207_v57  ;;  %v5501_v56 = vmul.f32 0.6931472, %v4086_v17  ;;  %v944_v52 = vmul.f32 %v927_v41, %v5209_v4  ;;  %v945_v46 = vmul.f32 %v928_v23, %v5213_v10 }
 0x113   :  { %v4094_v18 = vpop.eup %4093  ;;  %v5506_v9 = vmul.f32 0.6931472, %v4088_v15  ;;  %v946_v62 = vmul.f32 %v929_v35, %v5216_v55  ;;  %v947_v60 = vmul.f32 %v930_v19, %v5218_v2  ;;  %v5511_v24 = vmul.f32 0.6931472, %v4090_v27 }
 0x114   :  { %v4096_v34 = vpop.eup %4095  ;;  %v948_v17 = vmul.f32 %v931_v36, %v5221_v21  ;;  %v949_v22 = vmul.f32 %v932_v48, %v5223_v25  ;;  %v5516_v41 = vmul.f32 0.6931472, %v4092_v3  ;;  %v5518_v23 = vmul.f32 0.6931472, %v4094_v18 }
 0x115   :  { %v4098_v59 = vpop.eup %4097  ;;  %9507 = vst [vmem:[#allocation73_spill] sm:$0xff] %v5506_v9  ;;  %9508 = vst [vmem:[#allocation74_spill] sm:$0xff] %v5511_v24  ;;  %v950_v26 = vmul.f32 %v933_v45, %v5227_v43  ;;  %v5522_v20 = vmul.f32 0.6931472, %v4096_v34  ;;  %v951_v27 = vmul.f32 %v934_v5, %v5230_v47  ;;  %v952_v48 = vmul.f32 %v935_v6, %v5233_v63 }
 0x116   :  { %9509 = vst [vmem:[#allocation75_spill] sm:$0xff] %v5516_v41  ;;  %v5524_v35 = vmul.f32 0.6931472, %v4098_v59  ;;  %v953_v3 = vmul.f32 %v936_v53, %v5236_v8  ;;  %v956_v18 = vadd.f32 0.05519968, %v939_v39  ;;  %v954_v15 = vmul.f32 %v937_v38, %v5239_v33 }
 0x117   :  { %9510 = vst [vmem:[#allocation76_spill] sm:$0xff] %v5522_v20  ;;  %v955_v34 = vmul.f32 %v938_v16, %v5242_v50  ;;  %v957_v45 = vadd.f32 0.05519968, %v940_v32  ;;  %v958_v14 = vadd.f32 0.05519968, %v941_v30  ;;  %vm1401_vm3 = vcmp.le.f32.partialorder %v5205_v42, 1.0 }
 0x118   :  { %9511 = vst [vmem:[#allocation77_spill] sm:$0xff] %v5524_v35  ;;  %v959_v5 = vadd.f32 0.05519968, %v942_v40  ;;  %v960_v49 = vadd.f32 0.05519968, %v943_v29  ;;  %v973_v38 = vmul.f32 %v956_v18, %v5199_v28  ;;  %vm1402_vm4 = vcmp.le.f32.partialorder %v5207_v57, 1.0 }
 0x119   :  { %v961_v53 = vadd.f32 0.05519968, %v944_v52  ;;  %v962_v39 = vadd.f32 0.05519968, %v945_v46  ;;  %v963_v9 = vadd.f32 0.05519968, %v946_v62  ;;  %v974_v59 = vmul.f32 %v957_v45, %v5201_v51 }
 0x11a   :  { %v964_v54 = vadd.f32 0.05519968, %v947_v60  ;;  %v965_v24 = vadd.f32 0.05519968, %v948_v17  ;;  %v966_v16 = vadd.f32 0.05519968, %v949_v22  ;;  %v975_v40 = vmul.f32 %v958_v14, %v5203_v37 }
 0x11b   :  { %v967_v32 = vadd.f32 0.05519968, %v950_v26  ;;  %v968_v41 = vadd.f32 0.05519968, %v951_v27  ;;  %v969_v19 = vadd.f32 0.05519968, %v952_v48  ;;  %v976_v29 = vmul.f32 %v959_v5, %v5205_v42 }
 0x11c   :  { %v970_v30 = vadd.f32 0.05519968, %v953_v3  ;;  %v971_v36 = vadd.f32 0.05519968, %v954_v15  ;;  %v972_v20 = vadd.f32 0.05519968, %v955_v34  ;;  %v977_v52 = vmul.f32 %v960_v49, %v5207_v57 }
 0x11d   :  { %v5546_v62 = vld [vmem:[%s9031_s6] sm:$0xff]  ;;  %v978_v22 = vmul.f32 %v961_v53, %v5209_v4  ;;  %v979_v46 = vmul.f32 %v962_v39, %v5213_v10  ;;  %v980_v26 = vmul.f32 %v963_v9, %v5216_v55  ;;  %v981_v60 = vmul.f32 %v964_v54, %v5218_v2  ;;  %v5555_v14 = vld [vmem:[%s9031_s6 + $0x8] sm:$0xff] }
 0x11e   :  { %9512 = vst [vmem:[#allocation78_spill] sm:$0xff] %v5546_v62  ;;  %9513 = vst [vmem:[#allocation79_spill] sm:$0xff] %v5555_v14  ;;  %v982_v49 = vmul.f32 %v965_v24, %v5221_v21  ;;  %v983_v17 = vmul.f32 %v966_v16, %v5223_v25  ;;  %v984_v15 = vmul.f32 %v967_v32, %v5227_v43  ;;  %v990_v27 = vadd.f32 -0.24991055, %v973_v38 }
 0x11f   :  { %v985_v48 = vmul.f32 %v968_v41, %v5230_v47  ;;  %v986_v3 = vmul.f32 %v969_v19, %v5233_v63  ;;  %v987_v9 = vmul.f32 %v970_v30, %v5236_v8  ;;  %v991_v18 = vadd.f32 -0.24991055, %v974_v59 }
 0x120   :  { %v988_v54 = vmul.f32 %v971_v36, %v5239_v33  ;;  %v989_v34 = vmul.f32 %v972_v20, %v5242_v50  ;;  %v992_v45 = vadd.f32 -0.24991055, %v975_v40  ;;  %v5567_v24 = vmul.f32 %v5546_v62, %v5546_v62 }
 0x121   :  { %v993_v5 = vadd.f32 -0.24991055, %v976_v29  ;;  %v994_v53 = vadd.f32 -0.24991055, %v977_v52  ;;  %v995_v39 = vadd.f32 -0.24991055, %v978_v22  ;;  %v5571_v41 = vmul.f32 %v5555_v14, %v5555_v14 }
 0x122   :  { %v996_v19 = vadd.f32 -0.24991055, %v979_v46  ;;  %v997_v38 = vadd.f32 -0.24991055, %v980_v26  ;;  %v998_v16 = vadd.f32 -0.24991055, %v981_v60  ;;  %v1007_v59 = vmul.f32 %v990_v27, %v5199_v28 }
 0x123   :  { %9514 = vst [vmem:[#allocation80_spill] sm:$0xff] %v5571_v41  ;;  %v999_v36 = vadd.f32 -0.24991055, %v982_v49  ;;  %v1000_v32 = vadd.f32 -0.24991055, %v983_v17  ;;  %v1008_v30 = vmul.f32 %v991_v18, %v5201_v51  ;;  %v1009_v29 = vmul.f32 %v992_v45, %v5203_v37 }
 0x124   :  { %v1001_v20 = vadd.f32 -0.24991055, %v984_v15  ;;  %v1002_v40 = vadd.f32 -0.24991055, %v985_v48  ;;  %v1003_v6 = vadd.f32 -0.24991055, %v986_v3  ;;  %v1010_v14 = vmul.f32 %v993_v5, %v5205_v42 }
 0x125   :  { %v1004_v62 = vadd.f32 -0.24991055, %v987_v9  ;;  %v1005_v52 = vadd.f32 -0.24991055, %v988_v54  ;;  %v1006_v22 = vadd.f32 -0.24991055, %v989_v34  ;;  %v1011_v46 = vmul.f32 %v994_v53, %v5207_v57 }
 0x126   :  { %v5581_v26 = vld [vmem:[%s9031_s6 + $0x10] sm:$0x1]  ;;  %v1012_v60 = vmul.f32 %v995_v39, %v5209_v4  ;;  %v1013_v49 = vmul.f32 %v996_v19, %v5213_v10  ;;  %v1014_v17 = vmul.f32 %v997_v38, %v5216_v55  ;;  %v1015_v15 = vmul.f32 %v998_v16, %v5218_v2  ;;  %s4622_s6 = smov [#allocation7]  }
 0x127   :  { %9515 = vst [vmem:[#allocation81_spill] sm:$0xff] %v5581_v26  ;;  %v1016_v27 = vmul.f32 %v999_v36, %v5221_v21  ;;  %v1017_v48 = vmul.f32 %v1000_v32, %v5223_v25  ;;  %v1018_v3 = vmul.f32 %v1001_v20, %v5227_v43  ;;  %v1024_v9 = vadd.f32 0.99999195, %v1007_v59  ;;  %s3938_s23 = sshll.u32 %s4622_s6, 4  ;;  %s8973_s23 = int_to_ptr.vmem [resolvable:$true] %s3938_s23 }
 0x128   :  { %v1019_v18 = vmul.f32 %v1002_v40, %v5230_v47  ;;  %v1020_v54 = vmul.f32 %v1003_v6, %v5233_v63  ;;  %v1021_v34 = vmul.f32 %v1004_v62, %v5236_v8  ;;  %v1025_v45 = vadd.f32 0.99999195, %v1008_v30  ;;  %s4567_s25 = scalar_lea.vmem %s8973_s23, 1088  ;;  %p4572_p3 = scmp.lt.s32.totalorder %s8973_s23, %s8973_s23 }
 0x129   :  { %v1022_v5 = vmul.f32 %v1005_v52, %v5239_v33  ;;  %v1023_v53 = vmul.f32 %v1006_v22, %v5242_v50  ;;  %v1026_v39 = vadd.f32 0.99999195, %v1009_v29  ;;  %v5597_v19 = vmul.f32 %v5581_v26, %v5581_v26  ;;  %p4568_p2 = scmp.ne.s32.totalorder %s8973_s23, %s4567_s25  ;;  %p4573_p4 = scmp.lt.s32.totalorder %s4567_s25, %s4567_s25 }
 0x12a   :  { %v1027_v38 = vadd.f32 0.99999195, %v1010_v14  ;;  %v1028_v16 = vadd.f32 0.99999195, %v1011_v46  ;;  %v1029_v36 = vadd.f32 0.99999195, %v1012_v60  ;;  %4099 = vrcp.f32 %v5567_v24 }
 0x12b   :  { %9516 = vst [vmem:[#allocation82_spill] sm:$0xff] %v5597_v19  ;;  %v1030_v59 = vadd.f32 0.99999195, %v1013_v49  ;;  %v1031_v32 = vadd.f32 0.99999195, %v1014_v17  ;;  %v1041_v62 = vmul.f32 %v1024_v9, %v5199_v28  ;;  %v1042_v52 = vmul.f32 %v1025_v45, %v5201_v51  ;;  %p4574_p5 = por %p4573_p4, %p4572_p3 }
 0x12c   :  { %v1032_v6 = vadd.f32 0.99999195, %v1015_v15  ;;  %v1033_v20 = vadd.f32 0.99999195, %v1016_v27  ;;  %v1034_v30 = vadd.f32 0.99999195, %v1017_v48  ;;  %v1043_v26 = vmul.f32 %v1026_v39, %v5203_v37 }
 0x12d   :  { %v1035_v40 = vadd.f32 0.99999195, %v1018_v3  ;;  %v1036_v29 = vadd.f32 0.99999195, %v1019_v18  ;;  %v1037_v22 = vadd.f32 0.99999195, %v1020_v54  ;;  %v1044_v60 = vmul.f32 %v1027_v38, %v5205_v42  ;;  %p4575_p6 = pnand %p4574_p5, %p4568_p2 }
 0x12e   :  { %v1038_v35 = vadd.f32 0.99999195, %v1021_v34  ;;  %v1039_v14 = vadd.f32 0.99999195, %v1022_v5  ;;  %v1040_v46 = vadd.f32 0.99999195, %v1023_v53  ;;  %v1045_v49 = vmul.f32 %v1028_v16, %v5207_v57 }
 0x12f   :  { %v1046_v17 = vmul.f32 %v1029_v36, %v5209_v4  ;;  %v1047_v15 = vmul.f32 %v1030_v59, %v5213_v10  ;;  %v1048_v27 = vmul.f32 %v1031_v32, %v5216_v55  ;;  %v1049_v48 = vmul.f32 %v1032_v6, %v5218_v2 }
 0x130   :  { %v1050_v3 = vmul.f32 %v1033_v20, %v5221_v21  ;;  %v1051_v9 = vmul.f32 %v1034_v30, %v5223_v25  ;;  %v1052_v18 = vmul.f32 %v1035_v40, %v5227_v43  ;;  %v1058_v54 = vadd.f32 -0.5772157, %v1041_v62 }
 0x131   :  { %v1053_v34 = vmul.f32 %v1036_v29, %v5230_v47  ;;  %v1054_v45 = vmul.f32 %v1037_v22, %v5233_v63  ;;  %v1055_v5 = vmul.f32 %v1038_v35, %v5236_v8  ;;  %v1059_v53 = vadd.f32 -0.5772157, %v1042_v52 }
 0x132   :  { %v1056_v39 = vmul.f32 %v1039_v14, %v5239_v33  ;;  %v1057_v38 = vmul.f32 %v1040_v46, %v5242_v50  ;;  %v1060_v16 = vadd.f32 -0.5772157, %v1043_v26  ;;  %4101 = vrcp.f32 %v5571_v41 }
 0x133   :  { %v1061_v36 = vadd.f32 -0.5772157, %v1044_v60  ;;  %v1062_v59 = vadd.f32 -0.5772157, %v1045_v49  ;;  %v1063_v32 = vadd.f32 -0.5772157, %v1046_v17  ;;  %4103 = vrcp.f32 %v5597_v19 }
 0x134   :  { %v5619_v6 = vpop.eup %4099  ;;  %v1064_v62 = vadd.f32 -0.5772157, %v1047_v15  ;;  %v1065_v20 = vadd.f32 -0.5772157, %v1048_v27  ;;  %v1066_v30 = vadd.f32 -0.5772157, %v1049_v48 }
 0x135   :  { %9517 = vst [vmem:[#allocation83_spill] sm:$0xff] %v5619_v6  ;;  %v9518_v35 = vsub.f32 0.0, %v5449_v61  ;;  %v1067_v52 = vadd.f32 -0.5772157, %v1050_v3  ;;  %v1068_v29 = vadd.f32 -0.5772157, %v1051_v9 }
 0x136   :  { %v1069_v22 = vadd.f32 -0.5772157, %v1052_v18  ;;  %v9520_v26 = vsub.f32 0.0, %v5457_v12  ;;  %v1070_v46 = vadd.f32 -0.5772157, %v1053_v34  ;;  %v9522_v17 = vsub.f32 0.0, %v5459_v13 }
 0x137   :  { %v5623_v40 = vadd.f32 %v1058_v54, %v9518_v35  ;;  %v1071_v60 = vadd.f32 -0.5772157, %v1054_v45  ;;  %v1072_v49 = vadd.f32 -0.5772157, %v1055_v5  ;;  %v1073_v15 = vadd.f32 -0.5772157, %v1056_v39 }
 0x138   :  { %v5627_v14 = vadd.f32 %v1059_v53, %v9520_v26  ;;  %v5631_v6 = vadd.f32 %v1060_v16, %v9522_v17  ;;  %v1074_v27 = vadd.f32 -0.5772157, %v1057_v38  ;;  %v9524_v61 = vsub.f32 0.0, %v5466_v7  ;;  %v9540_v38 = vld [vmem:[#allocation73_spill] sm:$0xff]  ;;  %v9551_v35 = vld [vmem:[#allocation76_spill] sm:$0xff] }
 0x139   :  { %9519 = vst [vmem:[#allocation84_spill] sm:$0xff] %v5623_v40  ;;  %v9526_v3 = vsub.f32 0.0, %v5473_v58  ;;  %v9528_v12 = vsub.f32 0.0, %v5480_v44  ;;  %v9530_v54 = vsub.f32 0.0, %v5483_v11  ;;  %v9532_v13 = vsub.f32 0.0, %v5487_v0 }
 0x13a   :  { %9521 = vst [vmem:[#allocation85_spill] sm:$0xff] %v5627_v14  ;;  %9523 = vst [vmem:[#allocation86_spill] sm:$0xff] %v5631_v6  ;;  %v5635_v48 = vadd.f32 %v1061_v36, %v9524_v61  ;;  %v9534_v7 = vsub.f32 0.0, %v5491_v1  ;;  %v9536_v58 = vsub.f32 0.0, %v5496_v31  ;;  %v9538_v44 = vsub.f32 0.0, %v5501_v56  ;;  %v9543_v36 = vld [vmem:[#allocation74_spill] sm:$0xff] }
 0x13b   :  { %v5639_v9 = vadd.f32 %v1062_v59, %v9526_v3  ;;  %v5643_v18 = vadd.f32 %v1063_v32, %v9528_v12  ;;  %v5647_v34 = vadd.f32 %v1064_v62, %v9530_v54  ;;  %v5651_v45 = vadd.f32 %v1065_v20, %v9532_v13  ;;  %v9546_v1 = vld [vmem:[#allocation75_spill] sm:$0xff] }
 0x13c   :  { %9525 = vst [vmem:[#allocation87_spill] sm:$0xff] %v5635_v48  ;;  %v5655_v5 = vadd.f32 %v1066_v30, %v9534_v7  ;;  %v5659_v53 = vadd.f32 %v1067_v52, %v9536_v58  ;;  %v5663_v39 = vadd.f32 %v1068_v29, %v9538_v44  ;;  %v9541_v11 = vsub.f32 0.0, %v9540_v38  ;;  %v5690_v17 = vpop.eup %4101 }
 0x13d   :  { %9527 = vst [vmem:[#allocation88_spill] sm:$0xff] %v5639_v9  ;;  %9529 = vst [vmem:[#allocation89_spill] sm:$0xff] %v5643_v18  ;;  %v1092_v0 = vadd.f32 8.573329, %v5199_v28  ;;  %v9544_v59 = vsub.f32 0.0, %v9543_v36  ;;  %v9547_v62 = vsub.f32 0.0, %v9546_v1 }
 0x13e   :  { %9531 = vst [vmem:[#allocation90_spill] sm:$0xff] %v5647_v34  ;;  %9533 = vst [vmem:[#allocation91_spill] sm:$0xff] %v5651_v45  ;;  %v5667_v16 = vadd.f32 %v1069_v22, %v9541_v11  ;;  %v9549_v31 = vsub.f32 0.0, %v5518_v23  ;;  %v1093_v56 = vadd.f32 8.573329, %v5201_v51  ;;  %v9552_v52 = vsub.f32 0.0, %v9551_v35 }
 0x13f   :  { %9535 = vst [vmem:[#allocation92_spill] sm:$0xff] %v5655_v5  ;;  %9537 = vst [vmem:[#allocation93_spill] sm:$0xff] %v5659_v53  ;;  %v5672_v32 = vadd.f32 %v1070_v46, %v9544_v59  ;;  %v5676_v20 = vadd.f32 %v1071_v60, %v9547_v62  ;;  %v1094_v22 = vadd.f32 8.573329, %v5203_v37  ;;  %v1095_v26 = vadd.f32 8.573329, %v5205_v42 }
 0x140   :  { %9539 = vst [vmem:[#allocation94_spill] sm:$0xff] %v5663_v39  ;;  %9542 = vst [vmem:[#allocation73_spill] sm:$0xff] %v5667_v16  ;;  %v5680_v30 = vadd.f32 %v1072_v49, %v9549_v31  ;;  %v5685_v29 = vadd.f32 %v1073_v15, %v9552_v52  ;;  %v1096_v46 = vadd.f32 8.573329, %v5207_v57  ;;  %v9555_v60 = vld [vmem:[#allocation77_spill] sm:$0xff]  ;;  %v5699_v15 = vpop.eup %4103  ;;  %v1109_v58 = vmul.f32 %v1092_v0, %v5199_v28 }
 0x141   :  { %9545 = vst [vmem:[#allocation74_spill] sm:$0xff] %v5672_v32  ;;  %9548 = vst [vmem:[#allocation75_spill] sm:$0xff] %v5676_v20  ;;  %v9556_v61 = vsub.f32 0.0, %v9555_v60  ;;  %v1097_v23 = vadd.f32 8.573329, %v5209_v4  ;;  %v1110_v11 = vmul.f32 %v1093_v56, %v5201_v51  ;;  %v1111_v62 = vmul.f32 %v1094_v22, %v5203_v37 }
 0x142   :  { %9550 = vst [vmem:[#allocation95_spill] sm:$0xff] %v5680_v30  ;;  %9553 = vst [vmem:[#allocation76_spill] sm:$0xff] %v5685_v29  ;;  %v1098_v49 = vadd.f32 8.573329, %v5213_v10  ;;  %v1099_v12 = vadd.f32 8.573329, %v5216_v55  ;;  %v1112_v31 = vmul.f32 %v1095_v26, %v5205_v42  ;;  %v1113_v0 = vmul.f32 %v1096_v46, %v5207_v57 }
 0x143   :  { %9554 = vst [vmem:[#allocation96_spill] sm:$0xff] %v5690_v17  ;;  %v5694_v3 = vadd.f32 %v1074_v27, %v9556_v61  ;;  %9558 = vst [vmem:[#allocation97_spill] sm:$0xff] %v5699_v15  ;;  %v1100_v54 = vadd.f32 8.573329, %v5218_v2  ;;  %v1101_v13 = vadd.f32 8.573329, %v5221_v21  ;;  %v1114_v35 = vmul.f32 %v1097_v23, %v5209_v4 }
 0x144   :  { %v1102_v7 = vadd.f32 8.573329, %v5223_v25  ;;  %v1103_v44 = vadd.f32 8.573329, %v5227_v43  ;;  %v1104_v27 = vadd.f32 8.573329, %v5230_v47  ;;  %v1115_v52 = vmul.f32 %v1098_v49, %v5213_v10 }
 0x145   :  { %9557 = vst [vmem:[#allocation77_spill] sm:$0xff] %v5694_v3  ;;  %v1105_v38 = vadd.f32 8.573329, %v5233_v63  ;;  %v1106_v36 = vadd.f32 8.573329, %v5236_v8  ;;  %v1116_v60 = vmul.f32 %v1099_v12, %v5216_v55  ;;  %v1117_v56 = vmul.f32 %v1100_v54, %v5218_v2 }
 0x146   :  { %v1107_v59 = vadd.f32 8.573329, %v5239_v33  ;;  %v1108_v1 = vadd.f32 8.573329, %v5242_v50  ;;  %v1118_v61 = vmul.f32 %v1101_v13, %v5221_v21  ;;  %v1119_v15 = vmul.f32 %v1102_v7, %v5223_v25 }
 0x147   :  { %v1120_v17 = vmul.f32 %v1103_v44, %v5227_v43  ;;  %v1121_v22 = vmul.f32 %v1104_v27, %v5230_v47  ;;  %v1122_v26 = vmul.f32 %v1105_v38, %v5233_v63  ;;  %v1126_v3 = vadd.f32 18.059017, %v1109_v58 }
 0x148   :  { %v1123_v46 = vmul.f32 %v1106_v36, %v5236_v8  ;;  %v1124_v23 = vmul.f32 %v1107_v59, %v5239_v33  ;;  %v1127_v49 = vadd.f32 18.059017, %v1110_v11  ;;  %v1128_v29 = vadd.f32 18.059017, %v1111_v62 }
 0x149   :  { %v1125_v12 = vmul.f32 %v1108_v1, %v5242_v50  ;;  %v1129_v54 = vadd.f32 18.059017, %v1112_v31  ;;  %v1130_v30 = vadd.f32 18.059017, %v1113_v0  ;;  %v1131_v13 = vadd.f32 18.059017, %v1114_v35 }
 0x14a   :  { %v1132_v20 = vadd.f32 18.059017, %v1115_v52  ;;  %v1133_v7 = vadd.f32 18.059017, %v1116_v60  ;;  %v1134_v32 = vadd.f32 18.059017, %v1117_v56  ;;  %v5729_v44 = vmul.f32 %v5567_v24, %v5567_v24 }
 0x14b   :  { %v1135_v27 = vadd.f32 18.059017, %v1118_v61  ;;  %v1136_v58 = vadd.f32 18.059017, %v1119_v15  ;;  %v1137_v38 = vadd.f32 18.059017, %v1120_v17  ;;  %v1143_v36 = vmul.f32 %v1126_v3, %v5199_v28 }
 0x14c   :  { %9559 = vst [vmem:[#allocation98_spill] sm:$0xff] %v5729_v44  ;;  %v1138_v59 = vadd.f32 18.059017, %v1121_v22  ;;  %v1139_v11 = vadd.f32 18.059017, %v1122_v26  ;;  %v1144_v1 = vmul.f32 %v1127_v49, %v5201_v51  ;;  %v1145_v35 = vmul.f32 %v1128_v29, %v5203_v37 }
 0x14d   :  { %v1140_v62 = vadd.f32 18.059017, %v1123_v46  ;;  %v1141_v31 = vadd.f32 18.059017, %v1124_v23  ;;  %v1142_v0 = vadd.f32 18.059017, %v1125_v12  ;;  %v1146_v52 = vmul.f32 %v1129_v54, %v5205_v42 }
 0x14e   :  { %v1147_v60 = vmul.f32 %v1130_v30, %v5207_v57  ;;  %v1148_v56 = vmul.f32 %v1131_v13, %v5209_v4  ;;  %v1149_v15 = vmul.f32 %v1132_v20, %v5213_v10  ;;  %v1150_v17 = vmul.f32 %v1133_v7, %v5216_v55 }
 0x14f   :  { %v1151_v3 = vmul.f32 %v1134_v32, %v5218_v2  ;;  %v1152_v61 = vmul.f32 %v1135_v27, %v5221_v21  ;;  %v1153_v22 = vmul.f32 %v1136_v58, %v5223_v25  ;;  %v1154_v26 = vmul.f32 %v1137_v38, %v5227_v43 }
 0x150   :  { %v1155_v29 = vmul.f32 %v1138_v59, %v5230_v47  ;;  %v1156_v46 = vmul.f32 %v1139_v11, %v5233_v63  ;;  %v1157_v30 = vmul.f32 %v1140_v62, %v5236_v8  ;;  %v1160_v23 = vadd.f32 8.634761, %v1143_v36 }
 0x151   :  { %v1158_v49 = vmul.f32 %v1141_v31, %v5239_v33  ;;  %v1161_v20 = vadd.f32 8.634761, %v1144_v1  ;;  %v1162_v12 = vadd.f32 8.634761, %v1145_v35  ;;  %v1163_v54 = vadd.f32 8.634761, %v1146_v52 }
 0x152   :  { %v1159_v32 = vmul.f32 %v1142_v0, %v5242_v50  ;;  %v1164_v13 = vadd.f32 8.634761, %v1147_v60  ;;  %v1165_v7 = vadd.f32 8.634761, %v1148_v56  ;;  %v1166_v27 = vadd.f32 8.634761, %v1149_v15 }
 0x153   :  { %v1167_v58 = vadd.f32 8.634761, %v1150_v17  ;;  %v1168_v44 = vadd.f32 8.634761, %v1151_v3  ;;  %v1169_v38 = vadd.f32 8.634761, %v1152_v61  ;;  %v5750_v59 = vmul.f32 %v5571_v41, %v5571_v41 }
 0x154   :  { %v1170_v11 = vadd.f32 8.634761, %v1153_v22  ;;  %v1171_v62 = vadd.f32 8.634761, %v1154_v26  ;;  %v1172_v36 = vadd.f32 8.634761, %v1155_v29  ;;  %v1177_v31 = vmul.f32 %v1160_v23, %v5199_v28 }
 0x155   :  { %9560 = vst [vmem:[#allocation99_spill] sm:$0xff] %v5750_v59  ;;  %v1173_v1 = vadd.f32 8.634761, %v1156_v46  ;;  %v1174_v35 = vadd.f32 8.634761, %v1157_v30  ;;  %v1178_v52 = vmul.f32 %v1161_v20, %v5201_v51  ;;  %v1179_v0 = vmul.f32 %v1162_v12, %v5203_v37 }
 0x156   :  { %v1175_v60 = vadd.f32 8.634761, %v1158_v49  ;;  %v1176_v56 = vadd.f32 8.634761, %v1159_v32  ;;  %v1180_v15 = vmul.f32 %v1163_v54, %v5205_v42  ;;  %v1181_v17 = vmul.f32 %v1164_v13, %v5207_v57 }
 0x157   :  { %v1182_v3 = vmul.f32 %v1165_v7, %v5209_v4  ;;  %v1183_v61 = vmul.f32 %v1166_v27, %v5213_v10  ;;  %v1184_v22 = vmul.f32 %v1167_v58, %v5216_v55  ;;  %v1185_v26 = vmul.f32 %v1168_v44, %v5218_v2 }
 0x158   :  { %v1186_v29 = vmul.f32 %v1169_v38, %v5221_v21  ;;  %v1187_v46 = vmul.f32 %v1170_v11, %v5223_v25  ;;  %v1188_v30 = vmul.f32 %v1171_v62, %v5227_v43  ;;  %v1189_v23 = vmul.f32 %v1172_v36, %v5230_v47 }
 0x159   :  { %v1190_v49 = vmul.f32 %v1173_v1, %v5233_v63  ;;  %v1191_v20 = vmul.f32 %v1174_v35, %v5236_v8  ;;  %v1194_v12 = vadd.f32 0.26777375, %v1177_v31  ;;  %v1195_v54 = vadd.f32 0.26777375, %v1178_v52 }
 0x15a   :  { %v1192_v32 = vmul.f32 %v1175_v60, %v5239_v33  ;;  %v1196_v13 = vadd.f32 0.26777375, %v1179_v0  ;;  %v1197_v7 = vadd.f32 0.26777375, %v1180_v15  ;;  %v1198_v27 = vadd.f32 0.26777375, %v1181_v17 }
 0x15b   :  { %v1193_v44 = vmul.f32 %v1176_v56, %v5242_v50  ;;  %v1199_v58 = vadd.f32 0.26777375, %v1182_v3  ;;  %v5769_v38 = vadd.f32 0.26777375, %v1183_v61  ;;  %v5771_v11 = vadd.f32 0.26777375, %v1184_v22 }
 0x15c   :  { %v5773_v62 = vadd.f32 0.26777375, %v1185_v26  ;;  %v5775_v36 = vadd.f32 0.26777375, %v1186_v29  ;;  %v5777_v1 = vadd.f32 0.26777375, %v1187_v46  ;;  %v5781_v31 = vmul.f32 %v5597_v19, %v5597_v19 }
 0x15d   :  { %v5783_v35 = vadd.f32 0.26777375, %v1188_v30  ;;  %v5785_v52 = vadd.f32 0.26777375, %v1189_v23  ;;  %v1211_v0 = vadd.f32 9.573322, %v5199_v28 }
 0x15e   :  { %9561 = vst [vmem:[#allocation100_spill] sm:$0xff] %v5781_v31  ;;  %v9562_v60 = vld [vmem:[#allocation26_spill] sm:$0xff]  ;;  %v5791_v15 = vadd.f32 0.26777375, %v1190_v49  ;;  %v5793_v17 = vadd.f32 0.26777375, %v1191_v20 }
 0x15f   :  { %v5789_v56 = vmul.f32 %v9562_v60, %v1194_v12  ;;  %v1212_v3 = vadd.f32 9.573322, %v5201_v51  ;;  %v9564_v61 = vld [vmem:[#allocation28_spill] sm:$0xff]  ;;  %v5799_v26 = vadd.f32 0.26777375, %v1192_v32  ;;  %v9566_v30 = vld [vmem:[#allocation29_spill] sm:$0xff] }
 0x160   :  { %v5797_v22 = vmul.f32 %v9564_v61, %v1195_v54  ;;  %v5801_v29 = vadd.f32 0.26777375, %v1193_v44  ;;  %v1213_v46 = vadd.f32 9.573322, %v5203_v37  ;;  %v5805_v23 = vmul.f32 %v9566_v30, %v1196_v13  ;;  %v9568_v20 = vld [vmem:[#allocation30_spill] sm:$0xff]  ;;  %v9570_v31 = vld [vmem:[#allocation31_spill] sm:$0xff] }
 0x161   :  { %9563 = vst [vmem:[#allocation26_spill] sm:$0xff] %v5789_v56  ;;  %v1214_v12 = vadd.f32 9.573322, %v5205_v42  ;;  %v1215_v49 = vadd.f32 9.573322, %v5207_v57  ;;  %v5810_v60 = vmul.f32 %v9568_v20, %v1197_v7  ;;  %v5813_v59 = vmul.f32 %v9570_v31, %v1198_v27 }
 0x162   :  { %9565 = vst [vmem:[#allocation28_spill] sm:$0xff] %v5797_v22  ;;  %9567 = vst [vmem:[#allocation29_spill] sm:$0xff] %v5805_v23  ;;  %v1216_v54 = vadd.f32 9.573322, %v5209_v4  ;;  %v1217_v32 = vadd.f32 9.573322, %v5213_v10  ;;  %v1228_v61 = vmul.f32 %v1211_v0, %v5199_v28  ;;  %v1229_v7 = vmul.f32 %v1212_v3, %v5201_v51 }
 0x163   :  { %9569 = vst [vmem:[#allocation30_spill] sm:$0xff] %v5810_v60  ;;  %9571 = vst [vmem:[#allocation31_spill] sm:$0xff] %v5813_v59  ;;  %v1218_v44 = vadd.f32 9.573322, %v5216_v55  ;;  %v1219_v13 = vadd.f32 9.573322, %v5218_v2  ;;  %v1230_v39 = vmul.f32 %v1213_v46, %v5203_v37  ;;  %v1231_v45 = vmul.f32 %v1214_v12, %v5205_v42 }
 0x164   :  { %v1220_v30 = vadd.f32 9.573322, %v5221_v21  ;;  %v1221_v16 = vadd.f32 9.573322, %v5223_v25  ;;  %v1222_v20 = vadd.f32 9.573322, %v5227_v43  ;;  %v1232_v34 = vmul.f32 %v1215_v49, %v5207_v57 }
 0x165   :  { %v1223_v27 = vadd.f32 9.573322, %v5230_v47  ;;  %v1224_v31 = vadd.f32 9.573322, %v5233_v63  ;;  %v1225_v53 = vadd.f32 9.573322, %v5236_v8  ;;  %v1233_v3 = vmul.f32 %v1216_v54, %v5209_v4 }
 0x166   :  { %v1226_v0 = vadd.f32 9.573322, %v5239_v33  ;;  %v1227_v5 = vadd.f32 9.573322, %v5242_v50  ;;  %v1234_v18 = vmul.f32 %v1217_v32, %v5213_v10  ;;  %v1235_v9 = vmul.f32 %v1218_v44, %v5216_v55  ;;  %v9572_v22 = vld [vmem:[#allocation32_spill] sm:$0xff] }
 0x167   :  { %v1236_v48 = vmul.f32 %v1219_v13, %v5218_v2  ;;  %v1237_v46 = vmul.f32 %v1220_v30, %v5221_v21  ;;  %v1238_v6 = vmul.f32 %v1221_v16, %v5223_v25  ;;  %v1245_v14 = vadd.f32 25.632956, %v1228_v61 }
 0x168   :  { %v1239_v59 = vmul.f32 %v1222_v20, %v5227_v43  ;;  %v1240_v60 = vmul.f32 %v1223_v27, %v5230_v47  ;;  %v1241_v12 = vmul.f32 %v1224_v31, %v5233_v63  ;;  %v1246_v49 = vadd.f32 25.632956, %v1229_v7 }
 0x169   :  { %v1242_v54 = vmul.f32 %v1225_v53, %v5236_v8  ;;  %v1243_v32 = vmul.f32 %v1226_v0, %v5239_v33  ;;  %v1244_v44 = vmul.f32 %v1227_v5, %v5242_v50  ;;  %v1247_v40 = vadd.f32 25.632956, %v1230_v39 }
 0x16a   :  { %v1248_v13 = vadd.f32 25.632956, %v1231_v45  ;;  %v1249_v23 = vadd.f32 25.632956, %v1232_v34  ;;  %v1250_v30 = vadd.f32 25.632956, %v1233_v3  ;;  %v5845_v16 = vmul.f32 %v9572_v22, %v1199_v58 }
 0x16b   :  { %v1251_v61 = vadd.f32 25.632956, %v1234_v18  ;;  %v1252_v20 = vadd.f32 25.632956, %v1235_v9  ;;  %v1253_v56 = vadd.f32 25.632956, %v1236_v48  ;;  %v1262_v27 = vmul.f32 %v1245_v14, %v5199_v28 }
 0x16c   :  { %v1254_v31 = vadd.f32 25.632956, %v1237_v46  ;;  %v1255_v7 = vadd.f32 25.632956, %v1238_v6  ;;  %v1256_v19 = vadd.f32 25.632956, %v1239_v59  ;;  %v1263_v53 = vmul.f32 %v1246_v49, %v5201_v51 }
 0x16d   :  { %v1257_v0 = vadd.f32 25.632956, %v1240_v60  ;;  %v1258_v41 = vadd.f32 25.632956, %v1241_v12  ;;  %v1259_v5 = vadd.f32 25.632956, %v1242_v54  ;;  %v1264_v45 = vmul.f32 %v1247_v40, %v5203_v37 }
 0x16e   :  { %v1260_v34 = vadd.f32 25.632956, %v1243_v32  ;;  %v1261_v39 = vadd.f32 25.632956, %v1244_v44  ;;  %v1265_v58 = vmul.f32 %v1248_v13, %v5205_v42  ;;  %v1266_v18 = vmul.f32 %v1249_v23, %v5207_v57 }
 0x16f   :  { %v1267_v48 = vmul.f32 %v1250_v30, %v5209_v4  ;;  %v1268_v14 = vmul.f32 %v1251_v61, %v5213_v10  ;;  %v1269_v6 = vmul.f32 %v1252_v20, %v5216_v55  ;;  %v1270_v9 = vmul.f32 %v1253_v56, %v5218_v2  ;;  %v9573_v61 = vld [vmem:[#allocation33_spill] sm:$0xff] }
 0x170   :  { %v1271_v59 = vmul.f32 %v1254_v31, %v5221_v21  ;;  %v1272_v22 = vmul.f32 %v1255_v7, %v5223_v25  ;;  %v1273_v40 = vmul.f32 %v1256_v19, %v5227_v43  ;;  %v1279_v60 = vadd.f32 21.099653, %v1262_v27 }
 0x171   :  { %v1274_v3 = vmul.f32 %v1257_v0, %v5230_v47  ;;  %v1275_v46 = vmul.f32 %v1258_v41, %v5233_v63  ;;  %v1276_v23 = vmul.f32 %v1259_v5, %v5236_v8  ;;  %v1280_v12 = vadd.f32 21.099653, %v1263_v53 }
 0x172   :  { %v1277_v49 = vmul.f32 %v1260_v34, %v5239_v33  ;;  %v1278_v54 = vmul.f32 %v1261_v39, %v5242_v50  ;;  %v1281_v32 = vadd.f32 21.099653, %v1264_v45  ;;  %v1282_v56 = vadd.f32 21.099653, %v1265_v58 }
 0x173   :  { %v1283_v44 = vadd.f32 21.099653, %v1266_v18  ;;  %v1284_v13 = vadd.f32 21.099653, %v1267_v48  ;;  %v1285_v30 = vadd.f32 21.099653, %v1268_v14  ;;  %v5866_v19 = vmul.f32 %v9573_v61, %v5769_v38 }
 0x174   :  { %v1286_v20 = vadd.f32 21.099653, %v1269_v6  ;;  %v1287_v27 = vadd.f32 21.099653, %v1270_v9  ;;  %v1288_v31 = vadd.f32 21.099653, %v1271_v59  ;;  %v1296_v41 = vmul.f32 %v1279_v60, %v5199_v28 }
 0x175   :  { %v1289_v7 = vadd.f32 21.099653, %v1272_v22  ;;  %v1290_v53 = vadd.f32 21.099653, %v1273_v40  ;;  %v1291_v0 = vadd.f32 21.099653, %v1274_v3  ;;  %v1297_v5 = vmul.f32 %v1280_v12, %v5201_v51 }
 0x176   :  { %v1292_v34 = vadd.f32 21.099653, %v1275_v46  ;;  %v1293_v45 = vadd.f32 21.099653, %v1276_v23  ;;  %v1294_v39 = vadd.f32 21.099653, %v1277_v49  ;;  %v1298_v58 = vmul.f32 %v1281_v32, %v5203_v37 }
 0x177   :  { %v1295_v18 = vadd.f32 21.099653, %v1278_v54  ;;  %v1299_v48 = vmul.f32 %v1282_v56, %v5205_v42  ;;  %v1300_v38 = vmul.f32 %v1283_v44, %v5207_v57  ;;  %v1301_v14 = vmul.f32 %v1284_v13, %v5209_v4  ;;  %v9574_v13 = vld [vmem:[#allocation35_spill] sm:$0xff] }
 0x178   :  { %v1302_v6 = vmul.f32 %v1285_v30, %v5213_v10  ;;  %v1303_v9 = vmul.f32 %v1286_v20, %v5216_v55  ;;  %v1304_v59 = vmul.f32 %v1287_v27, %v5218_v2  ;;  %v1305_v22 = vmul.f32 %v1288_v31, %v5221_v21  ;;  %v9575_v31 = vld [vmem:[#allocation39_spill] sm:$0xff] }
 0x179   :  { %v1306_v40 = vmul.f32 %v1289_v7, %v5223_v25  ;;  %v1307_v60 = vmul.f32 %v1290_v53, %v5227_v43  ;;  %v1308_v3 = vmul.f32 %v1291_v0, %v5230_v47  ;;  %v1313_v46 = vadd.f32 3.9584968, %v1296_v41  ;;  %v9576_v0 = vld [vmem:[#allocation43_spill] sm:$0xff] }
 0x17a   :  { %v1309_v23 = vmul.f32 %v1292_v34, %v5233_v63  ;;  %v1310_v12 = vmul.f32 %v1293_v45, %v5236_v8  ;;  %v1311_v49 = vmul.f32 %v1294_v39, %v5239_v33  ;;  %v1314_v54 = vadd.f32 3.9584968, %v1297_v5 }
 0x17b   :  { %v1312_v32 = vmul.f32 %v1295_v18, %v5242_v50  ;;  %v1315_v56 = vadd.f32 3.9584968, %v1298_v58  ;;  %v1316_v44 = vadd.f32 3.9584968, %v1299_v48  ;;  %v5887_v30 = vmul.f32 %v9574_v13, %v5771_v11 }
 0x17c   :  { %v1317_v61 = vadd.f32 3.9584968, %v1300_v38  ;;  %v1318_v20 = vadd.f32 3.9584968, %v1301_v14  ;;  %v1319_v27 = vadd.f32 3.9584968, %v1302_v6  ;;  %v5891_v41 = vmul.f32 %v9575_v31, %v5773_v62 }
 0x17d   :  { %v1320_v7 = vadd.f32 3.9584968, %v1303_v9  ;;  %v1321_v53 = vadd.f32 3.9584968, %v1304_v59  ;;  %v5895_v5 = vmul.f32 %v9576_v0, %v5775_v36  ;;  %v1347_v34 = vmul.f32 %v1313_v46, %v5199_v28  ;;  %v9577_v38 = vld [vmem:[#allocation47_spill] sm:$0xff]  ;;  %v9584_v0 = vld [vmem:[#allocation80_spill] sm:$0xff] }
 0x17e   :  { %v1322_v45 = vadd.f32 3.9584968, %v1305_v22  ;;  %v1323_v39 = vadd.f32 3.9584968, %v1306_v40  ;;  %v1324_v58 = vadd.f32 3.9584968, %v1307_v60  ;;  %v1348_v11 = vmul.f32 %v1314_v54, %v5201_v51 }
 0x17f   :  { %v1325_v18 = vadd.f32 3.9584968, %v1308_v3  ;;  %v1326_v48 = vadd.f32 3.9584968, %v1309_v23  ;;  %v5901_v14 = vmul.f32 %v9577_v38, %v5777_v1  ;;  %v1349_v62 = vmul.f32 %v1315_v56, %v5203_v37  ;;  %v9578_v36 = vld [vmem:[#allocation51_spill] sm:$0xff]  ;;  %v9580_v1 = vld [vmem:[#allocation57_spill] sm:$0xff] }
 0x180   :  { %v1327_v6 = vadd.f32 3.9584968, %v1310_v12  ;;  %v1328_v9 = vadd.f32 3.9584968, %v1311_v49  ;;  %v5906_v59 = vmul.f32 %v9578_v36, %v5783_v35  ;;  %v1350_v22 = vmul.f32 %v1316_v44, %v5205_v42  ;;  %v9579_v60 = vld [vmem:[#allocation55_spill] sm:$0xff]  ;;  %v9582_v54 = vld [vmem:[#allocation61_spill] sm:$0xff] }
 0x181   :  { %v1329_v40 = vadd.f32 3.9584968, %v1312_v32  ;;  %v5911_v46 = vmul.f32 %v9579_v60, %v5785_v52  ;;  %v1351_v3 = vmul.f32 %v1317_v61, %v5207_v57  ;;  %4105 = vrcp.f32 %v1347_v34  ;;  %v9581_v12 = vld [vmem:[#allocation59_spill] sm:$0xff]  ;;  %v9588_v38 = vld [vmem:[#allocation81_spill] sm:$0xff]  ;;  %v9604_v37 = vld [vmem:[#allocation88_spill] sm:$0xff] }
 0x182   :  { %v5916_v23 = vmul.f32 %v9580_v1, %v5791_v15  ;;  %v5920_v49 = vmul.f32 %v9581_v12, %v5793_v17  ;;  %v1352_v35 = vmul.f32 %v1318_v20, %v5209_v4  ;;  %4107 = vrcp.f32 %v1348_v11  ;;  %v9583_v52 = vld [vmem:[#allocation63_spill] sm:$0xff]  ;;  %v9589_v1 = vld [vmem:[#allocation26_spill] sm:$0xff]  ;;  %v9599_v28 = vld [vmem:[#allocation85_spill] sm:$0xff] }
 0x183   :  { %v5925_v32 = vmul.f32 %v9582_v54, %v5799_v26  ;;  %v5929_v56 = vmul.f32 %v9583_v52, %v5801_v29  ;;  %v1353_v44 = vmul.f32 %v1319_v27, %v5213_v10  ;;  %4109 = vrcp.f32 %v1349_v62 }
 0x184   :  { %v1354_v15 = vmul.f32 %v1320_v7, %v5216_v55  ;;  %v1355_v13 = vmul.f32 %v1321_v53, %v5218_v2  ;;  %v1356_v17 = vmul.f32 %v1322_v45, %v5221_v21  ;;  %4111 = vrcp.f32 %v1350_v22  ;;  %v9585_v45 = vld [vmem:[#allocation82_spill] sm:$0xff] }
 0x185   :  { %v1357_v61 = vmul.f32 %v1323_v39, %v5223_v25  ;;  %v1358_v20 = vmul.f32 %v1324_v58, %v5227_v43  ;;  %v1359_v26 = vmul.f32 %v1325_v18, %v5230_v47  ;;  %4113 = vrcp.f32 %v1351_v3  ;;  %v9586_v58 = vld [vmem:[#allocation78_spill] sm:$0xff]  ;;  %v9587_v18 = vld [vmem:[#allocation79_spill] sm:$0xff] }
 0x186   :  { %v1360_v29 = vmul.f32 %v1326_v48, %v5233_v63  ;;  %v1361_v27 = vmul.f32 %v1327_v6, %v5236_v8  ;;  %v1362_v31 = vmul.f32 %v1328_v9, %v5239_v33  ;;  %4115 = vrcp.f32 %v1352_v35 }
 0x187   :  { %v1363_v7 = vmul.f32 %v1329_v40, %v5242_v50  ;;  %4117 = vrcp.f32 %v1353_v44  ;;  %v3967_v53 = vadd.f32 -1.0, %v5567_v24  ;;  %v3968_v34 = vadd.f32 -1.0, %v9584_v0  ;;  %v9591_v44 = vld [vmem:[#allocation28_spill] sm:$0xff] }
 0x188   :  { %4119 = vrcp.f32 %v1354_v15  ;;  %v3969_v39 = vadd.f32 -1.0, %v9585_v45  ;;  %v1484_v11 = vadd.f32 1.0, %v9586_v58  ;;  %v1485_v48 = vadd.f32 1.0, %v9587_v18  ;;  %v9595_v18 = vld [vmem:[#allocation30_spill] sm:$0xff] }
 0x189   :  { %4121 = vrcp.f32 %v1355_v13  ;;  %v1486_v62 = vadd.f32 1.0, %v9588_v38  ;;  %v5954_v6 = vadd.f32 1.0, %v5567_v24  ;;  %v5957_v9 = vadd.f32 1.0, %v9584_v0 }
 0x18a   :  { %4123 = vrcp.f32 %v1356_v17  ;;  %vm1403_vm5 = vcmp.le.f32.partialorder %v5209_v4, 1.0  ;;  %v5961_v22 = vadd.f32 1.0, %v9585_v45  ;;  %v5963_v40 = vmul.f32 %v3967_v53, %v3967_v53  ;;  %v9592_v53 = vld [vmem:[#allocation29_spill] sm:$0xff] }
 0x18b   :  { %v4106_v36 = vpop.eup %4105  ;;  %4125 = vrcp.f32 %v1357_v61  ;;  %v5965_v60 = vmul.f32 %v3968_v34, %v3968_v34  ;;  %vm1404_vm6 = vcmp.le.f32.partialorder %v5213_v10, 1.0  ;;  %v5969_v35 = vmul.f32 %v3969_v39, %v3969_v39  ;;  %v9614_v10 = vld [vmem:[#allocation27_spill] sm:$0xff] }
 0x18c   :  { %v4108_v3 = vpop.eup %4107  ;;  %v1365_v12 = vmul.f32 %v4106_v36, %v9589_v1  ;;  %4127 = vrcp.f32 %v1358_v20  ;;  %v1487_v54 = vmul.f32 0.5, %v1484_v11  ;;  %vm1405_vm7 = vcmp.le.f32.partialorder %v5216_v55, 1.0  ;;  %v9593_v20 = vld [vmem:[#allocation84_spill] sm:$0xff]  ;;  %v9598_v1 = vld [vmem:[#allocation31_spill] sm:$0xff] }
 0x18d   :  { %9590 = vst [vmem:[#allocation32_spill] sm:$0xff] %v5969_v35  ;;  %v4110_v52 = vpop.eup %4109  ;;  %v1367_v15 = vmul.f32 %v4108_v3, %v9591_v44  ;;  %4129 = vrcp.f32 %v1359_v26  ;;  %vm1406_vm8 = vcmp.le.f32.partialorder %v5218_v2, 1.0  ;;  %v1488_v13 = vmul.f32 0.5, %v1485_v48  ;;  %v9600_v44 = vld [vmem:[#allocation22_spill] sm:$0xff] }
 0x18e   :  { %v1489_v17 = vmul.f32 0.5, %v1486_v62  ;;  %v4112_v61 = vpop.eup %4111  ;;  %v1369_v34 = vmul.f32 %v4110_v52, %v9592_v53  ;;  %4131 = vrcp.f32 %v1360_v29  ;;  %vm1407_vm9 = vcmp.le.f32.partialorder %v5221_v21, 1.0 }
 0x18f   :  { %v1415_v39 = vsel %vm1398_vm0, %v9593_v20, %v1365_v12  ;;  %v5980_v58 = vmul.f32 -0.25, %v5963_v40  ;;  %v4114_v26 = vpop.eup %4113  ;;  %v1371_v38 = vmul.f32 %v4112_v61, %v9595_v18  ;;  %4133 = vrcp.f32 %v1361_v27  ;;  %v9601_v20 = vld [vmem:[#allocation86_spill] sm:$0xff] }
 0x190   :  { %v5984_v36 = vmul.f32 -0.25, %v5965_v60  ;;  %v5987_v3 = vmul.f32 -0.25, %v5969_v35  ;;  %v4116_v29 = vpop.eup %4115  ;;  %v1373_v52 = vmul.f32 %v4114_v26, %v9598_v1  ;;  %4135 = vrcp.f32 %v1362_v31  ;;  %v9602_v26 = vld [vmem:[#allocation87_spill] sm:$0xff] }
 0x191   :  { %9594 = vst [vmem:[#allocation33_spill] sm:$0xff] %v5980_v58  ;;  %vm1408_vm10 = vcmp.le.f32.partialorder %v5223_v25, 1.0  ;;  %v1416_v12 = vsel %vm1399_vm1, %v9599_v28, %v1367_v15  ;;  %v1432_v53 = vmul.f32 %v1415_v39, %v9600_v44  ;;  %v4118_v61 = vpop.eup %4117  ;;  %v1375_v27 = vmul.f32 %v4116_v29, %v5845_v16 }
 0x192   :  { %9596 = vst [vmem:[#allocation35_spill] sm:$0xff] %v5984_v36  ;;  %9597 = vst [vmem:[#allocation39_spill] sm:$0xff] %v5987_v3  ;;  %4137 = vrcp.f32 %v1363_v7  ;;  %vm1409_vm11 = vcmp.le.f32.partialorder %v5227_v43, 1.0  ;;  %vm1410_vm12 = vcmp.le.f32.partialorder %v5230_v47, 1.0  ;;  %v1417_v31 = vsel %vm1400_vm2, %v9601_v20, %v1369_v34  ;;  %v4120_v51 = vpop.eup %4119  ;;  %v9605_v34 = vld [vmem:[#allocation23_spill] sm:$0xff] }
 0x193   :  { %v1418_v18 = vsel %vm1401_vm3, %v9602_v26, %v1371_v38  ;;  %v1377_v15 = vmul.f32 %v4118_v61, %v5866_v19  ;;  %vm1411_vm13 = vcmp.le.f32.partialorder %v5233_v63, 1.0  ;;  %v6006_v39 = vmul.f32 %v1487_v54, %v1484_v11  ;;  %v4122_v29 = vpop.eup %4121  ;;  %v9607_v54 = vld [vmem:[#allocation24_spill] sm:$0xff] }
 0x194   :  { %v6008_v16 = vmul.f32 %v1488_v13, %v1485_v48  ;;  %v6010_v7 = vmul.f32 %v1489_v17, %v1486_v62  ;;  %v1379_v1 = vmul.f32 %v4120_v51, %v5887_v30  ;;  %vm1412_vm14 = vcmp.le.f32.partialorder %v5236_v8, 1.0  ;;  %v4124_v11 = vpop.eup %4123  ;;  %v9606_v62 = vld [vmem:[#allocation89_spill] sm:$0xff]  ;;  %v9613_v26 = vld [vmem:[#allocation92_spill] sm:$0xff] }
 0x195   :  { %v1419_v42 = vsel %vm1402_vm4, %v9604_v37, %v1373_v52  ;;  %v1433_v38 = vmul.f32 %v1416_v12, %v9605_v34  ;;  %v6020_v19 = vmul.f32 %v5980_v58, %v5980_v58  ;;  %v1381_v48 = vmul.f32 %v4122_v29, %v5891_v41  ;;  %v9608_v17 = vld [vmem:[#allocation25_spill] sm:$0xff]  ;;  %v4126_v52 = vpop.eup %4125  ;;  %v9609_v12 = vld [vmem:[#allocation90_spill] sm:$0xff]  ;;  %v9610_v41 = vld [vmem:[#allocation40_spill] sm:$0xff] }
 0x196   :  { %9603 = vst [vmem:[#allocation43_spill] sm:$0xff] %v6010_v7  ;;  %vm1413_vm15 = vcmp.le.f32.partialorder %v5239_v33, 1.0  ;;  %v1420_v30 = vsel %vm1403_vm5, %v9606_v62, %v1375_v27  ;;  %v1434_v13 = vmul.f32 %v1417_v31, %v9607_v54  ;;  %v1435_v57 = vmul.f32 %v1418_v18, %v9608_v17  ;;  %v4128_v27 = vpop.eup %4127  ;;  %v9612_v31 = vld [vmem:[#allocation91_spill] sm:$0xff]  ;;  %v9615_v29 = vld [vmem:[#allocation93_spill] sm:$0xff]  ;;  %v9616_v34 = vld [vmem:[#allocation34_spill] sm:$0xff] }
 0x197   :  { %v1383_v28 = vmul.f32 %v4124_v11, %v5895_v5  ;;  %vm1414_vm0 = vcmp.le.f32.partialorder %v5242_v50, 1.0  ;;  %v1421_v44 = vsel %vm1404_vm6, %v9609_v12, %v1377_v15  ;;  %v6035_v61 = vadd.f32 %v1432_v53, %v9610_v41  ;;  %v4130_v15 = vpop.eup %4129  ;;  %v9619_v54 = vld [vmem:[#allocation36_spill] sm:$0xff]  ;;  %v9626_v41 = vld [vmem:[#allocation38_spill] sm:$0xff] }
 0x198   :  { %v6039_v4 = vmul.f32 %v5984_v36, %v5984_v36  ;;  %v1385_v20 = vmul.f32 %v4126_v52, %v5901_v14  ;;  %v1422_v5 = vsel %vm1405_vm7, %v9612_v31, %v1379_v1  ;;  %v1423_v18 = vsel %vm1406_vm8, %v9613_v26, %v1381_v48  ;;  %v9617_v14 = vld [vmem:[#allocation44_spill] sm:$0xff]  ;;  %v4132_v55 = vpop.eup %4131  ;;  %v9627_v31 = vld [vmem:[#allocation73_spill] sm:$0xff]  ;;  %v9650_v33 = vld [vmem:[#allocation50_spill] sm:$0xff] }
 0x199   :  { %9611 = vst [vmem:[#allocation47_spill] sm:$0xff] %v6035_v61  ;;  %v1436_v51 = vmul.f32 %v1419_v42, %v9614_v10  ;;  %v1387_v53 = vmul.f32 %v4128_v27, %v5906_v59  ;;  %v1424_v37 = vsel %vm1407_vm9, %v9615_v29, %v1383_v28  ;;  %v1437_v11 = vmul.f32 %v1420_v30, %v9616_v34  ;;  %v9620_v48 = vld [vmem:[#allocation48_spill] sm:$0xff]  ;;  %v4134_v59 = vpop.eup %4133  ;;  %v9624_v28 = vld [vmem:[#allocation94_spill] sm:$0xff] }
 0x19a   :  { %v6055_v62 = vadd.f32 %v1433_v38, %v9617_v14  ;;  %v1389_v1 = vmul.f32 %v4130_v15, %v5911_v46  ;;  %v1438_v2 = vmul.f32 %v1421_v44, %v9619_v54  ;;  %v6060_v17 = vadd.f32 %v1434_v13, %v9620_v48  ;;  %v9622_v42 = vld [vmem:[#allocation52_spill] sm:$0xff]  ;;  %v9625_v38 = vld [vmem:[#allocation37_spill] sm:$0xff]  ;;  %v4136_v46 = vpop.eup %4135  ;;  %v9641_v48 = vld [vmem:[#allocation46_spill] sm:$0xff] }
 0x19b   :  { %v6063_v52 = vadd.f32 %v1435_v57, %v9622_v42  ;;  %v1391_v21 = vmul.f32 %v4132_v55, %v5916_v23  ;;  %v1425_v30 = vsel %vm1408_vm10, %v9624_v28, %v1385_v20  ;;  %v1439_v12 = vmul.f32 %v1422_v5, %v9625_v38  ;;  %v9628_v57 = vld [vmem:[#allocation74_spill] sm:$0xff]  ;;  %v9629_v23 = vld [vmem:[#allocation41_spill] sm:$0xff]  ;;  %v9630_v20 = vld [vmem:[#allocation75_spill] sm:$0xff] }
 0x19c   :  { %9618 = vst [vmem:[#allocation51_spill] sm:$0xff] %v6055_v62  ;;  %9621 = vst [vmem:[#allocation55_spill] sm:$0xff] %v6060_v17  ;;  %v1440_v27 = vmul.f32 %v1423_v18, %v9626_v41  ;;  %v1393_v44 = vmul.f32 %v4134_v59, %v5920_v49  ;;  %v1426_v13 = vsel %vm1409_vm11, %v9627_v31, %v1387_v53  ;;  %v4138_v15 = vpop.eup %4137  ;;  %v9631_v18 = vld [vmem:[#allocation56_spill] sm:$0xff]  ;;  %v9633_v49 = vld [vmem:[#allocation58_spill] sm:$0xff]  ;;  %4139 = vrcp.f32 %v6006_v39 }
 0x19d   :  { %9623 = vst [vmem:[#allocation57_spill] sm:$0xff] %v6063_v52  ;;  %v1427_v26 = vsel %vm1410_vm12, %v9628_v57, %v1389_v1  ;;  %v1441_v10 = vmul.f32 %v1424_v37, %v9629_v23  ;;  %v1395_v25 = vmul.f32 %v4136_v46, %v5925_v32  ;;  %v1428_v5 = vsel %vm1411_vm13, %v9630_v20, %v1391_v21  ;;  %v9635_v53 = vld [vmem:[#allocation95_spill] sm:$0xff]  ;;  %v9636_v37 = vld [vmem:[#allocation42_spill] sm:$0xff]  ;;  %v9637_v55 = vld [vmem:[#allocation60_spill] sm:$0xff] }
 0x19e   :  { %v6084_v29 = vadd.f32 %v1436_v51, %v9631_v18  ;;  %v6087_v34 = vadd.f32 %v1437_v11, %v9633_v49  ;;  %v1397_v43 = vmul.f32 %v4138_v15, %v5929_v56  ;;  %v1429_v47 = vsel %vm1412_vm14, %v9635_v53, %v1393_v44  ;;  %v9639_v1 = vld [vmem:[#allocation76_spill] sm:$0xff]  ;;  %v9640_v51 = vld [vmem:[#allocation45_spill] sm:$0xff]  ;;  %v9642_v42 = vld [vmem:[#allocation62_spill] sm:$0xff] }
 0x19f   :  { %v1442_v14 = vmul.f32 %v1425_v30, %v9636_v37  ;;  %v6095_v32 = vadd.f32 %v1438_v2, %v9637_v55  ;;  %v1430_v63 = vsel %vm1413_vm15, %v9639_v1, %v1395_v25  ;;  %v1443_v54 = vmul.f32 %v1426_v13, %v9640_v51  ;;  %v9644_v56 = vld [vmem:[#allocation77_spill] sm:$0xff]  ;;  %v9646_v30 = vld [vmem:[#allocation64_spill] sm:$0xff]  ;;  %v9652_v13 = vld [vmem:[#allocation54_spill] sm:$0xff] }
 0x1a0   :  { %9632 = vst [vmem:[#allocation59_spill] sm:$0xff] %v6084_v29  ;;  %9634 = vst [vmem:[#allocation61_spill] sm:$0xff] %v6087_v34  ;;  %v1444_v11 = vmul.f32 %v1427_v26, %v9641_v48  ;;  %v6103_v59 = vadd.f32 %v1439_v12, %v9642_v42  ;;  %v1431_v8 = vsel %vm1414_vm0, %v9644_v56, %v1397_v43  ;;  %v9645_v21 = vld [vmem:[#allocation49_spill] sm:$0xff]  ;;  %v6119_v12 = vmul.f32 2.0, %v5954_v6  ;;  %v9653_v26 = vld [vmem:[#allocation66_spill] sm:$0xff] }
 0x1a1   :  { %9638 = vst [vmem:[#allocation63_spill] sm:$0xff] %v6095_v32  ;;  %v1445_v28 = vmul.f32 %v1428_v5, %v9645_v21  ;;  %v6110_v2 = vadd.f32 %v1440_v27, %v9646_v30  ;;  %v9648_v38 = vld [vmem:[#allocation65_spill] sm:$0xff]  ;;  %v1446_v46 = vmul.f32 %v1429_v47, %v9650_v33  ;;  %v1448_v50 = vmul.f32 %v1431_v8, %v9652_v13  ;;  %v9657_v25 = vld [vmem:[#allocation68_spill] sm:$0xff]  ;;  %v9661_v53 = vld [vmem:[#allocation70_spill] sm:$0xff] }
 0x1a2   :  { %9643 = vst [vmem:[#allocation80_spill] sm:$0xff] %v6103_v59  ;;  %v6113_v41 = vadd.f32 %v1441_v10, %v9648_v38  ;;  %v9651_v44 = vld [vmem:[#allocation53_spill] sm:$0xff]  ;;  %4141 = vrcp.f32 %v6008_v16  ;;  %v6124_v57 = vmul.f32 2.0, %v5957_v9  ;;  %v6127_v27 = vmul.f32 2.0, %v5961_v22  ;;  %v9655_v10 = vld [vmem:[#allocation67_spill] sm:$0xff]  ;;  %v9673_v33 = vld [vmem:[#allocation98_spill] sm:$0xff] }
 0x1a3   :  { %9647 = vst [vmem:[#allocation82_spill] sm:$0xff] %v6110_v2  ;;  %v1447_v31 = vmul.f32 %v1430_v63, %v9651_v44  ;;  %v6130_v23 = vadd.f32 %v1442_v14, %v9653_v26  ;;  %v6133_v15 = vadd.f32 %v1443_v54, %v9655_v10  ;;  %v6136_v20 = vadd.f32 %v1444_v11, %v9657_v25  ;;  %v9659_v5 = vld [vmem:[#allocation69_spill] sm:$0xff]  ;;  %v9663_v55 = vld [vmem:[#allocation71_spill] sm:$0xff]  ;;  %v9665_v63 = vld [vmem:[#allocation72_spill] sm:$0xff] }
 0x1a4   :  { %9649 = vst [vmem:[#allocation78_spill] sm:$0xff] %v6113_v41  ;;  %4143 = vrcp.f32 %v6010_v7  ;;  %v6140_v18 = vadd.f32 %v1445_v28, %v9659_v5  ;;  %v1498_v49 = vmul.f32 %v5987_v3, %v5987_v3  ;;  %v1529_v43 = vmul.f32 %v6119_v12, %v6006_v39  ;;  %v9675_v26 = vld [vmem:[#allocation99_spill] sm:$0xff] }
 0x1a5   :  { %9654 = vst [vmem:[#allocation79_spill] sm:$0xff] %v6130_v23  ;;  %9656 = vst [vmem:[#allocation81_spill] sm:$0xff] %v6133_v15  ;;  %4145 = vrcp.f32 %v5954_v6  ;;  %v6148_v47 = vadd.f32 %v1446_v46, %v9661_v53  ;;  %v6153_v37 = vmul.f32 %v6124_v57, %v6008_v16  ;;  %v6157_v14 = vmul.f32 %v6127_v27, %v6010_v7  ;;  %v9677_v53 = vld [vmem:[#allocation100_spill] sm:$0xff] }
 0x1a6   :  { %9658 = vst [vmem:[#allocation26_spill] sm:$0xff] %v6136_v20  ;;  %9660 = vst [vmem:[#allocation28_spill] sm:$0xff] %v6140_v18  ;;  %4147 = vrcp.f32 %v5957_v9  ;;  %v6160_v1 = vadd.f32 %v1447_v31, %v9663_v55  ;;  %v6163_v51 = vadd.f32 %v1448_v50, %v9665_v63  ;;  %v6167_v54 = vmul.f32 0.16666667, %v6020_v19  ;;  %v6198_v31 = vpop.eup %4139 }
 0x1a7   :  { %9662 = vst [vmem:[#allocation29_spill] sm:$0xff] %v6148_v47  ;;  %4149 = vrcp.f32 %v5961_v22  ;;  %v6171_v48 = vmul.f32 0.16666667, %v6039_v4  ;;  %v6174_v11 = vmul.f32 -2.0, %v5567_v24  ;;  %v6177_v42 = vmul.f32 -2.0, %v9584_v0  ;;  %9674 = vst [vmem:[#allocation23_spill] sm:$0xff] %v6198_v31 }
 0x1a8   :  { %9664 = vst [vmem:[#allocation84_spill] sm:$0xff] %v6160_v1  ;;  %9666 = vst [vmem:[#allocation30_spill] sm:$0xff] %v6163_v51  ;;  %4151 = vrcp.f32 %v5963_v40  ;;  %v1532_v56 = vsub.f32 %v1529_v43, %v5963_v40  ;;  %v6181_v8 = vmul.f32 0.16666667, %v1498_v49  ;;  %v6184_v19 = vmul.f32 -2.0, %v9585_v45 }
 0x1a9   :  { %9667 = vst [vmem:[#allocation31_spill] sm:$0xff] %v6167_v54  ;;  %9668 = vst [vmem:[#allocation85_spill] sm:$0xff] %v6171_v48  ;;  %4153 = vrcp.f32 %v5965_v60  ;;  %v1533_v4 = vsub.f32 %v6153_v37, %v5965_v60  ;;  %v1534_v21 = vsub.f32 %v6157_v14, %v5969_v35  ;;  %v1559_v28 = vmul.f32 0.5, %v6006_v39 }
 0x1aa   :  { %9669 = vst [vmem:[#allocation22_spill] sm:$0xff] %v6174_v11  ;;  %9670 = vst [vmem:[#allocation86_spill] sm:$0xff] %v6177_v42  ;;  %4155 = vrcp.f32 %v5969_v35  ;;  %v1560_v30 = vmul.f32 0.5, %v6008_v16  ;;  %v6194_v38 = vmul.f32 0.5, %v6010_v7  ;;  %v1574_v46 = vmul.f32 16.0, %v9673_v33 }
 0x1ab   :  { %9671 = vst [vmem:[#allocation87_spill] sm:$0xff] %v6181_v8  ;;  %9672 = vst [vmem:[#allocation88_spill] sm:$0xff] %v6184_v19  ;;  %v1577_v44 = vadd.f32 1.0, %v9673_v33  ;;  %v1568_v13 = vmul.f32 %v6174_v11, %v5954_v6  ;;  %v1569_v50 = vmul.f32 %v6177_v42, %v5957_v9  ;;  %v1575_v10 = vmul.f32 16.0, %v9675_v26 }
 0x1ac   :  { %v1578_v25 = vadd.f32 1.0, %v9675_v26  ;;  %v6206_v5 = vpop.eup %4141  ;;  %4157 = vrcp.f32 %v1532_v56  ;;  %v1544_v49 = vmul.f32 %v6198_v31, %v6198_v31  ;;  %v1570_v43 = vmul.f32 %v6184_v19, %v5961_v22 }
 0x1ad   :  { %9676 = vst [vmem:[#allocation89_spill] sm:$0xff] %v6206_v5  ;;  %v1576_v37 = vmul.f32 16.0, %v9677_v53  ;;  %v1545_v55 = vmul.f32 %v6206_v5, %v6206_v5  ;;  %v1579_v63 = vadd.f32 1.0, %v9677_v53  ;;  %v1589_v51 = vmul.f32 16.0, %v5567_v24 }
 0x1ae   :  { %v6213_v14 = vpop.eup %4143  ;;  %v1590_v1 = vmul.f32 16.0, %v9584_v0  ;;  %v1547_v18 = vmul.f32 %v6198_v31, %v1544_v49  ;;  %v1553_v20 = vmul.f32 %v6198_v31, %v5980_v58  ;;  %v1580_v15 = vmul.f32 %v1577_v44, %v1574_v46 }
 0x1af   :  { %9678 = vst [vmem:[#allocation24_spill] sm:$0xff] %v6213_v14  ;;  %v4146_v56 = vpop.eup %4145  ;;  %v1546_v47 = vmul.f32 %v6213_v14, %v6213_v14  ;;  %v1548_v2 = vmul.f32 %v6206_v5, %v1545_v55  ;;  %v1554_v59 = vmul.f32 %v6206_v5, %v5984_v36  ;;  %v1581_v32 = vmul.f32 %v1578_v25, %v1575_v10 }
 0x1b0   :  { %v4148_v23 = vpop.eup %4147  ;;  %v6225_v41 = vmul.f32 %v4146_v56, %v4146_v56  ;;  %v1550_v49 = vmul.f32 %v1547_v18, %v6167_v54  ;;  %v1555_v17 = vmul.f32 %v6213_v14, %v5987_v3  ;;  %v1591_v36 = vmul.f32 16.0, %v9585_v45 }
 0x1b1   :  { %v4150_v34 = vpop.eup %4149  ;;  %v6230_v29 = vmul.f32 %v4148_v23, %v4148_v23  ;;  %v1549_v52 = vmul.f32 %v6213_v14, %v1546_v47  ;;  %v1551_v55 = vmul.f32 %v1548_v2, %v6171_v48  ;;  %v1582_v19 = vmul.f32 %v1579_v63, %v1576_v37 }
 0x1b2   :  { %9679 = vst [vmem:[#allocation25_spill] sm:$0xff] %v6225_v41  ;;  %v4152_v46 = vpop.eup %4151  ;;  %v6236_v44 = vmul.f32 %v4150_v34, %v4150_v34  ;;  %v1520_v58 = vmul.f32 %v4146_v56, %v6225_v41  ;;  %v1556_v47 = vadd.f32 %v1553_v20, %v1550_v49  ;;  %4159 = vrcp.f32 %v1533_v4 }
 0x1b3   :  { %9680 = vst [vmem:[#allocation90_spill] sm:$0xff] %v6230_v29  ;;  %v4154_v10 = vpop.eup %4153  ;;  %v1521_v25 = vmul.f32 %v4148_v23, %v6230_v29  ;;  %v1552_v62 = vmul.f32 %v1549_v52, %v6181_v8  ;;  %v1557_v3 = vadd.f32 %v1554_v59, %v1551_v55  ;;  %v1598_v14 = vmul.f32 0.5, %v5954_v6 }
 0x1b4   :  { %9681 = vst [vmem:[#allocation40_spill] sm:$0xff] %v6236_v44  ;;  %v4156_v18 = vpop.eup %4155  ;;  %v1522_v54 = vmul.f32 %v4150_v34, %v6236_v44  ;;  %v1583_v56 = vmul.f32 %v1580_v15, %v1520_v58  ;;  %v1592_v2 = vmul.f32 %v1589_v51, %v9673_v33  ;;  %4161 = vrcp.f32 %v1534_v21 }
 0x1b5   :  { %v1558_v42 = vadd.f32 %v1555_v17, %v1552_v62  ;;  %v1584_v41 = vmul.f32 %v1581_v32, %v1521_v25  ;;  %v6246_v48 = vmul.f32 %v4152_v46, %v1568_v13  ;;  %v1593_v23 = vmul.f32 %v1590_v1, %v9675_v26 }
 0x1b6   :  { %v1594_v52 = vmul.f32 %v1591_v36, %v9677_v53  ;;  %v6250_v20 = vpop.eup %4157  ;;  %v6252_v37 = vsub.f32 %v1556_v47, %v1559_v28  ;;  %v6254_v34 = vmul.f32 %v4154_v10, %v1569_v50  ;;  %v6256_v59 = vmul.f32 %v4156_v18, %v1570_v43 }
 0x1b7   :  { %v1585_v6 = vmul.f32 %v1582_v19, %v1522_v54  ;;  %v6258_v62 = vsub.f32 %v1557_v3, %v1560_v30  ;;  %v1599_v17 = vmul.f32 0.5, %v5957_v9  ;;  %v1600_v32 = vmul.f32 0.5, %v5961_v22 }
 0x1b8   :  { %v1601_v15 = vsub.f32 1.0, %v1598_v14  ;;  %v6263_v1 = vsub.f32 %v1558_v42, %v6194_v38  ;;  %v6265_v36 = vmul.f32 %v4152_v46, %v1583_v56  ;;  %v6267_v51 = vmul.f32 %v4154_v10, %v1584_v41  ;;  %v9683_v56 = vld [vmem:[#allocation86_spill] sm:$0xff] }
 0x1b9   :  { %v6269_v4 = vmul.f32 %v1592_v2, %v1520_v58  ;;  %v6271_v21 = vmul.f32 %v1593_v23, %v1521_v25  ;;  %v1602_v28 = vsub.f32 1.0, %v1599_v17  ;;  %v1603_v19 = vsub.f32 1.0, %v1600_v32  ;;  %v9684_v23 = vld [vmem:[#allocation88_spill] sm:$0xff] }
 0x1ba   :  { %v1604_v3 = vsub.f32 0.0, %v1601_v15  ;;  %v6273_v30 = vmul.f32 %v4156_v18, %v1585_v6  ;;  %v6275_v9 = vmul.f32 %v1594_v52, %v1522_v54  ;;  %v6278_v22 = vmul.f32 0.5, %v5567_v24  ;;  %v9685_v6 = vld [vmem:[#allocation24_spill] sm:$0xff] }
 0x1bb   :  { %v6280_v42 = vsub.f32 0.4131759, %v1598_v14  ;;  %v1605_v38 = vsub.f32 0.0, %v1602_v28  ;;  %v1606_v33 = vsub.f32 0.0, %v1603_v19  ;;  %v6285_v13 = vmul.f32 0.5, %v9584_v0  ;;  %v9686_v28 = vld [vmem:[#allocation51_spill] sm:$0xff] }
 0x1bc   :  { %4163 = vrcp.f32 %v1604_v3  ;;  %v1613_v58 = vmul.f32 %v1604_v3, %v6119_v12  ;;  %v1649_v41 = vsub.f32 %v1604_v3, %v6006_v39  ;;  %v6288_v50 = vmul.f32 0.5, %v9585_v45  ;;  %v6292_v26 = vpop.eup %4159 }
 0x1bd   :  { %v6290_v54 = vsub.f32 0.4131759, %v1599_v17  ;;  %4165 = vrcp.f32 %v1605_v38  ;;  %v1614_v24 = vmul.f32 %v1605_v38, %v6124_v57  ;;  %v1615_v43 = vmul.f32 %v1606_v33, %v6127_v27 }
 0x1be   :  { %v1616_v53 = vsub.f32 %v1613_v58, %v5963_v40  ;;  %4167 = vrcp.f32 %v1606_v33  ;;  %v1650_v14 = vsub.f32 %v1605_v38, %v6008_v16  ;;  %v6298_v63 = vsub.f32 0.4131759, %v1600_v32  ;;  %v6302_v45 = vpop.eup %4161 }
 0x1bf   :  { %v1718_v0 = vmul.f32 %v6280_v42, %v6280_v42  ;;  %v1617_v49 = vsub.f32 %v1614_v24, %v5965_v60  ;;  %v1651_v46 = vsub.f32 %v1606_v33, %v6010_v7  ;;  %v1658_v55 = vmul.f32 %v6198_v31, %v1604_v3 }
 0x1c0   :  { %4169 = vrcp.f32 %v1616_v53  ;;  %v1618_v10 = vsub.f32 %v1615_v43, %v5969_v35  ;;  %v1652_v25 = vmul.f32 %v1649_v41, %v6174_v11  ;;  %v1659_v47 = vmul.f32 %v6206_v5, %v1605_v38 }
 0x1c1   :  { %v6312_v18 = vmul.f32 %v6035_v61, %v6035_v61  ;;  %4171 = vrcp.f32 %v1617_v49  ;;  %v1653_v2 = vmul.f32 %v1650_v14, %v9683_v56  ;;  %v1654_v52 = vmul.f32 %v1651_v46, %v9684_v23  ;;  %v9696_v56 = vld [vmem:[#allocation31_spill] sm:$0xff] }
 0x1c2   :  { %v1660_v17 = vmul.f32 %v9685_v6, %v1606_v33  ;;  %4173 = vrcp.f32 %v1618_v10  ;;  %v1685_v32 = vmul.f32 %v6250_v20, %v1616_v53  ;;  %v1719_v15 = vmul.f32 %v6290_v54, %v6290_v54  ;;  %v9688_v53 = vld [vmem:[#allocation25_spill] sm:$0xff] }
 0x1c3   :  { %9682 = vst [vmem:[#allocation91_spill] sm:$0xff] %v6312_v18  ;;  %v6322_v19 = vmul.f32 %v9686_v28, %v9686_v28  ;;  %v6324_v58 = vmul.f32 0.5, %v1604_v3  ;;  %4175 = vlog2.f32 %v1658_v55  ;;  %v1686_v41 = vmul.f32 %v6292_v26, %v1617_v49 }
 0x1c4   :  { %v1720_v24 = vmul.f32 %v6298_v63, %v6298_v63  ;;  %v6329_v43 = vmul.f32 0.5, %v1605_v38  ;;  %v6331_v14 = vmul.f32 0.5, %v1606_v33  ;;  %v6334_v46 = vmul.f32 %v1652_v25, %v9688_v53  ;;  %v9689_v38 = vld [vmem:[#allocation33_spill] sm:$0xff]  ;;  %v9690_v33 = vld [vmem:[#allocation35_spill] sm:$0xff] }
 0x1c5   :  { %9687 = vst [vmem:[#allocation92_spill] sm:$0xff] %v6322_v19  ;;  %4177 = vlog2.f32 %v1659_v47  ;;  %v6337_v28 = vmul.f32 %v1653_v2, %v6230_v29  ;;  %v6340_v3 = vmul.f32 %v1654_v52, %v6236_v44  ;;  %v1687_v49 = vmul.f32 %v6302_v45, %v1618_v10  ;;  %v9691_v47 = vld [vmem:[#allocation39_spill] sm:$0xff] }
 0x1c6   :  { %v4164_v61 = vpop.eup %4163  ;;  %4179 = vlog2.f32 %v1660_v17  ;;  %v6344_v19 = vadd.f32 %v1718_v0, %v9689_v38  ;;  %v6347_v18 = vadd.f32 %v1719_v15, %v9690_v33  ;;  %v6350_v53 = vadd.f32 %v1720_v24, %v9691_v47  ;;  %v9692_v2 = vld [vmem:[#allocation55_spill] sm:$0xff]  ;;  %v9694_v17 = vld [vmem:[#allocation57_spill] sm:$0xff] }
 0x1c7   :  { %v1625_v55 = vmul.f32 %v4164_v61, %v4164_v61  ;;  %4181 = vlog2.f32 %v1685_v32  ;;  %v4166_v25 = vpop.eup %4165  ;;  %v6354_v52 = vmul.f32 %v9692_v2, %v9692_v2  ;;  %v6358_v10 = vmul.f32 %v9694_v17, %v9694_v17 }
 0x1c8   :  { %4183 = vlog2.f32 %v1686_v41  ;;  %v4168_v32 = vpop.eup %4167  ;;  %v1626_v44 = vmul.f32 %v4166_v25, %v4166_v25  ;;  %v1634_v29 = vmul.f32 %v4164_v61, %v9689_v38  ;;  %v1676_v15 = vsub.f32 %v4164_v61, %v6198_v31 }
 0x1c9   :  { %9693 = vst [vmem:[#allocation27_spill] sm:$0xff] %v6354_v52  ;;  %9695 = vst [vmem:[#allocation93_spill] sm:$0xff] %v6358_v10  ;;  %v1628_v0 = vmul.f32 %v4164_v61, %v1625_v55  ;;  %v1627_v41 = vmul.f32 %v4168_v32, %v4168_v32  ;;  %v1677_v24 = vsub.f32 %v4166_v25, %v6206_v5  ;;  %4185 = vlog2.f32 %v1687_v49  ;;  %v9697_v5 = vld [vmem:[#allocation85_spill] sm:$0xff] }
 0x1ca   :  { %v4170_v23 = vpop.eup %4169  ;;  %v1678_v35 = vsub.f32 %v4168_v32, %v9685_v6  ;;  %v1629_v52 = vmul.f32 %v4166_v25, %v1626_v44  ;;  %v1635_v17 = vmul.f32 %v4166_v25, %v9690_v33  ;;  %v1636_v38 = vmul.f32 %v4168_v32, %v9691_v47 }
 0x1cb   :  { %v1631_v11 = vmul.f32 %v1628_v0, %v9696_v56  ;;  %v4172_v10 = vpop.eup %4171  ;;  %v1630_v55 = vmul.f32 %v4168_v32, %v1627_v41  ;;  %v1700_v61 = vsub.f32 %v4170_v23, %v6250_v20  ;;  %4187 = vrsqrt.f32 %v6344_v19 }
 0x1cc   :  { %v4174_v31 = vpop.eup %4173  ;;  %v1632_v7 = vmul.f32 %v1629_v52, %v9697_v5  ;;  %v1679_v2 = vmul.f32 %v1676_v15, %v6278_v22  ;;  %4189 = vrsqrt.f32 %v6347_v18  ;;  %v1680_v49 = vmul.f32 %v1677_v24, %v6285_v13 }
 0x1cd   :  { %v1637_v6 = vadd.f32 %v1634_v29, %v1631_v11  ;;  %v4176_v44 = vpop.eup %4175  ;;  %v1633_v25 = vmul.f32 %v1630_v55, %v6181_v8  ;;  %v1681_v0 = vmul.f32 %v1678_v35, %v6288_v50  ;;  %v1701_v32 = vsub.f32 %v4172_v10, %v6292_v26 }
 0x1ce   :  { %vm1726_vm1 = vcmp.eq.f32.partialorder %v6344_v19, inf  ;;  %v1638_v41 = vadd.f32 %v1635_v17, %v1632_v7  ;;  %v1662_v47 = vmul.f32 0.6931472, %v4176_v44  ;;  %v1702_v29 = vsub.f32 %v4174_v31, %v6302_v45 }
 0x1cf   :  { %v4178_v23 = vpop.eup %4177  ;;  %v1703_v11 = vmul.f32 %v1700_v61, %v6269_v4  ;;  %vm1728_vm2 = vcmp.eq.f32.partialorder %v6344_v19, 0.0  ;;  %vm1733_vm3 = vcmp.eq.f32.partialorder %v6347_v18, inf  ;;  %v1639_v15 = vadd.f32 %v1636_v38, %v1633_v25 }
 0x1d0   :  { %v4180_v52 = vpop.eup %4179  ;;  %v1643_v24 = vsub.f32 %v1637_v6, %v6324_v58  ;;  %v1664_v35 = vmul.f32 0.6931472, %v4178_v23  ;;  %vm1735_vm4 = vcmp.eq.f32.partialorder %v6347_v18, 0.0  ;;  %4191 = vrsqrt.f32 %v6350_v53 }
 0x1d1   :  { %v4182_v10 = vpop.eup %4181  ;;  %v1644_v7 = vsub.f32 %v1638_v41, %v6329_v43  ;;  %v1666_v17 = vmul.f32 0.6931472, %v4180_v52  ;;  %v1667_v31 = vmul.f32 %v1662_v47, %v6246_v48  ;;  %v1736_v55 = vand.u32 2147483648, %v6347_v18 }
 0x1d2   :  { %v4184_v61 = vpop.eup %4183  ;;  %v1645_v44 = vsub.f32 %v1639_v15, %v6331_v14  ;;  %v1668_v38 = vmul.f32 %v1664_v35, %v6254_v34  ;;  %v1689_v25 = vmul.f32 0.6931472, %v4182_v10  ;;  %v1704_v6 = vmul.f32 %v1701_v32, %v6271_v21 }
 0x1d3   :  { %v1669_v58 = vmul.f32 %v1666_v17, %v6256_v59  ;;  %v1670_v23 = vadd.f32 %v1667_v31, %v6334_v46  ;;  %v1691_v8 = vmul.f32 0.6931472, %v4184_v61  ;;  %v1705_v43 = vmul.f32 %v1702_v29, %v6275_v9  ;;  %v4186_v14 = vpop.eup %4185 }
 0x1d4   :  { %v1646_v41 = vsub.f32 %v1643_v24, %v6252_v37  ;;  %v1671_v47 = vadd.f32 %v1668_v38, %v6337_v28  ;;  %v1694_v52 = vmul.f32 %v1689_v25, %v6265_v36  ;;  %vm1740_vm5 = vcmp.eq.f32.partialorder %v6350_v53, inf }
 0x1d5   :  { %v1647_v15 = vsub.f32 %v1644_v7, %v6258_v62  ;;  %v1672_v32 = vadd.f32 %v1669_v58, %v6340_v3  ;;  %v1682_v35 = vadd.f32 %v1679_v2, %v1670_v23  ;;  %v1695_v10 = vmul.f32 %v1691_v8, %v6267_v51  ;;  %v4188_v46 = vpop.eup %4187  ;;  %v9698_v8 = vld [vmem:[#allocation59_spill] sm:$0xff] }
 0x1d6   :  { %v1648_v17 = vsub.f32 %v1645_v44, %v6263_v1  ;;  %v1683_v29 = vadd.f32 %v1680_v49, %v1671_v47  ;;  %v1693_v31 = vmul.f32 0.6931472, %v4186_v14  ;;  %vm1742_vm6 = vcmp.eq.f32.partialorder %v6350_v53, 0.0  ;;  %v4190_v28 = vpop.eup %4189  ;;  %v9700_v47 = vld [vmem:[#allocation63_spill] sm:$0xff] }
 0x1d7   :  { %v1684_v24 = vadd.f32 %v1681_v0, %v1672_v32  ;;  %v1697_v61 = vadd.f32 %v1694_v52, %v1682_v35  ;;  %v1725_v38 = vmul.f32 %v4188_v46, %v6344_v19  ;;  %v1743_v25 = vand.u32 2147483648, %v6350_v53  ;;  %v9699_v0 = vld [vmem:[#allocation61_spill] sm:$0xff] }
 0x1d8   :  { %v1696_v7 = vmul.f32 %v1693_v31, %v6273_v30  ;;  %v1698_v3 = vadd.f32 %v1695_v10, %v1683_v29  ;;  %v1732_v2 = vmul.f32 %v4190_v28, %v6347_v18  ;;  %v6409_v58 = vmul.f32 %v9698_v8, %v9698_v8 }
 0x1d9   :  { %v1706_v49 = vadd.f32 %v1703_v11, %v1697_v61  ;;  %v1727_v44 = vsel %vm1726_vm1, %v6344_v19, %v1725_v38  ;;  %v6416_v23 = vmul.f32 %v9699_v0, %v9699_v0  ;;  %v6420_v52 = vmul.f32 %v9700_v47, %v9700_v47 }
 0x1da   :  { %v4192_v14 = vpop.eup %4191  ;;  %v1699_v32 = vadd.f32 %v1696_v7, %v1684_v24  ;;  %v1707_v35 = vadd.f32 %v1704_v6, %v1698_v3  ;;  %v9701_v10 = vand.u32 2147483648, %v6344_v19  ;;  %v1734_v46 = vsel %vm1733_vm3, %v6347_v18, %v1732_v2  ;;  %v9702_v7 = vld [vmem:[#allocation80_spill] sm:$0xff] }
 0x1db   :  { %v1709_v29 = vadd.f32 %v1706_v49, %v1646_v41  ;;  %v1737_v31 = vsel %vm1735_vm4, %v1736_v55, %v1734_v46  ;;  %v1739_v28 = vmul.f32 %v4192_v14, %v6350_v53  ;;  %v6436_v19 = vmul.f32 %v9702_v7, %v9702_v7  ;;  %v9703_v55 = vld [vmem:[#allocation82_spill] sm:$0xff]  ;;  %v9708_v46 = vld [vmem:[#allocation43_spill] sm:$0xff] }
 0x1dc   :  { %v1730_v11 = vsel %vm1728_vm2, %v9701_v10, %v1727_v44  ;;  %v1708_v38 = vadd.f32 %v1705_v43, %v1699_v32  ;;  %v1710_v24 = vadd.f32 %v1707_v35, %v1647_v15  ;;  %v1746_v6 = vsub.f32 %v1737_v31, %v6290_v54  ;;  %v9704_v54 = vld [vmem:[#allocation78_spill] sm:$0xff]  ;;  %v9705_v15 = vld [vmem:[#allocation79_spill] sm:$0xff] }
 0x1dd   :  { %v1745_v61 = vsub.f32 %v1730_v11, %v6280_v42  ;;  %v1741_v3 = vsel %vm1740_vm5, %v6350_v53, %v1739_v28  ;;  %v6444_v41 = vmul.f32 %v9703_v55, %v9703_v55  ;;  %v6450_v43 = vmul.f32 %v9704_v54, %v9704_v54  ;;  %v9710_v31 = vld [vmem:[#allocation86_spill] sm:$0xff] }
 0x1de   :  { %v1744_v42 = vsel %vm1742_vm6, %v1743_v25, %v1741_v3  ;;  %v6454_v2 = vmul.f32 %v9705_v15, %v9705_v15  ;;  %v1711_v49 = vadd.f32 %v1708_v38, %v1648_v17  ;;  %v6456_v44 = vmul.f32 0.5, %v1709_v29  ;;  %v9709_v29 = vld [vmem:[#allocation22_spill] sm:$0xff]  ;;  %v9711_v38 = vld [vmem:[#allocation32_spill] sm:$0xff] }
 0x1df   :  { %4193 = vrcp.f32 %v1745_v61  ;;  %v1754_v18 = vmul.f32 %v1745_v61, %v6119_v12  ;;  %v1747_v12 = vsub.f32 %v1744_v42, %v6298_v63  ;;  %v1755_v14 = vmul.f32 %v1746_v6, %v6124_v57  ;;  %v9715_v42 = vld [vmem:[#allocation25_spill] sm:$0xff] }
 0x1e0   :  { %4195 = vrcp.f32 %v1746_v6  ;;  %9706 = vst [vmem:[#allocation34_spill] sm:$0xff] %v6456_v44  ;;  %v6460_v32 = vmul.f32 0.5, %v1710_v24  ;;  %v1790_v25 = vsub.f32 %v1745_v61, %v6006_v39  ;;  %v1791_v35 = vsub.f32 %v1746_v6, %v6008_v16  ;;  %v9712_v39 = vld [vmem:[#allocation23_spill] sm:$0xff]  ;;  %v9713_v16 = vld [vmem:[#allocation89_spill] sm:$0xff] }
 0x1e1   :  { %v1757_v53 = vsub.f32 %v1754_v18, %v5963_v40  ;;  %4197 = vrcp.f32 %v1747_v12  ;;  %v1756_v10 = vmul.f32 %v1747_v12, %v6127_v27  ;;  %v1758_v11 = vsub.f32 %v1755_v14, %v5965_v60  ;;  %v9714_v18 = vld [vmem:[#allocation88_spill] sm:$0xff]  ;;  %v9716_v14 = vld [vmem:[#allocation90_spill] sm:$0xff] }
 0x1e2   :  { %9707 = vst [vmem:[#allocation44_spill] sm:$0xff] %v6460_v32  ;;  %v6467_v17 = vmul.f32 0.5, %v1745_v61  ;;  %v1792_v63 = vsub.f32 %v1747_v12, %v9708_v46  ;;  %v1793_v57 = vmul.f32 %v1790_v25, %v9709_v29  ;;  %v1794_v28 = vmul.f32 %v1791_v35, %v9710_v31  ;;  %v9717_v46 = vld [vmem:[#allocation24_spill] sm:$0xff] }
 0x1e3   :  { %4199 = vrcp.f32 %v1757_v53  ;;  %v1759_v40 = vsub.f32 %v1756_v10, %v9711_v38  ;;  %v1799_v24 = vmul.f32 %v9712_v39, %v1745_v61  ;;  %v1800_v3 = vmul.f32 %v9713_v16, %v1746_v6  ;;  %v9719_v31 = vld [vmem:[#allocation40_spill] sm:$0xff] }
 0x1e4   :  { %4201 = vrcp.f32 %v1758_v11  ;;  %v1795_v27 = vmul.f32 %v1792_v63, %v9714_v18  ;;  %v6477_v60 = vmul.f32 %v1793_v57, %v9715_v42  ;;  %v6480_v15 = vmul.f32 %v1794_v28, %v9716_v14  ;;  %v9720_v28 = vld [vmem:[#allocation83_spill] sm:$0xff]  ;;  %v9722_v42 = vld [vmem:[#allocation33_spill] sm:$0xff] }
 0x1e5   :  { %v1801_v54 = vmul.f32 %v9717_v46, %v1747_v12  ;;  %4203 = vrcp.f32 %v1759_v40  ;;  %v1823_v25 = vmul.f32 %v6250_v20, %v1757_v53  ;;  %v1824_v35 = vmul.f32 %v6292_v26, %v1758_v11  ;;  %v9721_v53 = vld [vmem:[#allocation96_spill] sm:$0xff] }
 0x1e6   :  { %v1825_v10 = vmul.f32 %v6302_v45, %v1759_v40  ;;  %v6486_v61 = vmul.f32 0.5, %v1711_v49  ;;  %v1782_v29 = vmul.f32 0.5, %v1746_v6  ;;  %v6489_v63 = vmul.f32 %v1795_v27, %v9719_v31 }
 0x1e7   :  { %4205 = vlog2.f32 %v1799_v24  ;;  %v6491_v38 = vmul.f32 0.5, %v1747_v12  ;;  %v6495_v18 = vmul.f32 %v9720_v28, %v6456_v44  ;;  %v6499_v11 = vmul.f32 %v9721_v53, %v6460_v32  ;;  %v9723_v28 = vld [vmem:[#allocation97_spill] sm:$0xff] }
 0x1e8   :  { %9718 = vst [vmem:[#allocation36_spill] sm:$0xff] %v6486_v61  ;;  %4207 = vlog2.f32 %v1800_v3  ;;  %v6508_v53 = vmul.f32 %v9723_v28, %v6486_v61 }
 0x1e9   :  { %v4194_v57 = vpop.eup %4193  ;;  %4209 = vlog2.f32 %v1801_v54 }
 0x1ea   :  { %v4196_v40 = vpop.eup %4195  ;;  %v1766_v49 = vmul.f32 %v4194_v57, %v4194_v57  ;;  %v1775_v6 = vmul.f32 %v4194_v57, %v9722_v42  ;;  %v1814_v27 = vsub.f32 %v4194_v57, %v9712_v39  ;;  %4211 = vlog2.f32 %v1823_v25  ;;  %v9725_v25 = vld [vmem:[#allocation39_spill] sm:$0xff] }
 0x1eb   :  { %v1767_v24 = vmul.f32 %v4196_v40, %v4196_v40  ;;  %v1776_v12 = vmul.f32 %v4196_v40, %v9690_v33  ;;  %v1815_v3 = vsub.f32 %v4196_v40, %v9713_v16  ;;  %4213 = vlog2.f32 %v1824_v35  ;;  %v4198_v32 = vpop.eup %4197 }
 0x1ec   :  { %v1769_v14 = vmul.f32 %v4194_v57, %v1766_v49  ;;  %v1817_v31 = vmul.f32 %v1814_v27, %v6278_v22  ;;  %4215 = vlog2.f32 %v1825_v10  ;;  %v6512_v39 = vsub.f32 1.0, %v6495_v18 }
 0x1ed   :  { %v1770_v44 = vmul.f32 %v4196_v40, %v1767_v24  ;;  %v1818_v54 = vmul.f32 %v1815_v3, %v6285_v13  ;;  %v4200_v33 = vpop.eup %4199  ;;  %v1768_v42 = vmul.f32 %v4198_v32, %v4198_v32  ;;  %v1777_v57 = vmul.f32 %v4198_v32, %v9725_v25  ;;  %v9729_v25 = vld [vmem:[#allocation81_spill] sm:$0xff] }
 0x1ee   :  { %9724 = vst [vmem:[#allocation48_spill] sm:$0xff] %v6512_v39  ;;  %v1772_v16 = vmul.f32 %v1769_v14, %v9696_v56  ;;  %v1816_v22 = vsub.f32 %v4198_v32, %v9717_v46  ;;  %v4202_v35 = vpop.eup %4201  ;;  %v1838_v27 = vsub.f32 %v4200_v33, %v6250_v20  ;;  %v6520_v40 = vsub.f32 1.0, %v6499_v11  ;;  %v9728_v33 = vld [vmem:[#allocation87_spill] sm:$0xff] }
 0x1ef   :  { %v1773_v49 = vmul.f32 %v1770_v44, %v9697_v5  ;;  %v6523_v13 = vsub.f32 1.0, %v6508_v53  ;;  %v1771_v10 = vmul.f32 %v4198_v32, %v1768_v42  ;;  %v1839_v56 = vsub.f32 %v4202_v35, %v6292_v26  ;;  %v4204_v14 = vpop.eup %4203 }
 0x1f0   :  { %9726 = vst [vmem:[#allocation52_spill] sm:$0xff] %v6520_v40  ;;  %v1778_v24 = vadd.f32 %v1775_v6, %v1772_v16  ;;  %v1819_v3 = vmul.f32 %v1816_v22, %v6288_v50  ;;  %v1841_v46 = vmul.f32 %v1838_v27, %v6269_v4  ;;  %v6530_v5 = vmul.f32 %v6512_v39, %v6512_v39 }
 0x1f1   :  { %9727 = vst [vmem:[#allocation94_spill] sm:$0xff] %v6523_v13  ;;  %v1779_v28 = vadd.f32 %v1776_v12, %v1773_v49  ;;  %v6534_v20 = vmul.f32 %v6520_v40, %v6520_v40  ;;  %v4206_v44 = vpop.eup %4205  ;;  %v1774_v32 = vmul.f32 %v1771_v10, %v9728_v33  ;;  %v1840_v50 = vsub.f32 %v4204_v14, %v6302_v45 }
 0x1f2   :  { %v1784_v6 = vsub.f32 %v1778_v24, %v6467_v17  ;;  %v1842_v26 = vmul.f32 %v1839_v56, %v6271_v21  ;;  %v4208_v12 = vpop.eup %4207  ;;  %v1803_v4 = vmul.f32 0.6931472, %v4206_v44  ;;  %v6542_v16 = vmul.f32 %v6523_v13, %v6523_v13  ;;  %v9730_v56 = vld [vmem:[#allocation26_spill] sm:$0xff] }
 0x1f3   :  { %v1785_v42 = vsub.f32 %v1779_v28, %v1782_v29  ;;  %v6546_v22 = vmul.f32 %v9729_v25, %v9729_v25  ;;  %v4210_v35 = vpop.eup %4209  ;;  %v1780_v49 = vadd.f32 %v1777_v57, %v1774_v32  ;;  %v1805_v17 = vmul.f32 0.6931472, %v4208_v12 }
 0x1f4   :  { %v1787_v27 = vsub.f32 %v1784_v6, %v6252_v37  ;;  %v1843_v45 = vmul.f32 %v1840_v50, %v6275_v9  ;;  %v4212_v10 = vpop.eup %4211  ;;  %v1807_v29 = vmul.f32 0.6931472, %v4210_v35  ;;  %v1808_v24 = vmul.f32 %v1803_v4, %v6246_v48  ;;  %v9731_v37 = vld [vmem:[#allocation28_spill] sm:$0xff]  ;;  %v9732_v50 = vld [vmem:[#allocation29_spill] sm:$0xff] }
 0x1f5   :  { %v1788_v21 = vsub.f32 %v1785_v42, %v6258_v62  ;;  %v6554_v14 = vmul.f32 %v9730_v56, %v9730_v56  ;;  %v4214_v28 = vpop.eup %4213  ;;  %v1786_v44 = vsub.f32 %v1780_v49, %v6491_v38  ;;  %v1809_v57 = vmul.f32 %v1805_v17, %v6254_v34 }
 0x1f6   :  { %v1827_v33 = vmul.f32 0.6931472, %v4212_v10  ;;  %v6560_v32 = vmul.f32 %v9731_v37, %v9731_v37  ;;  %v4216_v9 = vpop.eup %4215  ;;  %v1810_v62 = vmul.f32 %v1807_v29, %v6256_v59  ;;  %v1811_v6 = vadd.f32 %v1808_v24, %v6477_v60  ;;  %v9733_v10 = vld [vmem:[#allocation84_spill] sm:$0xff]  ;;  %v9734_v24 = vld [vmem:[#allocation30_spill] sm:$0xff]  ;;  %v9746_v37 = vld [vmem:[#allocation93_spill] sm:$0xff] }
 0x1f7   :  { %v1829_v48 = vmul.f32 0.6931472, %v4214_v28  ;;  %v1882_v12 = vmul.f32 %v9732_v50, %v9732_v50  ;;  %v1789_v42 = vsub.f32 %v1786_v44, %v6263_v1  ;;  %v1812_v38 = vadd.f32 %v1809_v57, %v6480_v15  ;;  %v9735_v1 = vld [vmem:[#allocation14_spill] sm:$0xff] }
 0x1f8   :  { %v1831_v4 = vmul.f32 0.6931472, %v4216_v9  ;;  %v1832_v34 = vmul.f32 %v1827_v33, %v6265_v36  ;;  %v1813_v35 = vadd.f32 %v1810_v62, %v6489_v63  ;;  %v1820_v49 = vadd.f32 %v1817_v31, %v1811_v6  ;;  %v9736_v36 = vld [vmem:[#allocation15_spill] sm:$0xff]  ;;  %v9737_v31 = vld [vmem:[#allocation16_spill] sm:$0xff]  ;;  %v9738_v9 = vld [vmem:[#allocation17_spill] sm:$0xff] }
 0x1f9   :  { %v1833_v17 = vmul.f32 %v1829_v48, %v6267_v51  ;;  %v1883_v59 = vmul.f32 %v9733_v10, %v9733_v10  ;;  %v1821_v60 = vadd.f32 %v1818_v54, %v1812_v38  ;;  %v1884_v28 = vmul.f32 %v9734_v24, %v9734_v24  ;;  %v9739_v62 = vld [vmem:[#allocation18_spill] sm:$0xff]  ;;  %v9740_v6 = vld [vmem:[#allocation19_spill] sm:$0xff] }
 0x1fa   :  { %v1834_v29 = vmul.f32 %v1831_v4, %v6273_v30  ;;  %v1891_v15 = vrot.slane %v6530_v5, %v9735_v1  ;;  %v1822_v44 = vadd.f32 %v1819_v3, %v1813_v35  ;;  %v1835_v57 = vadd.f32 %v1832_v34, %v1820_v49  ;;  %v9741_v3 = vld [vmem:[#allocation20_spill] sm:$0xff]  ;;  %v9742_v35 = vld [vmem:[#allocation21_spill] sm:$0xff]  ;;  %v9745_v10 = vld [vmem:[#allocation27_spill] sm:$0xff] }
 0x1fb   :  { %v1895_v63 = vrot.slane %v6530_v5, %v9736_v36  ;;  %v1899_v51 = vrot.slane %v6530_v5, %v9737_v31  ;;  %v1836_v33 = vadd.f32 %v1833_v17, %v1821_v60  ;;  %v1903_v54 = vrot.slane %v6530_v5, %v9738_v9 }
 0x1fc   :  { %v1907_v30 = vrot.slane %v6530_v5, %v9739_v62  ;;  %v1911_v48 = vrot.slane %v6530_v5, %v9740_v6  ;;  %v1837_v38 = vadd.f32 %v1834_v29, %v1822_v44  ;;  %v1844_v4 = vadd.f32 %v1841_v46, %v1835_v57 }
 0x1fd   :  { %v1915_v34 = vrot.slane %v6530_v5, %v9741_v3  ;;  %v1919_v49 = vrot.slane %v6530_v5, %v9742_v35  ;;  %v1845_v61 = vadd.f32 %v1842_v26, %v1836_v33  ;;  %v1923_v17 = vrot.slane %v6534_v20, %v9735_v1 }
 0x1fe   :  { %v1927_v60 = vrot.slane %v6534_v20, %v9736_v36  ;;  %v1931_v13 = vrot.slane %v6534_v20, %v9737_v31  ;;  %v1846_v40 = vadd.f32 %v1843_v45, %v1837_v38  ;;  %v1847_v39 = vadd.f32 %v1844_v4, %v1787_v27  ;;  %v9743_v45 = vld [vmem:[#allocation91_spill] sm:$0xff] }
 0x1ff   :  { %v1935_v46 = vrot.slane %v6534_v20, %v9738_v9  ;;  %v1939_v29 = vrot.slane %v6534_v20, %v9739_v62  ;;  %v1848_v44 = vadd.f32 %v1845_v61, %v1788_v21  ;;  %v1943_v5 = vrot.slane %v6534_v20, %v9740_v6  ;;  %v9744_v61 = vld [vmem:[#allocation92_spill] sm:$0xff] }
 0x200   :  { %v1947_v26 = vrot.slane %v6534_v20, %v9741_v3  ;;  %v1951_v57 = vrot.slane %v6534_v20, %v9742_v35  ;;  %v1849_v33 = vadd.f32 %v1846_v40, %v1789_v42  ;;  %v6608_v24 = vmul.f32 1.2101383, %v1847_v39 }
 0x201   :  { %v1955_v27 = vrot.slane %v6542_v16, %v9735_v1  ;;  %v1973_v38 = vmul.f32 %v1891_v15, %v9743_v45  ;;  %v6613_v4 = vmul.f32 1.2101383, %v1848_v44  ;;  %v1974_v21 = vmul.f32 %v1895_v63, %v9744_v61 }
 0x202   :  { %v1975_v50 = vmul.f32 %v1899_v51, %v9745_v10  ;;  %v1976_v56 = vmul.f32 %v1903_v54, %v9746_v37  ;;  %v6618_v25 = vmul.f32 1.2101383, %v1849_v33  ;;  %v6621_v20 = vsub.f32 1.0, %v6608_v24 }
 0x203   :  { %v1977_v39 = vmul.f32 %v1907_v30, %v6409_v58  ;;  %v1978_v40 = vmul.f32 %v1911_v48, %v6416_v23  ;;  %v6626_v16 = vsub.f32 1.0, %v6613_v4  ;;  %v1979_v42 = vmul.f32 %v1915_v34, %v6420_v52 }
 0x204   :  { %9747 = vst [vmem:[#allocation37_spill] sm:$0xff] %v6618_v25  ;;  %9748 = vst [vmem:[#allocation38_spill] sm:$0xff] %v6621_v20  ;;  %v1980_v15 = vmul.f32 %v1919_v49, %v6436_v19  ;;  %v1981_v10 = vmul.f32 %v1923_v17, %v6444_v41  ;;  %v1982_v63 = vmul.f32 %v1927_v60, %v6450_v43  ;;  %v1990_v30 = vsub.f32 1.0, %v1973_v38 }
 0x205   :  { %9749 = vst [vmem:[#allocation73_spill] sm:$0xff] %v6626_v16  ;;  %v6634_v51 = vmul.f32 %v1931_v13, %v6454_v2  ;;  %v6637_v58 = vmul.f32 %v1935_v46, %v6546_v22  ;;  %v6640_v23 = vmul.f32 %v1939_v29, %v6554_v14  ;;  %v6643_v54 = vmul.f32 %v1943_v5, %v6560_v32 }
 0x206   :  { %v6645_v52 = vmul.f32 %v1947_v26, %v1882_v12  ;;  %v6647_v19 = vmul.f32 %v1951_v57, %v1883_v59  ;;  %v6649_v41 = vmul.f32 %v1955_v27, %v1884_v28  ;;  %v1991_v43 = vsub.f32 1.0, %v1974_v21 }
 0x207   :  { %v1992_v48 = vsub.f32 1.0, %v1975_v50  ;;  %v1993_v2 = vsub.f32 1.0, %v1976_v56  ;;  %v1994_v13 = vsub.f32 1.0, %v1977_v39  ;;  %v1995_v34 = vsub.f32 1.0, %v1978_v40 }
 0x208   :  { %v1996_v22 = vsub.f32 1.0, %v1979_v42  ;;  %v1997_v49 = vsub.f32 1.0, %v1980_v15  ;;  %v1998_v17 = vsub.f32 1.0, %v1981_v10  ;;  %v1999_v14 = vsub.f32 1.0, %v1982_v63  ;;  %v9750_v10 = vld [vmem:[#allocation47_spill] sm:$0xff] }
 0x209   :  { %v2000_v60 = vsub.f32 1.0, %v6634_v51  ;;  %v2001_v32 = vsub.f32 1.0, %v6637_v58  ;;  %v2002_v12 = vsub.f32 1.0, %v6640_v23  ;;  %v2003_v59 = vsub.f32 1.0, %v6643_v54  ;;  %v9751_v51 = vld [vmem:[#allocation51_spill] sm:$0xff] }
 0x20a   :  { %v2004_v28 = vsub.f32 1.0, %v6645_v52  ;;  %v2005_v46 = vsub.f32 1.0, %v6647_v19  ;;  %4217 = vrcp.f32 %v1990_v30  ;;  %v2047_v50 = vrot.slane %v6495_v18, %v9735_v1  ;;  %v9752_v23 = vld [vmem:[#allocation55_spill] sm:$0xff]  ;;  %v9753_v52 = vld [vmem:[#allocation57_spill] sm:$0xff] }
 0x20b   :  { %4219 = vrcp.f32 %v1991_v43  ;;  %v2051_v29 = vrot.slane %v6495_v18, %v9736_v36  ;;  %v2055_v44 = vrot.slane %v6495_v18, %v9737_v31  ;;  %v2059_v5 = vrot.slane %v6495_v18, %v9738_v9 }
 0x20c   :  { %4221 = vrcp.f32 %v1992_v48  ;;  %v2063_v26 = vrot.slane %v6495_v18, %v9739_v62  ;;  %v2067_v57 = vrot.slane %v6495_v18, %v9740_v6  ;;  %v2071_v33 = vrot.slane %v6495_v18, %v9741_v3 }
 0x20d   :  { %4223 = vrcp.f32 %v1993_v2  ;;  %v2075_v27 = vrot.slane %v6495_v18, %v9742_v35  ;;  %v2079_v45 = vrot.slane %v6499_v11, %v9735_v1  ;;  %v2083_v38 = vrot.slane %v6499_v11, %v9736_v36 }
 0x20e   :  { %4225 = vrcp.f32 %v1994_v13  ;;  %v2087_v61 = vrot.slane %v6499_v11, %v9737_v31  ;;  %v2091_v21 = vrot.slane %v6499_v11, %v9738_v9  ;;  %v2095_v39 = vrot.slane %v6499_v11, %v9739_v62  ;;  %v9754_v13 = vld [vmem:[#allocation78_spill] sm:$0xff] }
 0x20f   :  { %4227 = vrcp.f32 %v1995_v34  ;;  %v2099_v18 = vrot.slane %v6499_v11, %v9740_v6  ;;  %v2103_v40 = vrot.slane %v6499_v11, %v9741_v3  ;;  %v2107_v42 = vrot.slane %v6499_v11, %v9742_v35 }
 0x210   :  { %4229 = vrcp.f32 %v1996_v22  ;;  %v2111_v15 = vrot.slane %v6508_v53, %v9735_v1  ;;  %v2129_v63 = vmul.f32 %v2047_v50, %v9750_v10  ;;  %v2130_v58 = vmul.f32 %v2051_v29, %v9751_v51  ;;  %v9755_v22 = vld [vmem:[#allocation79_spill] sm:$0xff]  ;;  %v9756_v29 = vld [vmem:[#allocation81_spill] sm:$0xff] }
 0x211   :  { %4231 = vrcp.f32 %v1997_v49  ;;  %v2131_v54 = vmul.f32 %v2055_v44, %v9752_v23  ;;  %v2132_v30 = vmul.f32 %v2059_v5, %v9753_v52  ;;  %v2133_v43 = vmul.f32 %v2063_v26, %v9698_v8  ;;  %v9757_v5 = vld [vmem:[#allocation26_spill] sm:$0xff] }
 0x212   :  { %4233 = vrcp.f32 %v1998_v17  ;;  %v2134_v48 = vmul.f32 %v2067_v57, %v9699_v0  ;;  %v2135_v11 = vmul.f32 %v2071_v33, %v9700_v47  ;;  %v2136_v2 = vmul.f32 %v2075_v27, %v9702_v7  ;;  %v9758_v17 = vld [vmem:[#allocation28_spill] sm:$0xff]  ;;  %v9759_v27 = vld [vmem:[#allocation29_spill] sm:$0xff] }
 0x213   :  { %4235 = vrcp.f32 %v1999_v14  ;;  %v2137_v53 = vmul.f32 %v2079_v45, %v9703_v55  ;;  %v2138_v34 = vmul.f32 %v2083_v38, %v9754_v13  ;;  %v2139_v49 = vmul.f32 %v2087_v61, %v9755_v22  ;;  %v9760_v45 = vld [vmem:[#allocation84_spill] sm:$0xff]  ;;  %v9761_v38 = vld [vmem:[#allocation30_spill] sm:$0xff] }
 0x214   :  { %v4218_v50 = vpop.eup %4217  ;;  %4237 = vrcp.f32 %v2000_v60  ;;  %v2140_v44 = vmul.f32 %v2091_v21, %v9756_v29  ;;  %v6705_v26 = vmul.f32 %v2095_v39, %v9757_v5  ;;  %v6708_v57 = vmul.f32 %v2099_v18, %v9758_v17 }
 0x215   :  { %v4220_v33 = vpop.eup %4219  ;;  %4239 = vrcp.f32 %v2001_v32  ;;  %v6711_v14 = vmul.f32 %v2103_v40, %v9759_v27  ;;  %v6714_v37 = vmul.f32 %v2107_v42, %v9760_v45  ;;  %v6717_v61 = vmul.f32 %v2111_v15, %v9761_v38 }
 0x216   :  { %v4222_v60 = vpop.eup %4221  ;;  %4241 = vrcp.f32 %v2002_v12  ;;  %v6719_v21 = vmul.f32 %v4218_v50, %v2129_v63  ;;  %v6721_v39 = vmul.f32 %v4220_v33, %v2130_v58  ;;  %v2169_v18 = vrot.slane %v6608_v24, %v9735_v1 }
 0x217   :  { %v4224_v56 = vpop.eup %4223  ;;  %4243 = vrcp.f32 %v2003_v59  ;;  %v6725_v32 = vmul.f32 %v4222_v60, %v2131_v54  ;;  %v2173_v40 = vrot.slane %v6608_v24, %v9736_v36  ;;  %v2177_v42 = vrot.slane %v6608_v24, %v9737_v31 }
 0x218   :  { %v4226_v15 = vpop.eup %4225  ;;  %4245 = vrcp.f32 %v2004_v28  ;;  %v6731_v12 = vmul.f32 %v4224_v56, %v2132_v30  ;;  %v2181_v63 = vrot.slane %v6608_v24, %v9738_v9  ;;  %v2185_v58 = vrot.slane %v6608_v24, %v9739_v62 }
 0x219   :  { %v4228_v50 = vpop.eup %4227  ;;  %4247 = vrcp.f32 %v2005_v46  ;;  %v6739_v59 = vmul.f32 %v4226_v15, %v2133_v43  ;;  %v2189_v54 = vrot.slane %v6608_v24, %v9740_v6  ;;  %v2193_v28 = vrot.slane %v6608_v24, %v9741_v3 }
 0x21a   :  { %9762 = vst [vmem:[#allocation74_spill] sm:$0xff] %v6731_v12  ;;  %v4230_v56 = vpop.eup %4229  ;;  %v9764_v30 = vsub.f32 1.0, %v6649_v41  ;;  %v6747_v33 = vmul.f32 %v4228_v50, %v2134_v48  ;;  %v2197_v60 = vrot.slane %v6608_v24, %v9742_v35  ;;  %v2201_v19 = vrot.slane %v6613_v4, %v9735_v1 }
 0x21b   :  { %9763 = vst [vmem:[#allocation41_spill] sm:$0xff] %v6739_v59  ;;  %v4232_v46 = vpop.eup %4231  ;;  %v6753_v43 = vmul.f32 %v4230_v56, %v2135_v11  ;;  %v2205_v15 = vrot.slane %v6613_v4, %v9736_v36  ;;  %v2209_v16 = vrot.slane %v6613_v4, %v9737_v31  ;;  %v2213_v41 = vrot.slane %v6613_v4, %v9738_v9 }
 0x21c   :  { %4249 = vrcp.f32 %v9764_v30  ;;  %9765 = vst [vmem:[#allocation75_spill] sm:$0xff] %v6747_v33  ;;  %v4234_v48 = vpop.eup %4233  ;;  %v6761_v50 = vmul.f32 %v4232_v46, %v2136_v2  ;;  %v2217_v24 = vrot.slane %v6613_v4, %v9739_v62  ;;  %v2221_v30 = vrot.slane %v6613_v4, %v9740_v6 }
 0x21d   :  { %9766 = vst [vmem:[#allocation56_spill] sm:$0xff] %v6753_v43  ;;  %v2225_v11 = vrot.slane %v6613_v4, %v9741_v3  ;;  %v4236_v56 = vpop.eup %4235  ;;  %v6769_v20 = vmul.f32 %v4234_v48, %v2137_v53  ;;  %v2229_v38 = vrot.slane %v6613_v4, %v9742_v35  ;;  %v2233_v45 = vrot.slane %v6618_v25, %v9735_v1 }
 0x21e   :  { %9767 = vst [vmem:[#allocation58_spill] sm:$0xff] %v6761_v50  ;;  %v6776_v2 = vmul.f32 %v2169_v18, %v6719_v21  ;;  %v4238_v46 = vpop.eup %4237  ;;  %v6778_v27 = vmul.f32 %v4236_v56, %v2138_v34  ;;  %v6781_v17 = vmul.f32 %v2173_v40, %v6721_v39  ;;  %v6784_v5 = vmul.f32 %v2177_v42, %v6725_v32 }
 0x21f   :  { %9768 = vst [vmem:[#allocation95_spill] sm:$0xff] %v6769_v20  ;;  %v6787_v53 = vmul.f32 %v2181_v63, %v6731_v12  ;;  %v4240_v48 = vpop.eup %4239  ;;  %v6789_v4 = vmul.f32 %v4238_v46, %v2139_v49  ;;  %v6792_v25 = vmul.f32 %v2185_v58, %v6739_v59  ;;  %v6795_v18 = vmul.f32 %v2189_v54, %v6747_v33 }
 0x220   :  { %9769 = vst [vmem:[#allocation42_spill] sm:$0xff] %v6776_v2  ;;  %9770 = vst [vmem:[#allocation60_spill] sm:$0xff] %v6778_v27  ;;  %v6798_v34 = vmul.f32 %v2193_v28, %v6753_v43  ;;  %v4242_v40 = vpop.eup %4241  ;;  %v6800_v56 = vmul.f32 %v4240_v48, %v2140_v44  ;;  %v6803_v42 = vmul.f32 %v2197_v60, %v6761_v50  ;;  %v9784_v28 = vld [vmem:[#allocation48_spill] sm:$0xff] }
 0x221   :  { %9771 = vst [vmem:[#allocation76_spill] sm:$0xff] %v6781_v17  ;;  %9772 = vst [vmem:[#allocation45_spill] sm:$0xff] %v6784_v5  ;;  %v6806_v63 = vmul.f32 %v2201_v19, %v6769_v20  ;;  %v6809_v49 = vmul.f32 %v2205_v15, %v6778_v27  ;;  %v4244_v58 = vpop.eup %4243  ;;  %v6812_v46 = vmul.f32 %v4242_v40, %v6705_v26  ;;  %v9793_v50 = vld [vmem:[#allocation52_spill] sm:$0xff] }
 0x222   :  { %9773 = vst [vmem:[#allocation46_spill] sm:$0xff] %v6787_v53  ;;  %9774 = vst [vmem:[#allocation62_spill] sm:$0xff] %v6789_v4  ;;  %v6815_v54 = vmul.f32 %v2209_v16, %v6789_v4  ;;  %v2274_v44 = vrot.slane %v9784_v28, %v9735_v1  ;;  %v2278_v60 = vrot.slane %v9784_v28, %v9736_v36  ;;  %v4246_v48 = vpop.eup %4245 }
 0x223   :  { %9775 = vst [vmem:[#allocation77_spill] sm:$0xff] %v6792_v25  ;;  %9776 = vst [vmem:[#allocation49_spill] sm:$0xff] %v6795_v18  ;;  %v6822_v19 = vmul.f32 %v4244_v58, %v6708_v57  ;;  %v6825_v15 = vmul.f32 %v2213_v41, %v6800_v56  ;;  %v2282_v26 = vrot.slane %v9784_v28, %v9737_v31  ;;  %v4248_v40 = vpop.eup %4247 }
 0x224   :  { %9777 = vst [vmem:[#allocation64_spill] sm:$0xff] %v6798_v34  ;;  %9778 = vst [vmem:[#allocation65_spill] sm:$0xff] %v6800_v56  ;;  %v2286_v16 = vrot.slane %v9784_v28, %v9738_v9  ;;  %v6832_v4 = vmul.f32 %v4246_v48, %v6711_v14  ;;  %v6835_v27 = vmul.f32 %v2217_v24, %v6812_v46 }
 0x225   :  { %9779 = vst [vmem:[#allocation50_spill] sm:$0xff] %v6803_v42  ;;  %9780 = vst [vmem:[#allocation53_spill] sm:$0xff] %v6806_v63  ;;  %v2290_v57 = vrot.slane %v9784_v28, %v9739_v62  ;;  %v2294_v41 = vrot.slane %v9784_v28, %v9740_v6  ;;  %v6842_v56 = vmul.f32 %v4248_v40, %v6714_v37 }
 0x226   :  { %9781 = vst [vmem:[#allocation54_spill] sm:$0xff] %v6809_v49  ;;  %9782 = vst [vmem:[#allocation66_spill] sm:$0xff] %v6812_v46  ;;  %v4250_v58 = vpop.eup %4249  ;;  %v6845_v20 = vmul.f32 %v2221_v30, %v6822_v19  ;;  %v2298_v14 = vrot.slane %v9784_v28, %v9741_v3  ;;  %v2302_v24 = vrot.slane %v9784_v28, %v9742_v35 }
 0x227   :  { %9783 = vst [vmem:[#allocation67_spill] sm:$0xff] %v6815_v54  ;;  %9785 = vst [vmem:[#allocation68_spill] sm:$0xff] %v6822_v19  ;;  %v6852_v48 = vmul.f32 %v4250_v58, %v6717_v61  ;;  %v6855_v46 = vmul.f32 %v2225_v11, %v6832_v4  ;;  %v2306_v43 = vrot.slane %v9793_v50, %v9735_v1 }
 0x228   :  { %9786 = vst [vmem:[#allocation69_spill] sm:$0xff] %v6825_v15  ;;  %9787 = vst [vmem:[#allocation70_spill] sm:$0xff] %v6832_v4  ;;  %v2310_v37 = vrot.slane %v9793_v50, %v9736_v36  ;;  %v6862_v30 = vmul.f32 %v2229_v38, %v6842_v56  ;;  %v2314_v40 = vrot.slane %v9793_v50, %v9737_v31 }
 0x229   :  { %9788 = vst [vmem:[#allocation71_spill] sm:$0xff] %v6835_v27  ;;  %9789 = vst [vmem:[#allocation72_spill] sm:$0xff] %v6842_v56  ;;  %v2318_v28 = vrot.slane %v9793_v50, %v9738_v9  ;;  %v2322_v61 = vrot.slane %v9793_v50, %v9739_v62  ;;  %v6871_v11 = vmul.f32 %v2233_v45, %v6852_v48  ;;  %v9796_v56 = vld [vmem:[#allocation94_spill] sm:$0xff] }
 0x22a   :  { %9790 = vst [vmem:[#allocation98_spill] sm:$0xff] %v6845_v20  ;;  %9791 = vst [vmem:[#allocation99_spill] sm:$0xff] %v6852_v48  ;;  %v2326_v58 = vrot.slane %v9793_v50, %v9740_v6  ;;  %v2330_v4 = vrot.slane %v9793_v50, %v9741_v3  ;;  %v2334_v38 = vrot.slane %v9793_v50, %v9742_v35 }
 0x22b   :  { %9792 = vst [vmem:[#allocation100_spill] sm:$0xff] %v6855_v46  ;;  %9794 = vst [vmem:[#allocation35_spill] sm:$0xff] %v6862_v30  ;;  %v2338_v19 = vrot.slane %v9796_v56, %v9735_v1  ;;  %v6882_v33 = vmul.f32 %v2274_v44, %v9750_v10  ;;  %v6885_v59 = vmul.f32 %v2278_v60, %v9751_v51 }
 0x22c   :  { %9795 = vst [vmem:[#allocation31_spill] sm:$0xff] %v6871_v11  ;;  %v6888_v45 = vmul.f32 %v2282_v26, %v9752_v23  ;;  %v6891_v48 = vmul.f32 %v2286_v16, %v9753_v52  ;;  %v6894_v12 = vmul.f32 %v2290_v57, %v9698_v8  ;;  %v6897_v50 = vmul.f32 %v2294_v41, %v9699_v0  ;;  %v9801_v0 = vld [vmem:[#allocation26_spill] sm:$0xff] }
 0x22d   :  { %v6900_v56 = vmul.f32 %v2298_v14, %v9700_v47  ;;  %v6903_v10 = vmul.f32 %v2302_v24, %v9702_v7  ;;  %v6906_v51 = vmul.f32 %v2306_v43, %v9703_v55  ;;  %v6909_v23 = vmul.f32 %v2310_v37, %v9754_v13  ;;  %v9803_v47 = vld [vmem:[#allocation28_spill] sm:$0xff]  ;;  %v9805_v7 = vld [vmem:[#allocation29_spill] sm:$0xff]  ;;  %v9809_v13 = vld [vmem:[#allocation30_spill] sm:$0xff] }
 0x22e   :  { %v6912_v52 = vmul.f32 %v2314_v40, %v9755_v22  ;;  %v6915_v8 = vmul.f32 %v2318_v28, %v9756_v29  ;;  %v6918_v44 = vmul.f32 %v2322_v61, %v9801_v0  ;;  %v6921_v60 = vmul.f32 %v2326_v58, %v9803_v47  ;;  %v9807_v55 = vld [vmem:[#allocation84_spill] sm:$0xff] }
 0x22f   :  { %9797 = vst [vmem:[#allocation85_spill] sm:$0xff] %v6906_v51  ;;  %9798 = vst [vmem:[#allocation59_spill] sm:$0xff] %v6909_v23  ;;  %v6924_v26 = vmul.f32 %v2330_v4, %v9805_v7  ;;  %v6927_v43 = vmul.f32 %v2334_v38, %v9807_v55  ;;  %v6930_v16 = vmul.f32 %v2338_v19, %v9809_v13  ;;  %v9811_v55 = vld [vmem:[#allocation38_spill] sm:$0xff] }
 0x230   :  { %9799 = vst [vmem:[#allocation61_spill] sm:$0xff] %v6912_v52  ;;  %9800 = vst [vmem:[#allocation63_spill] sm:$0xff] %v6915_v8  ;;  %v2373_v22 = vmul.f32 %v6882_v33, %v6776_v2  ;;  %v2374_v29 = vmul.f32 %v6885_v59, %v6781_v17  ;;  %v2375_v57 = vmul.f32 %v6888_v45, %v6784_v5  ;;  %v9813_v17 = vld [vmem:[#allocation37_spill] sm:$0xff] }
 0x231   :  { %9802 = vst [vmem:[#allocation80_spill] sm:$0xff] %v6918_v44  ;;  %9804 = vst [vmem:[#allocation82_spill] sm:$0xff] %v6921_v60  ;;  %v2376_v41 = vmul.f32 %v6891_v48, %v6787_v53  ;;  %v2377_v4 = vmul.f32 %v6894_v12, %v6792_v25  ;;  %v2378_v14 = vmul.f32 %v6897_v50, %v6795_v18  ;;  %v9814_v2 = vsub.f32 1.0, %v9813_v17 }
 0x232   :  { %9806 = vst [vmem:[#allocation43_spill] sm:$0xff] %v6924_v26  ;;  %9808 = vst [vmem:[#allocation22_spill] sm:$0xff] %v6927_v43  ;;  %v2379_v19 = vmul.f32 %v6900_v56, %v6798_v34  ;;  %v2380_v24 = vmul.f32 %v6903_v10, %v6803_v42  ;;  %v2381_v37 = vmul.f32 %v6906_v51, %v6806_v63 }
 0x233   :  { %9810 = vst [vmem:[#allocation86_spill] sm:$0xff] %v6930_v16  ;;  %v2382_v40 = vmul.f32 %v6909_v23, %v6809_v49  ;;  %v2383_v28 = vmul.f32 %v6912_v52, %v6815_v54  ;;  %v2384_v61 = vmul.f32 %v6915_v8, %v6825_v15  ;;  %v2385_v58 = vmul.f32 %v6918_v44, %v6835_v27  ;;  %v9812_v49 = vld [vmem:[#allocation73_spill] sm:$0xff] }
 0x234   :  { %v2386_v38 = vmul.f32 %v6921_v60, %v6845_v20  ;;  %v2387_v0 = vmul.f32 %v6924_v26, %v6855_v46  ;;  %v2388_v47 = vmul.f32 %v6927_v43, %v6862_v30  ;;  %v2389_v7 = vmul.f32 %v6930_v16, %v6871_v11 }
 0x235   :  { %v2396_v13 = vrot.slane %v9811_v55, %v9735_v1  ;;  %v2400_v15 = vrot.slane %v9811_v55, %v9736_v36  ;;  %v2404_v27 = vrot.slane %v9811_v55, %v9737_v31  ;;  %v2408_v20 = vrot.slane %v9811_v55, %v9738_v9 }
 0x236   :  { %v2412_v46 = vrot.slane %v9811_v55, %v9739_v62  ;;  %v2416_v30 = vrot.slane %v9811_v55, %v9740_v6  ;;  %v2420_v11 = vrot.slane %v9811_v55, %v9741_v3  ;;  %v2424_v54 = vrot.slane %v9811_v55, %v9742_v35 }
 0x237   :  { %v2428_v63 = vrot.slane %v9812_v49, %v9735_v1  ;;  %v2432_v42 = vrot.slane %v9812_v49, %v9736_v36  ;;  %v2436_v34 = vrot.slane %v9812_v49, %v9737_v31  ;;  %v2440_v18 = vrot.slane %v9812_v49, %v9738_v9 }
 0x238   :  { %v2444_v25 = vrot.slane %v9812_v49, %v9739_v62  ;;  %v2448_v53 = vrot.slane %v9812_v49, %v9740_v6  ;;  %v2452_v55 = vrot.slane %v9812_v49, %v9741_v3  ;;  %v2456_v5 = vrot.slane %v9812_v49, %v9742_v35 }
 0x239   :  { %v2460_v16 = vrot.slane %v9814_v2, %v9735_v1  ;;  %v7001_v43 = vadd.f32 %v2396_v13, %v2373_v22  ;;  %v7003_v26 = vadd.f32 %v2400_v15, %v2374_v29  ;;  %v7005_v60 = vadd.f32 %v2404_v27, %v2375_v57  ;;  %v9838_v13 = vld [vmem:[#allocation74_spill] sm:$0xff] }
 0x23a   :  { %v7007_v44 = vadd.f32 %v2408_v20, %v2376_v41  ;;  %v7009_v8 = vadd.f32 %v2412_v46, %v2377_v4  ;;  %v7011_v52 = vadd.f32 %v2416_v30, %v2378_v14  ;;  %v7013_v23 = vadd.f32 %v2420_v11, %v2379_v19 }
 0x23b   :  { %9815 = vst [vmem:[#allocation32_spill] sm:$0xff] %v7001_v43  ;;  %9816 = vst [vmem:[#allocation23_spill] sm:$0xff] %v7003_v26  ;;  %v7015_v51 = vadd.f32 %v2424_v54, %v2380_v24  ;;  %v7017_v49 = vadd.f32 %v2428_v63, %v2381_v37  ;;  %v7019_v17 = vadd.f32 %v2432_v42, %v2382_v40  ;;  %v9832_v54 = vld [vmem:[#allocation34_spill] sm:$0xff]  ;;  %v9833_v63 = vld [vmem:[#allocation44_spill] sm:$0xff] }
 0x23c   :  { %9817 = vst [vmem:[#allocation89_spill] sm:$0xff] %v7005_v60  ;;  %9818 = vst [vmem:[#allocation88_spill] sm:$0xff] %v7007_v44  ;;  %v7021_v2 = vadd.f32 %v2436_v34, %v2383_v28  ;;  %v7023_v15 = vadd.f32 %v2440_v18, %v2384_v61  ;;  %v7025_v27 = vadd.f32 %v2444_v25, %v2385_v58  ;;  %v7036_v22 = vsub.f32 1.0, %v9832_v54  ;;  %v9834_v34 = vld [vmem:[#allocation36_spill] sm:$0xff] }
 0x23d   :  { %9819 = vst [vmem:[#allocation25_spill] sm:$0xff] %v7009_v8  ;;  %9820 = vst [vmem:[#allocation90_spill] sm:$0xff] %v7011_v52  ;;  %v7027_v20 = vadd.f32 %v2448_v53, %v2386_v38  ;;  %v7029_v46 = vadd.f32 %v2452_v55, %v2387_v0  ;;  %v7031_v30 = vadd.f32 %v2456_v5, %v2388_v47  ;;  %v7039_v42 = vsub.f32 1.0, %v9833_v63 }
 0x23e   :  { %9821 = vst [vmem:[#allocation24_spill] sm:$0xff] %v7013_v23  ;;  %9822 = vst [vmem:[#allocation40_spill] sm:$0xff] %v7015_v51  ;;  %v7033_v11 = vadd.f32 %v2460_v16, %v2389_v7  ;;  %v2501_v25 = vrot.slane %v9832_v54, %v9735_v1  ;;  %v2505_v53 = vrot.slane %v9832_v54, %v9736_v36 }
 0x23f   :  { %9823 = vst [vmem:[#allocation83_spill] sm:$0xff] %v7017_v49  ;;  %9824 = vst [vmem:[#allocation96_spill] sm:$0xff] %v7019_v17  ;;  %v2509_v5 = vrot.slane %v9832_v54, %v9737_v31  ;;  %v2513_v18 = vrot.slane %v9832_v54, %v9738_v9  ;;  %v2517_v16 = vrot.slane %v9832_v54, %v9739_v62 }
 0x240   :  { %9825 = vst [vmem:[#allocation33_spill] sm:$0xff] %v7021_v2  ;;  %9826 = vst [vmem:[#allocation97_spill] sm:$0xff] %v7023_v15  ;;  %v2521_v57 = vrot.slane %v9832_v54, %v9740_v6  ;;  %v2525_v41 = vrot.slane %v9832_v54, %v9741_v3  ;;  %v2529_v4 = vrot.slane %v9832_v54, %v9742_v35  ;;  %v9840_v54 = vld [vmem:[#allocation41_spill] sm:$0xff] }
 0x241   :  { %9827 = vst [vmem:[#allocation39_spill] sm:$0xff] %v7025_v27  ;;  %9828 = vst [vmem:[#allocation87_spill] sm:$0xff] %v7027_v20  ;;  %v2533_v14 = vrot.slane %v9833_v63, %v9735_v1  ;;  %v2537_v19 = vrot.slane %v9833_v63, %v9736_v36  ;;  %v2541_v24 = vrot.slane %v9833_v63, %v9737_v31  ;;  %v9873_v20 = vld [vmem:[#allocation22_spill] sm:$0xff] }
 0x242   :  { %9829 = vst [vmem:[#allocation14_spill] sm:$0xff] %v7029_v46  ;;  %9830 = vst [vmem:[#allocation15_spill] sm:$0xff] %v7031_v30  ;;  %v2545_v37 = vrot.slane %v9833_v63, %v9738_v9  ;;  %v2549_v40 = vrot.slane %v9833_v63, %v9739_v62  ;;  %v2553_v28 = vrot.slane %v9833_v63, %v9740_v6  ;;  %v9844_v30 = vld [vmem:[#allocation56_spill] sm:$0xff]  ;;  %v9874_v27 = vld [vmem:[#allocation86_spill] sm:$0xff] }
 0x243   :  { %9831 = vst [vmem:[#allocation16_spill] sm:$0xff] %v7033_v11  ;;  %v2557_v61 = vrot.slane %v9833_v63, %v9741_v3  ;;  %v2561_v58 = vrot.slane %v9833_v63, %v9742_v35  ;;  %v2565_v38 = vrot.slane %v9834_v34, %v9735_v1  ;;  %v7077_v0 = vmul.f32 %v2501_v25, %v6719_v21  ;;  %v9842_v11 = vld [vmem:[#allocation75_spill] sm:$0xff]  ;;  %v9846_v21 = vld [vmem:[#allocation58_spill] sm:$0xff] }
 0x244   :  { %v7080_v47 = vmul.f32 %v2505_v53, %v6721_v39  ;;  %v7083_v7 = vmul.f32 %v2509_v5, %v6725_v32  ;;  %v7086_v55 = vmul.f32 %v2513_v18, %v9838_v13  ;;  %v7089_v29 = vmul.f32 %v2517_v16, %v9840_v54  ;;  %v9848_v39 = vld [vmem:[#allocation95_spill] sm:$0xff]  ;;  %v9850_v32 = vld [vmem:[#allocation60_spill] sm:$0xff]  ;;  %v9852_v18 = vld [vmem:[#allocation62_spill] sm:$0xff] }
 0x245   :  { %9835 = vst [vmem:[#allocation17_spill] sm:$0xff] %v7077_v0  ;;  %v7092_v63 = vmul.f32 %v2521_v57, %v9842_v11  ;;  %v7095_v46 = vmul.f32 %v2525_v41, %v9844_v30  ;;  %v7098_v25 = vmul.f32 %v2529_v4, %v9846_v21  ;;  %v7101_v53 = vmul.f32 %v2533_v14, %v9848_v39  ;;  %v9854_v16 = vld [vmem:[#allocation65_spill] sm:$0xff]  ;;  %v9856_v11 = vld [vmem:[#allocation66_spill] sm:$0xff]  ;;  %v9858_v30 = vld [vmem:[#allocation68_spill] sm:$0xff] }
 0x246   :  { %9836 = vst [vmem:[#allocation18_spill] sm:$0xff] %v7080_v47  ;;  %9837 = vst [vmem:[#allocation19_spill] sm:$0xff] %v7083_v7  ;;  %v7104_v5 = vmul.f32 %v2537_v19, %v9850_v32  ;;  %v7107_v13 = vmul.f32 %v2541_v24, %v9852_v18  ;;  %v7110_v54 = vmul.f32 %v2545_v37, %v9854_v16  ;;  %v9860_v4 = vld [vmem:[#allocation70_spill] sm:$0xff]  ;;  %v9862_v14 = vld [vmem:[#allocation72_spill] sm:$0xff] }
 0x247   :  { %9839 = vst [vmem:[#allocation20_spill] sm:$0xff] %v7086_v55  ;;  %9841 = vst [vmem:[#allocation21_spill] sm:$0xff] %v7089_v29  ;;  %v7113_v57 = vmul.f32 %v2549_v40, %v9856_v11  ;;  %v7116_v41 = vmul.f32 %v2553_v28, %v9858_v30  ;;  %v7119_v21 = vmul.f32 %v2557_v61, %v9860_v4  ;;  %v9864_v19 = vld [vmem:[#allocation99_spill] sm:$0xff]  ;;  %v9866_v18 = vld [vmem:[#allocation85_spill] sm:$0xff] }
 0x248   :  { %9843 = vst [vmem:[#allocation91_spill] sm:$0xff] %v7092_v63  ;;  %9845 = vst [vmem:[#allocation92_spill] sm:$0xff] %v7095_v46  ;;  %v7122_v39 = vmul.f32 %v2561_v58, %v9862_v14  ;;  %v7125_v32 = vmul.f32 %v2565_v38, %v9864_v19  ;;  %v2600_v24 = vmul.f32 %v7077_v0, %v6882_v33  ;;  %v9867_v16 = vld [vmem:[#allocation59_spill] sm:$0xff]  ;;  %v9868_v11 = vld [vmem:[#allocation61_spill] sm:$0xff] }
 0x249   :  { %9847 = vst [vmem:[#allocation27_spill] sm:$0xff] %v7098_v25  ;;  %9849 = vst [vmem:[#allocation93_spill] sm:$0xff] %v7101_v53  ;;  %v2601_v37 = vmul.f32 %v7080_v47, %v6885_v59  ;;  %v2602_v40 = vmul.f32 %v7083_v7, %v6888_v45  ;;  %v2603_v28 = vmul.f32 %v7086_v55, %v6891_v48  ;;  %v9869_v30 = vld [vmem:[#allocation63_spill] sm:$0xff]  ;;  %v9870_v4 = vld [vmem:[#allocation80_spill] sm:$0xff] }
 0x24a   :  { %9851 = vst [vmem:[#allocation47_spill] sm:$0xff] %v7104_v5  ;;  %9853 = vst [vmem:[#allocation51_spill] sm:$0xff] %v7107_v13  ;;  %v2604_v61 = vmul.f32 %v7089_v29, %v6894_v12  ;;  %v2605_v58 = vmul.f32 %v7092_v63, %v6897_v50  ;;  %v2606_v38 = vmul.f32 %v7095_v46, %v6900_v56  ;;  %v9871_v14 = vld [vmem:[#allocation82_spill] sm:$0xff]  ;;  %v9872_v19 = vld [vmem:[#allocation43_spill] sm:$0xff] }
 0x24b   :  { %9855 = vst [vmem:[#allocation55_spill] sm:$0xff] %v7110_v54  ;;  %9857 = vst [vmem:[#allocation57_spill] sm:$0xff] %v7113_v57  ;;  %v2607_v33 = vmul.f32 %v7098_v25, %v6903_v10  ;;  %v2608_v59 = vmul.f32 %v7101_v53, %v9866_v18  ;;  %v2609_v45 = vmul.f32 %v7104_v5, %v9867_v16 }
 0x24c   :  { %9859 = vst [vmem:[#allocation78_spill] sm:$0xff] %v7116_v41  ;;  %9861 = vst [vmem:[#allocation79_spill] sm:$0xff] %v7119_v21  ;;  %v2610_v48 = vmul.f32 %v7107_v13, %v9868_v11  ;;  %v2611_v12 = vmul.f32 %v7110_v54, %v9869_v30  ;;  %v2612_v50 = vmul.f32 %v7113_v57, %v9870_v4 }
 0x24d   :  { %9863 = vst [vmem:[#allocation81_spill] sm:$0xff] %v7122_v39  ;;  %9865 = vst [vmem:[#allocation48_spill] sm:$0xff] %v7125_v32  ;;  %v2613_v56 = vmul.f32 %v7116_v41, %v9871_v14  ;;  %v2614_v10 = vmul.f32 %v7119_v21, %v9872_v19  ;;  %v2615_v18 = vmul.f32 %v7122_v39, %v9873_v20 }
 0x24e   :  { %v2616_v16 = vmul.f32 %v7125_v32, %v9874_v27  ;;  %v2623_v11 = vrot.slane %v7036_v22, %v9735_v1  ;;  %v2627_v30 = vrot.slane %v7036_v22, %v9736_v36  ;;  %v2631_v4 = vrot.slane %v7036_v22, %v9737_v31 }
 0x24f   :  { %v2635_v14 = vrot.slane %v7036_v22, %v9738_v9  ;;  %v2639_v19 = vrot.slane %v7036_v22, %v9739_v62  ;;  %v2643_v20 = vrot.slane %v7036_v22, %v9740_v6  ;;  %v2647_v27 = vrot.slane %v7036_v22, %v9741_v3 }
 0x250   :  { %v2651_v15 = vrot.slane %v7036_v22, %v9742_v35  ;;  %v2655_v2 = vrot.slane %v7039_v42, %v9735_v1  ;;  %v2659_v17 = vrot.slane %v7039_v42, %v9736_v36  ;;  %v2663_v49 = vrot.slane %v7039_v42, %v9737_v31 }
 0x251   :  { %v2667_v51 = vrot.slane %v7039_v42, %v9738_v9  ;;  %v2671_v23 = vrot.slane %v7039_v42, %v9739_v62  ;;  %v2675_v52 = vrot.slane %v7039_v42, %v9740_v6  ;;  %v2679_v22 = vrot.slane %v7039_v42, %v9741_v3 }
 0x252   :  { %v2683_v8 = vrot.slane %v7039_v42, %v9742_v35  ;;  %v9875_v36 = vsub.f32 1.0, %v9834_v34  ;;  %v7196_v31 = vadd.f32 %v2623_v11, %v2600_v24  ;;  %v7198_v60 = vadd.f32 %v2627_v30, %v2601_v37 }
 0x253   :  { %v7200_v9 = vadd.f32 %v2631_v4, %v2602_v40  ;;  %v7202_v62 = vadd.f32 %v2635_v14, %v2603_v28  ;;  %v7204_v26 = vadd.f32 %v2639_v19, %v2604_v61  ;;  %v7206_v6 = vadd.f32 %v2643_v20, %v2605_v58 }
 0x254   :  { %v2687_v44 = vrot.slane %v9875_v36, %v9735_v1  ;;  %9876 = vst [vmem:[#allocation52_spill] sm:$0xff] %v7196_v31  ;;  %9877 = vst [vmem:[#allocation94_spill] sm:$0xff] %v7198_v60  ;;  %v7208_v3 = vadd.f32 %v2647_v27, %v2606_v38  ;;  %v7210_v43 = vadd.f32 %v2651_v15, %v2607_v33 }
 0x255   :  { %9878 = vst [vmem:[#allocation26_spill] sm:$0xff] %v7200_v9  ;;  %9879 = vst [vmem:[#allocation28_spill] sm:$0xff] %v7202_v62  ;;  %v7212_v35 = vadd.f32 %v2655_v2, %v2608_v59  ;;  %v7214_v42 = vadd.f32 %v2659_v17, %v2609_v45  ;;  %v7216_v1 = vadd.f32 %v2663_v49, %v2610_v48 }
 0x256   :  { %9880 = vst [vmem:[#allocation29_spill] sm:$0xff] %v7204_v26  ;;  %9881 = vst [vmem:[#allocation84_spill] sm:$0xff] %v7206_v6  ;;  %v7218_v34 = vadd.f32 %v2667_v51, %v2611_v12  ;;  %v7220_v24 = vadd.f32 %v2671_v23, %v2612_v50  ;;  %v7222_v37 = vadd.f32 %v2675_v52, %v2613_v56 }
 0x257   :  { %9882 = vst [vmem:[#allocation30_spill] sm:$0xff] %v7208_v3  ;;  %9883 = vst [vmem:[#allocation38_spill] sm:$0xff] %v7210_v43  ;;  %v7224_v40 = vadd.f32 %v2679_v22, %v2614_v10  ;;  %v7226_v28 = vadd.f32 %v2683_v8, %v2615_v18  ;;  %v7228_v61 = vadd.f32 %v2687_v44, %v2616_v16 }
 0x258   :  { %9884 = vst [vmem:[#allocation73_spill] sm:$0xff] %v7212_v35  ;;  %9885 = vst [vmem:[#allocation37_spill] sm:$0xff] %v7214_v42  ;;  %v7232_v2 = vadd.f32 %v7196_v31, %v7077_v0  ;;  %v7236_v49 = vadd.f32 %v7198_v60, %v7080_v47  ;;  %v7240_v51 = vadd.f32 %v7200_v9, %v7083_v7 }
 0x259   :  { %9886 = vst [vmem:[#allocation34_spill] sm:$0xff] %v7216_v1  ;;  %9887 = vst [vmem:[#allocation44_spill] sm:$0xff] %v7218_v34  ;;  %v7244_v23 = vadd.f32 %v7202_v62, %v7086_v55  ;;  %v7248_v52 = vadd.f32 %v7204_v26, %v7089_v29  ;;  %v7252_v8 = vadd.f32 %v7206_v6, %v7092_v63 }
 0x25a   :  { %9888 = vst [vmem:[#allocation36_spill] sm:$0xff] %v7220_v24  ;;  %9889 = vst [vmem:[#allocation74_spill] sm:$0xff] %v7222_v37  ;;  %v7256_v44 = vadd.f32 %v7208_v3, %v7095_v46  ;;  %v7260_v17 = vadd.f32 %v7210_v43, %v7098_v25  ;;  %v7264_v15 = vadd.f32 %v7212_v35, %v7101_v53 }
 0x25b   :  { %9890 = vst [vmem:[#allocation41_spill] sm:$0xff] %v7224_v40  ;;  %9891 = vst [vmem:[#allocation75_spill] sm:$0xff] %v7226_v28  ;;  %v7268_v58 = vadd.f32 %v7214_v42, %v7104_v5  ;;  %v7272_v38 = vadd.f32 %v7216_v1, %v7107_v13  ;;  %v7276_v33 = vadd.f32 %v7218_v34, %v7110_v54 }
 0x25c   :  { %9892 = vst [vmem:[#allocation56_spill] sm:$0xff] %v7228_v61  ;;  %9893 = vst [vmem:[#allocation58_spill] sm:$0xff] %v7232_v2  ;;  %v7280_v59 = vadd.f32 %v7220_v24, %v7113_v57  ;;  %v7284_v45 = vadd.f32 %v7222_v37, %v7116_v41  ;;  %v7288_v48 = vadd.f32 %v7224_v40, %v7119_v21 }
 0x25d   :  { %9894 = vst [vmem:[#allocation95_spill] sm:$0xff] %v7236_v49  ;;  %9895 = vst [vmem:[#allocation60_spill] sm:$0xff] %v7240_v51  ;;  %v7292_v12 = vadd.f32 %v7226_v28, %v7122_v39  ;;  %v7296_v50 = vadd.f32 %v7228_v61, %v7125_v32  ;;  %v7300_v56 = vsub.f32 %v7196_v31, %v7077_v0 }
 0x25e   :  { %9896 = vst [vmem:[#allocation62_spill] sm:$0xff] %v7244_v23  ;;  %9897 = vst [vmem:[#allocation65_spill] sm:$0xff] %v7248_v52  ;;  %v7304_v10 = vsub.f32 %v7198_v60, %v7080_v47  ;;  %v7308_v18 = vsub.f32 %v7200_v9, %v7083_v7  ;;  %v7312_v16 = vsub.f32 %v7202_v62, %v7086_v55  ;;  %v2764_v55 = vadd.f32 1.0, %v7264_v15 }
 0x25f   :  { %9898 = vst [vmem:[#allocation66_spill] sm:$0xff] %v7252_v8  ;;  %9899 = vst [vmem:[#allocation68_spill] sm:$0xff] %v7256_v44  ;;  %v7316_v11 = vsub.f32 %v7204_v26, %v7089_v29  ;;  %v7320_v30 = vsub.f32 %v7206_v6, %v7092_v63  ;;  %v7324_v4 = vsub.f32 %v7208_v3, %v7095_v46  ;;  %v2758_v46 = vadd.f32 1.0, %v7240_v51 }
 0x260   :  { %9900 = vst [vmem:[#allocation70_spill] sm:$0xff] %v7260_v17  ;;  %9901 = vst [vmem:[#allocation72_spill] sm:$0xff] %v7264_v15  ;;  %v7328_v14 = vsub.f32 %v7210_v43, %v7098_v25  ;;  %v7332_v19 = vsub.f32 %v7212_v35, %v7101_v53  ;;  %v7336_v20 = vsub.f32 %v7214_v42, %v7104_v5  ;;  %v2756_v25 = vadd.f32 1.0, %v7232_v2 }
 0x261   :  { %9902 = vst [vmem:[#allocation99_spill] sm:$0xff] %v7268_v58  ;;  %9903 = vst [vmem:[#allocation85_spill] sm:$0xff] %v7272_v38  ;;  %v7340_v27 = vsub.f32 %v7216_v1, %v7107_v13  ;;  %v7344_v22 = vsub.f32 %v7218_v34, %v7110_v54  ;;  %v7348_v36 = vsub.f32 %v7220_v24, %v7113_v57  ;;  %v2757_v57 = vadd.f32 1.0, %v7236_v49 }
 0x262   :  { %9904 = vst [vmem:[#allocation59_spill] sm:$0xff] %v7276_v33  ;;  %9905 = vst [vmem:[#allocation61_spill] sm:$0xff] %v7280_v59  ;;  %v7352_v53 = vsub.f32 %v7222_v37, %v7116_v41  ;;  %v7356_v5 = vsub.f32 %v7224_v40, %v7119_v21  ;;  %v7360_v13 = vsub.f32 %v7226_v28, %v7122_v39  ;;  %v2759_v41 = vadd.f32 1.0, %v7244_v23 }
 0x263   :  { %9906 = vst [vmem:[#allocation63_spill] sm:$0xff] %v7284_v45  ;;  %9907 = vst [vmem:[#allocation80_spill] sm:$0xff] %v7288_v48  ;;  %v7364_v54 = vsub.f32 %v7228_v61, %v7125_v32  ;;  %v2760_v63 = vadd.f32 1.0, %v7248_v52  ;;  %v2761_v21 = vadd.f32 1.0, %v7252_v8  ;;  %v2762_v29 = vadd.f32 1.0, %v7256_v44 }
 0x264   :  { %9908 = vst [vmem:[#allocation82_spill] sm:$0xff] %v7292_v12  ;;  %9909 = vst [vmem:[#allocation43_spill] sm:$0xff] %v7296_v50  ;;  %v2763_v39 = vadd.f32 1.0, %v7260_v17  ;;  %v2765_v32 = vadd.f32 1.0, %v7268_v58  ;;  %v2766_v7 = vadd.f32 1.0, %v7272_v38  ;;  %v2767_v47 = vadd.f32 1.0, %v7276_v33 }
 0x265   :  { %9910 = vst [vmem:[#allocation22_spill] sm:$0xff] %v7344_v22  ;;  %9911 = vst [vmem:[#allocation86_spill] sm:$0xff] %v7348_v36  ;;  %v2768_v0 = vadd.f32 1.0, %v7280_v59  ;;  %v2769_v61 = vadd.f32 1.0, %v7284_v45  ;;  %v2770_v28 = vadd.f32 1.0, %v7288_v48  ;;  %v2771_v40 = vadd.f32 1.0, %v7292_v12 }
 0x266   :  { %9912 = vst [vmem:[#allocation101_spill] sm:$0xff] %v7352_v53  ;;  %9913 = vst [vmem:[#allocation102_spill] sm:$0xff] %v7356_v5  ;;  %v2772_v37 = vadd.f32 1.0, %v7296_v50  ;;  %v2773_v24 = vadd.f32 1.0, %v7300_v56  ;;  %v2774_v34 = vadd.f32 1.0, %v7304_v10  ;;  %v2775_v1 = vadd.f32 1.0, %v7308_v18 }
 0x267   :  { %9914 = vst [vmem:[#allocation103_spill] sm:$0xff] %v7364_v54  ;;  %v2776_v42 = vadd.f32 1.0, %v7312_v16  ;;  %v2777_v35 = vadd.f32 1.0, %v7316_v11  ;;  %v2778_v43 = vadd.f32 1.0, %v7320_v30  ;;  %v2779_v3 = vadd.f32 1.0, %v7324_v4 }
 0x268   :  { %v2780_v6 = vadd.f32 1.0, %v7328_v14  ;;  %v2781_v26 = vadd.f32 1.0, %v7332_v19  ;;  %v2782_v62 = vadd.f32 1.0, %v7336_v20  ;;  %v2783_v9 = vadd.f32 1.0, %v7340_v27 }
 0x269   :  { %v2784_v60 = vadd.f32 1.0, %v7344_v22  ;;  %v2785_v31 = vadd.f32 1.0, %v7348_v36  ;;  %v2786_v50 = vadd.f32 1.0, %v7352_v53  ;;  %v2787_v12 = vadd.f32 1.0, %v7356_v5 }
 0x26a   :  { %v2788_v48 = vadd.f32 1.0, %v7360_v13  ;;  %v2789_v45 = vadd.f32 1.0, %v7364_v54  ;;  %v2790_v59 = vmul.f32 %v2773_v24, %v2756_v25  ;;  %v2791_v33 = vmul.f32 %v2774_v34, %v2757_v57 }
 0x26b   :  { %v2792_v38 = vmul.f32 %v2775_v1, %v2758_v46  ;;  %v2793_v58 = vmul.f32 %v2776_v42, %v2759_v41  ;;  %v2794_v15 = vmul.f32 %v2777_v35, %v2760_v63  ;;  %v2795_v17 = vmul.f32 %v2778_v43, %v2761_v21  ;;  %v9919_v35 = vld [vmem:[#allocation58_spill] sm:$0xff] }
 0x26c   :  { %v2796_v44 = vmul.f32 %v2779_v3, %v2762_v29  ;;  %v2797_v8 = vmul.f32 %v2780_v6, %v2763_v39  ;;  %v2798_v52 = vmul.f32 %v2781_v26, %v2764_v55  ;;  %v2799_v23 = vmul.f32 %v2782_v62, %v2765_v32  ;;  %v9915_v57 = vld [vmem:[#allocation22_spill] sm:$0xff] }
 0x26d   :  { %v2800_v51 = vmul.f32 %v2783_v9, %v2766_v7  ;;  %v2801_v49 = vmul.f32 %v2784_v60, %v2767_v47  ;;  %v2802_v2 = vmul.f32 %v2785_v31, %v2768_v0  ;;  %v2803_v53 = vmul.f32 %v2786_v50, %v2769_v61  ;;  %v9916_v21 = vld [vmem:[#allocation86_spill] sm:$0xff]  ;;  %v9917_v31 = vld [vmem:[#allocation101_spill] sm:$0xff] }
 0x26e   :  { %v2804_v36 = vmul.f32 %v2787_v12, %v2770_v28  ;;  %v2805_v5 = vmul.f32 %v2788_v48, %v2771_v40  ;;  %v7400_v22 = vmul.f32 %v2789_v45, %v2772_v37  ;;  %v2807_v54 = vsub.f32 1.0, %v7300_v56  ;;  %v9918_v62 = vld [vmem:[#allocation102_spill] sm:$0xff]  ;;  %v9920_v34 = vld [vmem:[#allocation103_spill] sm:$0xff] }
 0x26f   :  { %v2808_v25 = vsub.f32 1.0, %v7304_v10  ;;  %v2809_v46 = vsub.f32 1.0, %v7308_v18  ;;  %v2810_v43 = vsub.f32 1.0, %v7312_v16  ;;  %v2811_v29 = vsub.f32 1.0, %v7316_v11  ;;  %v9923_v50 = vld [vmem:[#allocation62_spill] sm:$0xff]  ;;  %v9924_v16 = vld [vmem:[#allocation65_spill] sm:$0xff] }
 0x270   :  { %v2812_v26 = vsub.f32 1.0, %v7320_v30  ;;  %v2813_v60 = vsub.f32 1.0, %v7324_v4  ;;  %v2814_v0 = vsub.f32 1.0, %v7328_v14  ;;  %v2815_v47 = vsub.f32 1.0, %v7332_v19 }
 0x271   :  { %v2816_v7 = vsub.f32 1.0, %v7336_v20  ;;  %v2824_v55 = vmul.f32 %v2807_v54, %v2790_v59  ;;  %v2817_v63 = vsub.f32 1.0, %v7340_v27  ;;  %v2818_v41 = vsub.f32 1.0, %v9915_v57  ;;  %v9921_v54 = vld [vmem:[#allocation95_spill] sm:$0xff]  ;;  %v9922_v59 = vld [vmem:[#allocation60_spill] sm:$0xff] }
 0x272   :  { %v2819_v39 = vsub.f32 1.0, %v9916_v21  ;;  %v2825_v32 = vmul.f32 %v2808_v25, %v2791_v33  ;;  %v2820_v9 = vsub.f32 1.0, %v9917_v31  ;;  %v2821_v6 = vsub.f32 1.0, %v9918_v62 }
 0x273   :  { %v2826_v3 = vmul.f32 %v2809_v46, %v2792_v38  ;;  %v2841_v42 = vsub.f32 1.0, %v9919_v35  ;;  %v2822_v1 = vsub.f32 1.0, %v7360_v13  ;;  %v2823_v24 = vsub.f32 1.0, %v9920_v34  ;;  %v9972_v35 = vld [vmem:[#allocation19_spill] sm:$0xff] }
 0x274   :  { %v2827_v37 = vmul.f32 %v2810_v43, %v2793_v58  ;;  %v2842_v40 = vsub.f32 1.0, %v9921_v54  ;;  %v2828_v28 = vmul.f32 %v2811_v29, %v2794_v15  ;;  %v2829_v61 = vmul.f32 %v2812_v26, %v2795_v17  ;;  %v9925_v58 = vld [vmem:[#allocation66_spill] sm:$0xff]  ;;  %v9926_v17 = vld [vmem:[#allocation68_spill] sm:$0xff] }
 0x275   :  { %v2843_v45 = vsub.f32 1.0, %v9922_v59  ;;  %v2858_v48 = vmul.f32 %v2841_v42, %v2824_v55  ;;  %v2830_v33 = vmul.f32 %v2813_v60, %v2796_v44  ;;  %v2831_v12 = vmul.f32 %v2814_v0, %v2797_v8  ;;  %v9927_v44 = vld [vmem:[#allocation70_spill] sm:$0xff]  ;;  %v9928_v29 = vld [vmem:[#allocation72_spill] sm:$0xff]  ;;  %v9929_v0 = vld [vmem:[#allocation99_spill] sm:$0xff] }
 0x276   :  { %v2844_v56 = vsub.f32 1.0, %v9923_v50  ;;  %v2859_v10 = vmul.f32 %v2842_v40, %v2825_v32  ;;  %v2832_v38 = vmul.f32 %v2815_v47, %v2798_v52  ;;  %v2833_v18 = vmul.f32 %v2816_v7, %v2799_v23  ;;  %v9930_v55 = vld [vmem:[#allocation85_spill] sm:$0xff]  ;;  %v9933_v42 = vld [vmem:[#allocation63_spill] sm:$0xff]  ;;  %v9934_v40 = vld [vmem:[#allocation80_spill] sm:$0xff] }
 0x277   :  { %v2845_v11 = vsub.f32 1.0, %v9924_v16  ;;  %v2860_v13 = vmul.f32 %v2843_v45, %v2826_v3  ;;  %v2834_v30 = vmul.f32 %v2817_v63, %v2800_v51  ;;  %v2835_v4 = vmul.f32 %v2818_v41, %v2801_v49  ;;  %v9931_v41 = vld [vmem:[#allocation59_spill] sm:$0xff]  ;;  %v9971_v59 = vld [vmem:[#allocation18_spill] sm:$0xff] }
 0x278   :  { %v2846_v14 = vsub.f32 1.0, %v9925_v58  ;;  %v2861_v19 = vmul.f32 %v2844_v56, %v2827_v37  ;;  %v2836_v15 = vmul.f32 %v2819_v39, %v2802_v2  ;;  %v2847_v20 = vsub.f32 1.0, %v9926_v17  ;;  %v9969_v17 = vld [vmem:[#allocation56_spill] sm:$0xff] }
 0x279   :  { %v2862_v27 = vmul.f32 %v2845_v11, %v2828_v28  ;;  %v7426_v25 = vmax.f32 %v2858_v48, 0.0  ;;  %v2837_v8 = vmul.f32 %v2820_v9, %v2803_v53  ;;  %v2848_v46 = vsub.f32 1.0, %v9927_v44 }
 0x27a   :  { %v2863_v43 = vmul.f32 %v2846_v14, %v2829_v61  ;;  %v7429_v52 = vmax.f32 %v2859_v10, 0.0  ;;  %v2838_v23 = vmul.f32 %v2821_v6, %v2804_v36  ;;  %v2849_v26 = vsub.f32 1.0, %v9928_v29  ;;  %v9935_v61 = vld [vmem:[#allocation82_spill] sm:$0xff]  ;;  %v9968_v29 = vld [vmem:[#allocation75_spill] sm:$0xff] }
 0x27b   :  { %v2864_v51 = vmul.f32 %v2847_v20, %v2830_v33  ;;  %v7432_v49 = vmax.f32 %v2860_v13, 0.0  ;;  %v2839_v60 = vmul.f32 %v2822_v1, %v2805_v5  ;;  %v2850_v2 = vsub.f32 1.0, %v9929_v0  ;;  %v9932_v5 = vld [vmem:[#allocation61_spill] sm:$0xff] }
 0x27c   :  { %v2865_v47 = vmul.f32 %v2848_v46, %v2831_v12  ;;  %v7435_v7 = vmax.f32 %v2861_v19, 0.0  ;;  %v2851_v63 = vsub.f32 1.0, %v9930_v55  ;;  %v2866_v53 = vmul.f32 %v2849_v26, %v2832_v38 }
 0x27d   :  { %v7438_v57 = vmax.f32 %v2862_v27, 0.0  ;;  %4251 = vrsqrt.f32 %v7426_v25  ;;  %v2852_v36 = vsub.f32 1.0, %v9931_v41  ;;  %v2867_v21 = vmul.f32 %v2850_v2, %v2833_v18  ;;  %v9966_v41 = vld [vmem:[#allocation41_spill] sm:$0xff] }
 0x27e   :  { %v7442_v39 = vmax.f32 %v2863_v43, 0.0  ;;  %4253 = vrsqrt.f32 %v7429_v52  ;;  %v2853_v32 = vsub.f32 1.0, %v9932_v5  ;;  %v2868_v31 = vmul.f32 %v2851_v63, %v2834_v30 }
 0x27f   :  { %v7446_v9 = vmax.f32 %v2864_v51, 0.0  ;;  %4255 = vrsqrt.f32 %v7432_v49  ;;  %v2840_v62 = vmul.f32 %v2823_v24, %v7400_v22  ;;  %v2869_v6 = vmul.f32 %v2852_v36, %v2835_v4  ;;  %v9936_v22 = vld [vmem:[#allocation43_spill] sm:$0xff] }
 0x280   :  { %v7450_v3 = vmax.f32 %v2865_v47, 0.0  ;;  %4257 = vrsqrt.f32 %v7435_v7  ;;  %v2854_v1 = vsub.f32 1.0, %v9933_v42  ;;  %v2870_v34 = vmul.f32 %v2853_v32, %v2836_v15  ;;  %v9965_v42 = vld [vmem:[#allocation74_spill] sm:$0xff] }
 0x281   :  { %v7454_v37 = vmax.f32 %v2866_v53, 0.0  ;;  %4259 = vrsqrt.f32 %v7438_v57  ;;  %v2855_v28 = vsub.f32 1.0, %v9934_v40  ;;  %v2856_v45 = vsub.f32 1.0, %v9935_v61  ;;  %v9964_v61 = vld [vmem:[#allocation36_spill] sm:$0xff] }
 0x282   :  { %v7459_v48 = vmax.f32 %v2867_v21, 0.0  ;;  %4261 = vrsqrt.f32 %v7442_v39  ;;  %v2857_v24 = vsub.f32 1.0, %v9936_v22  ;;  %v2871_v33 = vmul.f32 %v2854_v1, %v2837_v8 }
 0x283   :  { %v7463_v12 = vmax.f32 %v2868_v31, 0.0  ;;  %4263 = vrsqrt.f32 %v7446_v9  ;;  %v2872_v56 = vmul.f32 %v2855_v28, %v2838_v23  ;;  %v7466_v10 = vmax.f32 %v2869_v6, 0.0 }
 0x284   :  { %4265 = vrsqrt.f32 %v7450_v3  ;;  %v2873_v38 = vmul.f32 %v2856_v45, %v2839_v60  ;;  %v2874_v18 = vmul.f32 %v2857_v24, %v2840_v62  ;;  %v7469_v11 = vmax.f32 %v2870_v34, 0.0 }
 0x285   :  { %4267 = vrsqrt.f32 %v7454_v37  ;;  %v7473_v30 = vmax.f32 %v2871_v33, 0.0  ;;  %v7476_v14 = vmax.f32 %v2872_v56, 0.0  ;;  %vm2894_vm7 = vcmp.eq.f32.partialorder %v7426_v25, inf }
 0x286   :  { %4269 = vrsqrt.f32 %v7459_v48  ;;  %v7479_v15 = vmax.f32 %v2873_v38, 0.0  ;;  %v7481_v20 = vmax.f32 %v2874_v18, 0.0  ;;  %vm2896_vm8 = vcmp.eq.f32.partialorder %v7426_v25, 0.0 }
 0x287   :  { %v4252_v13 = vpop.eup %4251  ;;  %4271 = vrsqrt.f32 %v7463_v12  ;;  %v2897_v8 = vand.u32 2147483648, %v7426_v25  ;;  %vm2901_vm9 = vcmp.eq.f32.partialorder %v7429_v52, inf  ;;  %vm2903_vm10 = vcmp.eq.f32.partialorder %v7429_v52, 0.0 }
 0x288   :  { %v4254_v4 = vpop.eup %4253  ;;  %4273 = vrsqrt.f32 %v7466_v10  ;;  %v2904_v43 = vand.u32 2147483648, %v7429_v52  ;;  %vm2908_vm11 = vcmp.eq.f32.partialorder %v7432_v49, inf  ;;  %v2911_v23 = vand.u32 2147483648, %v7432_v49 }
 0x289   :  { %v4256_v19 = vpop.eup %4255  ;;  %4275 = vrsqrt.f32 %v7469_v11  ;;  %v2893_v51 = vmul.f32 %v4252_v13, %v7426_v25  ;;  %v2900_v60 = vmul.f32 %v4254_v4, %v7429_v52  ;;  %vm2910_vm12 = vcmp.eq.f32.partialorder %v7432_v49, 0.0 }
 0x28a   :  { %v4258_v27 = vpop.eup %4257  ;;  %4277 = vrsqrt.f32 %v7473_v30  ;;  %vm2915_vm13 = vcmp.eq.f32.partialorder %v7435_v7, inf  ;;  %v2918_v2 = vand.u32 2147483648, %v7435_v7  ;;  %vm2922_vm14 = vcmp.eq.f32.partialorder %v7438_v57, inf }
 0x28b   :  { %v4260_v46 = vpop.eup %4259  ;;  %v2925_v63 = vand.u32 2147483648, %v7438_v57  ;;  %vm2929_vm15 = vcmp.eq.f32.partialorder %v7442_v39, inf  ;;  %v2932_v53 = vand.u32 2147483648, %v7442_v39  ;;  %v2907_v21 = vmul.f32 %v4256_v19, %v7432_v49 }
 0x28c   :  { %v4262_v26 = vpop.eup %4261  ;;  %vm2917_vm0 = vcmp.eq.f32.partialorder %v7435_v7, 0.0  ;;  %vm2936_vm1 = vcmp.eq.f32.partialorder %v7446_v9, inf  ;;  %v2939_v32 = vand.u32 2147483648, %v7446_v9  ;;  %v2946_v31 = vand.u32 2147483648, %v7450_v3 }
 0x28d   :  { %v4264_v47 = vpop.eup %4263  ;;  %v2953_v6 = vand.u32 2147483648, %v7454_v37  ;;  %4279 = vrsqrt.f32 %v7476_v14  ;;  %v2895_v28 = vsel %vm2894_vm7, %v7426_v25, %v2893_v51  ;;  %v2902_v45 = vsel %vm2901_vm9, %v7429_v52, %v2900_v60 }
 0x28e   :  { %v4266_v36 = vpop.eup %4265  ;;  %v2914_v24 = vmul.f32 %v4258_v27, %v7435_v7  ;;  %vm2924_vm5 = vcmp.eq.f32.partialorder %v7438_v57, 0.0  ;;  %vm2931_vm6 = vcmp.eq.f32.partialorder %v7442_v39, 0.0  ;;  %v2967_v56 = vand.u32 2147483648, %v7463_v12 }
 0x28f   :  { %v4268_v62 = vpop.eup %4267  ;;  %vm2971_vm2 = vcmp.eq.f32.partialorder %v7466_v10, inf  ;;  %v2974_v38 = vand.u32 2147483648, %v7466_v10  ;;  %vm2978_vm7 = vcmp.eq.f32.partialorder %v7469_v11, inf  ;;  %v2909_v13 = vsel %vm2908_vm11, %v7432_v49, %v2907_v21 }
 0x290   :  { %v4270_v34 = vpop.eup %4269  ;;  %v2921_v4 = vmul.f32 %v4260_v46, %v7438_v57  ;;  %v2928_v19 = vmul.f32 %v4262_v26, %v7442_v39  ;;  %vm2945_vm9 = vcmp.eq.f32.partialorder %v7450_v3, 0.0  ;;  %vm2952_vm3 = vcmp.eq.f32.partialorder %v7454_v37, 0.0 }
 0x291   :  { %v4272_v33 = vpop.eup %4271  ;;  %vm2959_vm4 = vcmp.eq.f32.partialorder %v7459_v48, 0.0  ;;  %v2981_v27 = vand.u32 2147483648, %v7469_v11  ;;  %v7539_v60 = vsel %vm2896_vm8, %v2897_v8, %v2895_v28  ;;  %v7543_v21 = vsel %vm2903_vm10, %v2904_v43, %v2902_v45 }
 0x292   :  { %v4274_v18 = vpop.eup %4273  ;;  %v2935_v46 = vmul.f32 %v4264_v47, %v7446_v9  ;;  %4281 = vrsqrt.f32 %v7479_v15  ;;  %v2916_v26 = vsel %vm2915_vm13, %v7435_v7, %v2914_v24  ;;  %v2942_v1 = vmul.f32 %v4266_v36, %v7450_v3 }
 0x293   :  { %v4276_v51 = vpop.eup %4275  ;;  %v2949_v25 = vmul.f32 %v4268_v62, %v7454_v37  ;;  %v2956_v8 = vmul.f32 %v4270_v34, %v7459_v48  ;;  %vm2973_vm8 = vcmp.eq.f32.partialorder %v7466_v10, 0.0  ;;  %vm2980_vm10 = vcmp.eq.f32.partialorder %v7469_v11, 0.0 }
 0x294   :  { %v4278_v52 = vpop.eup %4277  ;;  %v7558_v43 = vsel %vm2910_vm12, %v2911_v23, %v2909_v13  ;;  %v2963_v47 = vmul.f32 %v4272_v33, %v7463_v12  ;;  %vm2985_vm11 = vcmp.eq.f32.partialorder %v7473_v30, inf  ;;  %4283 = vrsqrt.f32 %v7481_v20 }
 0x295   :  { %v2923_v36 = vsel %vm2922_vm14, %v7438_v57, %v2921_v4  ;;  %v2930_v62 = vsel %vm2929_vm15, %v7442_v39, %v2928_v19  ;;  %v2970_v34 = vmul.f32 %v4274_v18, %v7466_v10  ;;  %v2977_v49 = vmul.f32 %v4276_v51, %v7469_v11 }
 0x296   :  { %v7573_v23 = vsel %vm2917_vm0, %v2918_v2, %v2916_v26  ;;  %v2937_v28 = vsel %vm2936_vm1, %v7446_v9, %v2935_v46  ;;  %vm2987_vm12 = vcmp.eq.f32.partialorder %v7473_v30, 0.0  ;;  %v2988_v45 = vand.u32 2147483648, %v7473_v30  ;;  %v9951_v26 = vld [vmem:[#allocation52_spill] sm:$0xff] }
 0x297   :  { %vm9937_vm13 = vcmp.eq.f32.partialorder %v7450_v3, inf  ;;  %vm9938_vm14 = vcmp.eq.f32.partialorder %v7454_v37, inf  ;;  %vm9939_vm15 = vcmp.eq.f32.partialorder %v7459_v48, inf  ;;  %v2984_v2 = vmul.f32 %v4278_v52, %v7473_v30  ;;  %v4280_v18 = vpop.eup %4279 }
 0x298   :  { %v2944_v24 = vsel %vm9937_vm13, %v7450_v3, %v2942_v1  ;;  %v2951_v33 = vsel %vm9938_vm14, %v7454_v37, %v2949_v25  ;;  %v2958_v7 = vsel %vm9939_vm15, %v7459_v48, %v2956_v8  ;;  %v7594_v13 = vsel %vm2924_vm5, %v2925_v63, %v2923_v36  ;;  %v9952_v8 = vld [vmem:[#allocation94_spill] sm:$0xff] }
 0x299   :  { %v7600_v1 = vsel %vm2931_vm6, %v2932_v53, %v2930_v62  ;;  %vm9940_vm0 = vcmp.eq.f32.partialorder %v7463_v12, inf  ;;  %vm2992_vm1 = vcmp.eq.f32.partialorder %v7476_v14, inf  ;;  %vm9941_vm13 = vcmp.eq.f32.partialorder %v7446_v9, 0.0  ;;  %v9956_v62 = vld [vmem:[#allocation29_spill] sm:$0xff] }
 0x29a   :  { %v2965_v4 = vsel %vm9940_vm0, %v7463_v12, %v2963_v47  ;;  %v7610_v19 = vsel %vm9941_vm13, %v2939_v32, %v2937_v28  ;;  %v2972_v57 = vsel %vm2971_vm2, %v7466_v10, %v2970_v34  ;;  %v2979_v39 = vsel %vm2978_vm7, %v7469_v11, %v2977_v49  ;;  %v9955_v47 = vld [vmem:[#allocation28_spill] sm:$0xff] }
 0x29b   :  { %9942 = vst [vmem:[#allocation22_spill] sm:$0xff] %v7610_v19  ;;  %vm2994_vm5 = vcmp.eq.f32.partialorder %v7476_v14, 0.0  ;;  %v7623_v63 = vsel %vm2945_vm9, %v2946_v31, %v2944_v24  ;;  %v7629_v9 = vsel %vm2952_vm3, %v2953_v6, %v2951_v33  ;;  %v9945_v53 = vand.u32 2147483648, %v7459_v48  ;;  %v9957_v49 = vld [vmem:[#allocation84_spill] sm:$0xff] }
 0x29c   :  { %9943 = vst [vmem:[#allocation86_spill] sm:$0xff] %v7623_v63  ;;  %9944 = vst [vmem:[#allocation101_spill] sm:$0xff] %v7629_v9  ;;  %v2995_v51 = vand.u32 2147483648, %v7476_v14  ;;  %vm9947_vm2 = vcmp.eq.f32.partialorder %v7463_v12, 0.0  ;;  %v2986_v3 = vsel %vm2985_vm11, %v7473_v30, %v2984_v2  ;;  %v2991_v37 = vmul.f32 %v4280_v18, %v7476_v14  ;;  %v4282_v31 = vpop.eup %4281  ;;  %v9958_v30 = vld [vmem:[#allocation30_spill] sm:$0xff]  ;;  %v9960_v18 = vld [vmem:[#allocation73_spill] sm:$0xff] }
 0x29d   :  { %v7635_v32 = vsel %vm2959_vm4, %v9945_v53, %v2958_v7  ;;  %v7640_v46 = vsel %vm9947_vm2, %v2967_v56, %v2965_v4  ;;  %vm2999_vm3 = vcmp.eq.f32.partialorder %v7479_v15, inf  ;;  %v7649_v48 = vsel %vm2973_vm8, %v2974_v38, %v2972_v57  ;;  %v9953_v38 = vld [vmem:[#allocation26_spill] sm:$0xff]  ;;  %v9961_v57 = vld [vmem:[#allocation37_spill] sm:$0xff] }
 0x29e   :  { %9946 = vst [vmem:[#allocation102_spill] sm:$0xff] %v7635_v32  ;;  %9948 = vst [vmem:[#allocation103_spill] sm:$0xff] %v7640_v46  ;;  %v7653_v6 = vsel %vm2980_vm10, %v2981_v27, %v2979_v39  ;;  %v3002_v12 = vand.u32 2147483648, %v7479_v15  ;;  %vm3006_vm4 = vcmp.eq.f32.partialorder %v7481_v20, inf  ;;  %vm3001_vm6 = vcmp.eq.f32.partialorder %v7479_v15, 0.0  ;;  %v4284_v11 = vpop.eup %4283  ;;  %v9959_v7 = vld [vmem:[#allocation38_spill] sm:$0xff] }
 0x29f   :  { %9949 = vst [vmem:[#allocation104_spill] sm:$0xff] %v7649_v48  ;;  %9950 = vst [vmem:[#allocation105_spill] sm:$0xff] %v7653_v6  ;;  %v3009_v56 = vand.u32 2147483648, %v7481_v20  ;;  %v3011_v25 = vmul.f32 %v9951_v26, %v9951_v26  ;;  %v3012_v10 = vmul.f32 %v9952_v8, %v9952_v8  ;;  %v3013_v52 = vmul.f32 %v9953_v38, %v9953_v38  ;;  %v9962_v53 = vld [vmem:[#allocation34_spill] sm:$0xff]  ;;  %v9977_v6 = vld [vmem:[#allocation27_spill] sm:$0xff] }
 0x2a0   :  { %v7667_v27 = vsel %vm2987_vm12, %v2988_v45, %v2986_v3  ;;  %v3014_v36 = vmul.f32 %v9955_v47, %v9955_v47  ;;  %v3015_v34 = vmul.f32 %v9956_v62, %v9956_v62  ;;  %v3016_v28 = vmul.f32 %v9957_v49, %v9957_v49  ;;  %v9983_v32 = vld [vmem:[#allocation57_spill] sm:$0xff] }
 0x2a1   :  { %9954 = vst [vmem:[#allocation106_spill] sm:$0xff] %v7667_v27  ;;  %v2993_v24 = vsel %vm2992_vm1, %v7476_v14, %v2991_v37  ;;  %v2998_v33 = vmul.f32 %v4282_v31, %v7479_v15  ;;  %vm3008_vm7 = vcmp.eq.f32.partialorder %v7481_v20, 0.0  ;;  %v3017_v45 = vmul.f32 %v9958_v30, %v9958_v30  ;;  %v9963_v37 = vld [vmem:[#allocation44_spill] sm:$0xff] }
 0x2a2   :  { %v3018_v2 = vmul.f32 %v9959_v7, %v9959_v7  ;;  %v3019_v4 = vmul.f32 %v9960_v18, %v9960_v18  ;;  %v3020_v39 = vmul.f32 %v9961_v57, %v9961_v57  ;;  %v3021_v3 = vmul.f32 %v9962_v53, %v9962_v53 }
 0x2a3   :  { %v3022_v31 = vmul.f32 %v9963_v37, %v9963_v37  ;;  %v3005_v22 = vmul.f32 %v4284_v11, %v7481_v20  ;;  %v3023_v40 = vmul.f32 %v9964_v61, %v9964_v61  ;;  %v3024_v5 = vmul.f32 %v9965_v42, %v9965_v42  ;;  %v9970_v11 = vld [vmem:[#allocation17_spill] sm:$0xff] }
 0x2a4   :  { %v3025_v55 = vmul.f32 %v9966_v41, %v9966_v41  ;;  %v7701_v0 = vsel %vm2994_vm5, %v2995_v51, %v2993_v24  ;;  %v3026_v44 = vmul.f32 %v9968_v29, %v9968_v29  ;;  %v3027_v58 = vmul.f32 %v9969_v17, %v9969_v17  ;;  %v9973_v51 = vld [vmem:[#allocation20_spill] sm:$0xff]  ;;  %v9974_v29 = vld [vmem:[#allocation21_spill] sm:$0xff]  ;;  %v9975_v17 = vld [vmem:[#allocation91_spill] sm:$0xff] }
 0x2a5   :  { %9967 = vst [vmem:[#allocation107_spill] sm:$0xff] %v7701_v0  ;;  %v3028_v16 = vmul.f32 %v9970_v11, %v9970_v11  ;;  %v3000_v50 = vsel %vm2999_vm3, %v7479_v15, %v2998_v33  ;;  %v3029_v54 = vmul.f32 %v9971_v59, %v9971_v59  ;;  %v3030_v14 = vmul.f32 %v9972_v35, %v9972_v35  ;;  %v9976_v11 = vld [vmem:[#allocation92_spill] sm:$0xff]  ;;  %v9978_v35 = vld [vmem:[#allocation93_spill] sm:$0xff] }
 0x2a6   :  { %v3031_v24 = vmul.f32 %v9973_v51, %v9973_v51  ;;  %v3032_v41 = vmul.f32 %v9974_v29, %v9974_v29  ;;  %v3033_v0 = vmul.f32 %v9975_v17, %v9975_v17  ;;  %v3034_v27 = vmul.f32 %v9976_v11, %v9976_v11  ;;  %v9979_v51 = vld [vmem:[#allocation47_spill] sm:$0xff] }
 0x2a7   :  { %v3035_v33 = vmul.f32 %v9977_v6, %v9977_v6  ;;  %v3007_v59 = vsel %vm3006_vm4, %v7481_v20, %v3005_v22  ;;  %v3036_v42 = vmul.f32 %v9978_v35, %v9978_v35  ;;  %v3037_v48 = vmul.f32 %v9979_v51, %v9979_v51  ;;  %v9980_v29 = vld [vmem:[#allocation51_spill] sm:$0xff]  ;;  %v9984_v22 = vld [vmem:[#allocation78_spill] sm:$0xff]  ;;  %v9986_v51 = vld [vmem:[#allocation81_spill] sm:$0xff] }
 0x2a8   :  { %v3038_v46 = vmul.f32 %v9980_v29, %v9980_v29  ;;  %v7737_v17 = vsel %vm3001_vm6, %v3002_v12, %v3000_v50  ;;  %v9982_v11 = vld [vmem:[#allocation55_spill] sm:$0xff]  ;;  %v3040_v61 = vmul.f32 %v9983_v32, %v9983_v32  ;;  %v3041_v9 = vmul.f32 %v9984_v22, %v9984_v22  ;;  %v9987_v29 = vld [vmem:[#allocation48_spill] sm:$0xff] }
 0x2a9   :  { %9981 = vst [vmem:[#allocation108_spill] sm:$0xff] %v7737_v17  ;;  %v3039_v6 = vmul.f32 %v9982_v11, %v9982_v11  ;;  %v9985_v35 = vld [vmem:[#allocation79_spill] sm:$0xff]  ;;  %v3043_v19 = vmul.f32 %v9986_v51, %v9986_v51  ;;  %v3044_v15 = vmul.f32 %v9987_v29, %v9987_v29  ;;  %v7751_v50 = vsub.f32 %v3011_v25, %v3028_v16 }
 0x2aa   :  { %v3042_v63 = vmul.f32 %v9985_v35, %v9985_v35  ;;  %v7755_v12 = vsel %vm3008_vm7, %v3009_v56, %v3007_v59  ;;  %v7757_v11 = vsub.f32 %v3012_v10, %v3029_v54  ;;  %v7759_v32 = vsub.f32 %v3013_v52, %v3030_v14 }
 0x2ab   :  { %v7761_v22 = vsub.f32 %v3014_v36, %v3031_v24  ;;  %v7763_v17 = vsub.f32 %v3015_v34, %v3032_v41  ;;  %v7765_v35 = vsub.f32 %v3016_v28, %v3033_v0  ;;  %v7767_v51 = vsub.f32 %v3017_v45, %v3034_v27 }
 0x2ac   :  { %4285 = vrcp.f32 %v9951_v26  ;;  %v7770_v16 = vsub.f32 %v3018_v2, %v3035_v33  ;;  %v7772_v25 = vsub.f32 %v3019_v4, %v3036_v42  ;;  %v7774_v59 = vsub.f32 %v3020_v39, %v3037_v48 }
 0x2ad   :  { %4287 = vrcp.f32 %v9952_v8  ;;  %v7777_v54 = vsub.f32 %v3021_v3, %v3038_v46  ;;  %v7779_v20 = vsub.f32 %v3022_v31, %v3039_v6  ;;  %v7781_v41 = vsub.f32 %v3023_v40, %v3040_v61 }
 0x2ae   :  { %4289 = vrcp.f32 %v9953_v38  ;;  %v7784_v0 = vsub.f32 %v3024_v5, %v3041_v9  ;;  %v7786_v56 = vsub.f32 %v3025_v55, %v3042_v63  ;;  %v7788_v10 = vsub.f32 %v3026_v44, %v3043_v19  ;;  %v10004_v38 = vld [vmem:[#allocation107_spill] sm:$0xff] }
 0x2af   :  { %4291 = vrcp.f32 %v9955_v47  ;;  %v7791_v42 = vsub.f32 %v3027_v58, %v3044_v15  ;;  %v3062_v48 = vadd.f32 1.0, %v7751_v50  ;;  %v3063_v46 = vadd.f32 1.0, %v7757_v11  ;;  %v9988_v15 = vld [vmem:[#allocation22_spill] sm:$0xff] }
 0x2b0   :  { %4293 = vrcp.f32 %v9956_v62  ;;  %v3064_v40 = vadd.f32 1.0, %v7759_v32  ;;  %v3065_v61 = vadd.f32 1.0, %v7761_v22  ;;  %v3066_v5 = vadd.f32 1.0, %v7763_v17  ;;  %v10000_v62 = vld [vmem:[#allocation105_spill] sm:$0xff]  ;;  %v10002_v47 = vld [vmem:[#allocation106_spill] sm:$0xff]  ;;  %v10007_v26 = vld [vmem:[#allocation108_spill] sm:$0xff] }
 0x2b1   :  { %4295 = vrcp.f32 %v9957_v49  ;;  %v3067_v44 = vadd.f32 1.0, %v7765_v35  ;;  %v3068_v55 = vadd.f32 1.0, %v7767_v51  ;;  %v3069_v58 = vadd.f32 1.0, %v7770_v16 }
 0x2b2   :  { %4297 = vrcp.f32 %v9958_v30  ;;  %v3070_v19 = vadd.f32 1.0, %v7772_v25  ;;  %v3071_v63 = vadd.f32 1.0, %v7774_v59  ;;  %v3072_v9 = vadd.f32 1.0, %v7777_v54  ;;  %v9997_v30 = vld [vmem:[#allocation104_spill] sm:$0xff] }
 0x2b3   :  { %4299 = vrcp.f32 %v9959_v7  ;;  %v3073_v6 = vadd.f32 1.0, %v7779_v20  ;;  %v3074_v52 = vadd.f32 1.0, %v7781_v41  ;;  %v3075_v27 = vadd.f32 1.0, %v7784_v0  ;;  %v9995_v7 = vld [vmem:[#allocation103_spill] sm:$0xff] }
 0x2b4   :  { %4301 = vrcp.f32 %v9960_v18  ;;  %v3076_v36 = vadd.f32 1.0, %v7786_v56  ;;  %v3077_v34 = vadd.f32 1.0, %v7788_v10  ;;  %v3078_v28 = vadd.f32 1.0, %v7791_v42  ;;  %v9993_v18 = vld [vmem:[#allocation102_spill] sm:$0xff] }
 0x2b5   :  { %4303 = vrcp.f32 %v9961_v57  ;;  %v7819_v2 = vadd.f32 %v3062_v48, %v7539_v60  ;;  %v7822_v4 = vadd.f32 %v3063_v46, %v7543_v21  ;;  %v7825_v39 = vadd.f32 %v3064_v40, %v7558_v43  ;;  %v9989_v46 = vld [vmem:[#allocation86_spill] sm:$0xff] }
 0x2b6   :  { %v7816_v45 = vpop.eup %4285  ;;  %4305 = vrcp.f32 %v9962_v53  ;;  %v7831_v31 = vadd.f32 %v3065_v61, %v7573_v23  ;;  %v7834_v14 = vadd.f32 %v3066_v5, %v7594_v13  ;;  %v7837_v24 = vadd.f32 %v3067_v44, %v7600_v1  ;;  %v9990_v53 = vld [vmem:[#allocation101_spill] sm:$0xff]  ;;  %v9992_v61 = vld [vmem:[#allocation36_spill] sm:$0xff] }
 0x2b7   :  { %v7828_v3 = vpop.eup %4287  ;;  %4307 = vrcp.f32 %v9963_v37  ;;  %v7843_v48 = vadd.f32 %v3068_v55, %v9988_v15  ;;  %v7846_v40 = vadd.f32 %v3069_v58, %v9989_v46  ;;  %v7849_v57 = vadd.f32 %v3070_v19, %v9990_v53  ;;  %v9999_v55 = vld [vmem:[#allocation74_spill] sm:$0xff] }
 0x2b8   :  { %v7840_v33 = vpop.eup %4289  ;;  %4309 = vrcp.f32 %v9992_v61  ;;  %v7855_v44 = vadd.f32 %v3071_v63, %v9993_v18  ;;  %v7858_v37 = vadd.f32 %v3072_v9, %v9995_v7  ;;  %v7861_v49 = vadd.f32 %v3073_v6, %v9997_v30  ;;  %v10006_v63 = vld [vmem:[#allocation41_spill] sm:$0xff] }
 0x2b9   :  { %9991 = vst [vmem:[#allocation22_spill] sm:$0xff] %v7849_v57  ;;  %v7852_v5 = vpop.eup %4291  ;;  %4311 = vrcp.f32 %v9999_v55  ;;  %v7867_v19 = vadd.f32 %v3074_v52, %v10000_v62  ;;  %v7870_v61 = vadd.f32 %v3075_v27, %v10002_v47  ;;  %v7873_v8 = vadd.f32 %v3076_v36, %v10004_v38  ;;  %v10017_v57 = vld [vmem:[#allocation91_spill] sm:$0xff] }
 0x2ba   :  { %9994 = vst [vmem:[#allocation86_spill] sm:$0xff] %v7855_v44  ;;  %9996 = vst [vmem:[#allocation101_spill] sm:$0xff] %v7858_v37  ;;  %v7864_v58 = vpop.eup %4293  ;;  %4313 = vrcp.f32 %v10006_v63  ;;  %v7879_v6 = vadd.f32 %v3077_v34, %v10007_v26  ;;  %v7882_v55 = vadd.f32 %v3078_v28, %v7755_v12  ;;  %v3147_v52 = vsub.f32 1.0, %v7751_v50  ;;  %v10014_v37 = vld [vmem:[#allocation20_spill] sm:$0xff]  ;;  %v10016_v44 = vld [vmem:[#allocation21_spill] sm:$0xff] }
 0x2bb   :  { %9998 = vst [vmem:[#allocation102_spill] sm:$0xff] %v7861_v49  ;;  %10001 = vst [vmem:[#allocation103_spill] sm:$0xff] %v7867_v19  ;;  %v7876_v9 = vpop.eup %4295  ;;  %v10010_v49 = vld [vmem:[#allocation75_spill] sm:$0xff]  ;;  %v3148_v27 = vsub.f32 1.0, %v7757_v11  ;;  %v3149_v36 = vsub.f32 1.0, %v7759_v32  ;;  %v3150_v63 = vsub.f32 1.0, %v7761_v22 }
 0x2bc   :  { %10003 = vst [vmem:[#allocation104_spill] sm:$0xff] %v7870_v61  ;;  %10005 = vst [vmem:[#allocation105_spill] sm:$0xff] %v7873_v8  ;;  %4315 = vrcp.f32 %v10010_v49  ;;  %v7886_v19 = vpop.eup %4297  ;;  %v10011_v8 = vld [vmem:[#allocation17_spill] sm:$0xff]  ;;  %v3151_v34 = vsub.f32 1.0, %v7763_v17  ;;  %v3152_v28 = vsub.f32 1.0, %v7765_v35  ;;  %v3153_v49 = vsub.f32 1.0, %v7767_v51 }
 0x2bd   :  { %10008 = vst [vmem:[#allocation106_spill] sm:$0xff] %v7879_v6  ;;  %10009 = vst [vmem:[#allocation107_spill] sm:$0xff] %v7882_v55  ;;  %4317 = vrcp.f32 %v10011_v8  ;;  %v7892_v61 = vpop.eup %4299  ;;  %v10012_v55 = vld [vmem:[#allocation18_spill] sm:$0xff]  ;;  %v3154_v11 = vsub.f32 1.0, %v7770_v16  ;;  %v3155_v32 = vsub.f32 1.0, %v7772_v25  ;;  %v3156_v22 = vsub.f32 1.0, %v7774_v59 }
 0x2be   :  { %4319 = vrcp.f32 %v10012_v55  ;;  %v7898_v50 = vpop.eup %4301  ;;  %v10013_v6 = vld [vmem:[#allocation19_spill] sm:$0xff]  ;;  %v3157_v17 = vsub.f32 1.0, %v7777_v54  ;;  %v3158_v35 = vsub.f32 1.0, %v7779_v20  ;;  %v3159_v51 = vsub.f32 1.0, %v7781_v41 }
 0x2bf   :  { %4321 = vrcp.f32 %v10013_v6  ;;  %v7904_v8 = vpop.eup %4303  ;;  %v3160_v16 = vsub.f32 1.0, %v7784_v0  ;;  %v3161_v25 = vsub.f32 1.0, %v7786_v56  ;;  %v3162_v59 = vsub.f32 1.0, %v7788_v10 }
 0x2c0   :  { %4323 = vrcp.f32 %v10014_v37  ;;  %v7910_v55 = vpop.eup %4305  ;;  %v3163_v54 = vsub.f32 1.0, %v7791_v42  ;;  %v3164_v20 = vadd.f32 %v3147_v52, %v7539_v60  ;;  %v3165_v41 = vadd.f32 %v3148_v27, %v7543_v21  ;;  %v10019_v52 = vld [vmem:[#allocation27_spill] sm:$0xff] }
 0x2c1   :  { %10015 = vst [vmem:[#allocation108_spill] sm:$0xff] %v7910_v55  ;;  %4325 = vrcp.f32 %v10016_v44  ;;  %v7916_v6 = vpop.eup %4307  ;;  %v3166_v0 = vadd.f32 %v3149_v36, %v7558_v43  ;;  %v3167_v56 = vadd.f32 %v3150_v63, %v7573_v23  ;;  %v3168_v10 = vadd.f32 %v3151_v34, %v7594_v13  ;;  %v10018_v55 = vld [vmem:[#allocation92_spill] sm:$0xff]  ;;  %v10020_v63 = vld [vmem:[#allocation93_spill] sm:$0xff] }
 0x2c2   :  { %4327 = vrcp.f32 %v10017_v57  ;;  %v7922_v37 = vpop.eup %4309  ;;  %v3169_v42 = vadd.f32 %v3152_v28, %v7600_v1  ;;  %v3170_v60 = vadd.f32 %v3153_v49, %v9988_v15  ;;  %v7933_v21 = vadd.f32 %v3154_v11, %v9989_v46  ;;  %v10022_v28 = vld [vmem:[#allocation51_spill] sm:$0xff] }
 0x2c3   :  { %4329 = vrcp.f32 %v10018_v55  ;;  %v7928_v44 = vpop.eup %4311  ;;  %v7939_v43 = vadd.f32 %v3155_v32, %v9990_v53  ;;  %v7942_v23 = vadd.f32 %v3156_v22, %v9993_v18  ;;  %v7945_v13 = vadd.f32 %v3157_v17, %v9995_v7  ;;  %v10021_v53 = vld [vmem:[#allocation47_spill] sm:$0xff]  ;;  %v10024_v17 = vld [vmem:[#allocation57_spill] sm:$0xff] }
 0x2c4   :  { %4331 = vrcp.f32 %v10019_v52  ;;  %v7936_v27 = vpop.eup %4313  ;;  %v7951_v49 = vadd.f32 %v3158_v35, %v9997_v30  ;;  %v7954_v15 = vadd.f32 %v3159_v51, %v10000_v62  ;;  %v7957_v46 = vadd.f32 %v3160_v16, %v10002_v47  ;;  %v10023_v32 = vld [vmem:[#allocation55_spill] sm:$0xff] }
 0x2c5   :  { %4333 = vrcp.f32 %v10020_v63  ;;  %v3097_v36 = vmul.f32 0.5, %v7816_v45  ;;  %v7962_v7 = vadd.f32 %v3161_v25, %v10004_v38  ;;  %v7965_v34 = vadd.f32 %v3162_v59, %v10007_v26 }
 0x2c6   :  { %v7948_v1 = vpop.eup %4315  ;;  %4335 = vrcp.f32 %v10021_v53  ;;  %v3099_v62 = vmul.f32 0.5, %v7828_v3  ;;  %v7970_v11 = vadd.f32 %v3163_v54, %v7755_v12  ;;  %v7974_v45 = vmul.f32 0.5, %v7840_v33  ;;  %v10025_v12 = vld [vmem:[#allocation78_spill] sm:$0xff]  ;;  %v10026_v54 = vld [vmem:[#allocation79_spill] sm:$0xff] }
 0x2c7   :  { %v4318_v18 = vpop.eup %4317  ;;  %4337 = vrcp.f32 %v10022_v28  ;;  %v7977_v38 = vmul.f32 %v3097_v36, %v7819_v2  ;;  %v7981_v51 = vmul.f32 0.5, %v7852_v5 }
 0x2c8   :  { %v4320_v30 = vpop.eup %4319  ;;  %v3182_v47 = vmul.f32 0.5, %v4318_v18  ;;  %4339 = vrcp.f32 %v10023_v32  ;;  %v7985_v59 = vmul.f32 %v3099_v62, %v7822_v4 }
 0x2c9   :  { %v4322_v22 = vpop.eup %4321  ;;  %v3184_v26 = vmul.f32 0.5, %v4320_v30  ;;  %4341 = vrcp.f32 %v10024_v17  ;;  %v10027_v30 = vld [vmem:[#allocation81_spill] sm:$0xff] }
 0x2ca   :  { %v4324_v35 = vpop.eup %4323  ;;  %v3186_v3 = vmul.f32 0.5, %v4322_v22  ;;  %4343 = vrcp.f32 %v10025_v12  ;;  %v3215_v16 = vmul.f32 %v3182_v47, %v3164_v20 }
 0x2cb   :  { %v4326_v25 = vpop.eup %4325  ;;  %v3188_v33 = vmul.f32 0.5, %v4324_v35  ;;  %4345 = vrcp.f32 %v10026_v54  ;;  %v3216_v2 = vmul.f32 %v3184_v26, %v3165_v41 }
 0x2cc   :  { %v4328_v18 = vpop.eup %4327  ;;  %v3190_v36 = vmul.f32 0.5, %v4326_v25  ;;  %4347 = vrcp.f32 %v10027_v30  ;;  %v3217_v17 = vmul.f32 %v3186_v3, %v3166_v0  ;;  %v3233_v32 = vmax.f32 %v3215_v16, 1e-09 }
 0x2cd   :  { %v4330_v5 = vpop.eup %4329  ;;  %v3192_v28 = vmul.f32 0.5, %v4328_v18  ;;  %4349 = vrcp.f32 %v9987_v29  ;;  %v3218_v22 = vmul.f32 %v3188_v33, %v3167_v56  ;;  %v3234_v20 = vmax.f32 %v3216_v2, 1e-09 }
 0x2ce   :  { %v4332_v47 = vpop.eup %4331  ;;  %v3194_v12 = vmul.f32 0.5, %v4330_v5  ;;  %v3219_v4 = vmul.f32 %v3190_v36, %v3168_v10  ;;  %v3235_v62 = vmax.f32 %v3217_v17, 1e-09  ;;  %4351 = vlog2.f32 %v3233_v32 }
 0x2cf   :  { %v4334_v35 = vpop.eup %4333  ;;  %v3196_v54 = vmul.f32 0.5, %v4332_v47  ;;  %v3220_v41 = vmul.f32 %v3192_v28, %v3169_v42  ;;  %v3236_v26 = vmax.f32 %v3218_v22, 1e-09  ;;  %4353 = vlog2.f32 %v3234_v20 }
 0x2d0   :  { %v4336_v25 = vpop.eup %4335  ;;  %v3198_v30 = vmul.f32 0.5, %v4334_v35  ;;  %v3221_v0 = vmul.f32 %v3194_v12, %v3170_v60  ;;  %v3237_v3 = vmax.f32 %v3219_v4, 1e-09  ;;  %4355 = vlog2.f32 %v3235_v62 }
 0x2d1   :  { %v4338_v16 = vpop.eup %4337  ;;  %v3200_v18 = vmul.f32 0.5, %v4336_v25  ;;  %v3222_v56 = vmul.f32 %v3196_v54, %v7933_v21  ;;  %v3238_v33 = vmax.f32 %v3220_v41, 1e-09  ;;  %4357 = vlog2.f32 %v3236_v26 }
 0x2d2   :  { %v4340_v2 = vpop.eup %4339  ;;  %v3202_v10 = vmul.f32 0.5, %v4338_v16  ;;  %v3223_v32 = vmul.f32 %v3198_v30, %v7939_v43  ;;  %v3239_v17 = vmax.f32 %v3221_v0, 1e-09  ;;  %4359 = vlog2.f32 %v3237_v3 }
 0x2d3   :  { %v4342_v42 = vpop.eup %4341  ;;  %v3204_v28 = vmul.f32 0.5, %v4340_v2  ;;  %v3224_v36 = vmul.f32 %v3200_v18, %v7942_v23  ;;  %v3240_v5 = vmax.f32 %v3222_v56, 1e-09  ;;  %4361 = vlog2.f32 %v3238_v33 }
 0x2d4   :  { %v4344_v60 = vpop.eup %4343  ;;  %v3206_v12 = vmul.f32 0.5, %v4342_v42  ;;  %v3225_v22 = vmul.f32 %v3202_v10, %v7945_v13  ;;  %v3241_v20 = vmax.f32 %v3223_v32, 1e-09  ;;  %4363 = vlog2.f32 %v3239_v17 }
 0x2d5   :  { %v4346_v21 = vpop.eup %4345  ;;  %v3208_v54 = vmul.f32 0.5, %v4344_v60  ;;  %v3226_v47 = vmul.f32 %v3204_v28, %v7951_v49  ;;  %v3242_v4 = vmax.f32 %v3224_v36, 1e-09  ;;  %4365 = vlog2.f32 %v3240_v5  ;;  %v8001_v36 = vpop.permute.xlu0 %3286 }
 0x2d6   :  { %v4348_v43 = vpop.eup %4347  ;;  %v3210_v30 = vmul.f32 0.5, %v4346_v21  ;;  %v3227_v62 = vmul.f32 %v3206_v12, %v7954_v15  ;;  %v3243_v35 = vmax.f32 %v3225_v22, 1e-09  ;;  %4367 = vlog2.f32 %v3241_v20  ;;  %10028 = vst [vmem:[#allocation109_spill] sm:$0xff] %v8001_v36 }
 0x2d7   :  { %v4350_v23 = vpop.eup %4349  ;;  %v3212_v41 = vmul.f32 0.5, %v4348_v43  ;;  %v3228_v26 = vmul.f32 %v3208_v54, %v7957_v46  ;;  %v3244_v25 = vmax.f32 %v3226_v47, 1e-09  ;;  %4369 = vlog2.f32 %v3242_v4  ;;  %v10029_v47 = vld [vmem:[#allocation56_spill] sm:$0xff] }
 0x2d8   :  { %v4352_v13 = vpop.eup %4351  ;;  %v3214_v0 = vmul.f32 0.5, %v4350_v23  ;;  %v3229_v3 = vmul.f32 %v3210_v30, %v7962_v7  ;;  %v3245_v16 = vmax.f32 %v3227_v62, 1e-09  ;;  %4371 = vlog2.f32 %v3243_v35 }
 0x2d9   :  { %v4354_v49 = vpop.eup %4353  ;;  %v3230_v18 = vmul.f32 %v3212_v41, %v7965_v34  ;;  %v3246_v56 = vmax.f32 %v3228_v26, 1e-09  ;;  %v3251_v33 = vmul.f32 0.6931472, %v4352_v13  ;;  %4373 = vlog2.f32 %v3244_v25 }
 0x2da   :  { %v4356_v15 = vpop.eup %4355  ;;  %v3231_v2 = vmul.f32 %v3214_v0, %v7970_v11  ;;  %v3247_v10 = vmax.f32 %v3229_v3, 1e-09  ;;  %v3253_v32 = vmul.f32 0.6931472, %v4354_v49  ;;  %4375 = vlog2.f32 %v3245_v16 }
 0x2db   :  { %v4358_v46 = vpop.eup %4357  ;;  %v3105_v17 = vmul.f32 0.5, %v7864_v58  ;;  %v3248_v42 = vmax.f32 %v3230_v18, 1e-09  ;;  %v3255_v28 = vmul.f32 0.6931472, %v4356_v15  ;;  %4377 = vlog2.f32 %v3246_v56 }
 0x2dc   :  { %v4360_v7 = vpop.eup %4359  ;;  %v8005_v34 = vmul.f32 %v7974_v45, %v7825_v39  ;;  %v3249_v5 = vmax.f32 %v3231_v2, 1e-09  ;;  %v3257_v60 = vmul.f32 0.6931472, %v4358_v46  ;;  %4379 = vlog2.f32 %v3247_v10 }
 0x2dd   :  { %v4362_v11 = vpop.eup %4361  ;;  %v3259_v12 = vmul.f32 0.6931472, %v4360_v7  ;;  %4381 = vlog2.f32 %v3248_v42  ;;  %v3289_v22 = vmul.f32 %v8001_v36, %v3251_v33  ;;  %v8010_v58 = vmul.f32 %v7977_v38, %v7977_v38 }
 0x2de   :  { %v4364_v20 = vpop.eup %4363  ;;  %v3107_v21 = vmul.f32 0.5, %v7876_v9  ;;  %v3261_v54 = vmul.f32 0.6931472, %v4362_v11  ;;  %4383 = vlog2.f32 %v3249_v5  ;;  %v3290_v39 = vmul.f32 %v8001_v36, %v3253_v32 }
 0x2df   :  { %v4366_v45 = vpop.eup %4365  ;;  %4385 = vrcp.f32 %v10029_v47  ;;  %v8017_v4 = vmul.f32 %v7981_v51, %v7831_v31  ;;  %v3263_v43 = vmul.f32 0.6931472, %v4364_v20  ;;  %v3291_v30 = vmul.f32 %v8001_v36, %v3255_v28  ;;  %v10055_v47 = vld [vmem:[#allocation106_spill] sm:$0xff] }
 0x2e0   :  { %v4368_v62 = vpop.eup %4367  ;;  %v3109_v35 = vmul.f32 0.5, %v7886_v19  ;;  %v3265_v23 = vmul.f32 0.6931472, %v4366_v45  ;;  %v3292_v9 = vmul.f32 %v8001_v36, %v3257_v60  ;;  %v8024_v41 = vmul.f32 %v7985_v59, %v7985_v59 }
 0x2e1   :  { %v4370_v26 = vpop.eup %4369  ;;  %v8027_v25 = vmul.f32 %v3105_v17, %v7834_v14  ;;  %v3267_v13 = vmul.f32 0.6931472, %v4368_v62  ;;  %v3293_v31 = vmul.f32 %v8001_v36, %v3259_v12  ;;  %v3306_v51 = vmul.f32 1.442695, %v3289_v22 }
 0x2e2   :  { %v4372_v0 = vpop.eup %4371  ;;  %v3269_v3 = vmul.f32 0.6931472, %v4370_v26  ;;  %v3294_v16 = vmul.f32 %v8001_v36, %v3261_v54  ;;  %v3308_v19 = vmul.f32 1.442695, %v3290_v39  ;;  %v8033_v49 = vmul.f32 %v8005_v34, %v8005_v34 }
 0x2e3   :  { %v4374_v18 = vpop.eup %4373  ;;  %v3111_v56 = vmul.f32 0.5, %v7892_v61  ;;  %v3271_v33 = vmul.f32 0.6931472, %v4372_v0  ;;  %v3295_v14 = vmul.f32 %v8001_v36, %v3263_v43  ;;  %v3310_v15 = vmul.f32 1.442695, %v3291_v30 }
 0x2e4   :  { %v4376_v2 = vpop.eup %4375  ;;  %v8038_v10 = vmul.f32 %v3107_v21, %v7837_v24  ;;  %v3273_v32 = vmul.f32 0.6931472, %v4374_v18  ;;  %v3296_v46 = vmul.f32 %v8001_v36, %v3265_v23  ;;  %v3312_v17 = vmul.f32 1.442695, %v3292_v9 }
 0x2e5   :  { %v4378_v42 = vpop.eup %4377  ;;  %v3275_v28 = vmul.f32 0.6931472, %v4376_v2  ;;  %v3297_v7 = vmul.f32 %v8001_v36, %v3267_v13  ;;  %4387 = vpow2.f32 %v3306_v51  ;;  %v3314_v5 = vmul.f32 1.442695, %v3293_v31 }
 0x2e6   :  { %v4380_v60 = vpop.eup %4379  ;;  %v3277_v61 = vmul.f32 0.6931472, %v4378_v42  ;;  %v3298_v11 = vmul.f32 %v8001_v36, %v3269_v3  ;;  %4389 = vpow2.f32 %v3308_v19  ;;  %v3316_v12 = vmul.f32 1.442695, %v3294_v16 }
 0x2e7   :  { %v4382_v22 = vpop.eup %4381  ;;  %v3279_v20 = vmul.f32 0.6931472, %v4380_v60  ;;  %v3299_v24 = vmul.f32 %v8001_v36, %v3271_v33  ;;  %4391 = vpow2.f32 %v3310_v15  ;;  %v3318_v21 = vmul.f32 1.442695, %v3295_v14 }
 0x2e8   :  { %v4384_v54 = vpop.eup %4383  ;;  %v3281_v39 = vmul.f32 0.6931472, %v4382_v22  ;;  %v3300_v45 = vmul.f32 %v8001_v36, %v3273_v32  ;;  %4393 = vpow2.f32 %v3312_v17  ;;  %v3320_v43 = vmul.f32 1.442695, %v3296_v46  ;;  %v10031_v32 = vld [vmem:[#allocation22_spill] sm:$0xff] }
 0x2e9   :  { %v8045_v30 = vpop.eup %4385  ;;  %v3283_v62 = vmul.f32 0.6931472, %v4384_v54  ;;  %v3301_v23 = vmul.f32 %v8001_v36, %v3275_v28  ;;  %4395 = vpow2.f32 %v3314_v5  ;;  %v3322_v9 = vmul.f32 1.442695, %v3297_v7  ;;  %v10033_v7 = vld [vmem:[#allocation108_spill] sm:$0xff] }
 0x2ea   :  { %v3302_v26 = vmul.f32 %v8001_v36, %v3277_v61  ;;  %4397 = vpow2.f32 %v3316_v12  ;;  %v3324_v13 = vmul.f32 1.442695, %v3298_v11  ;;  %v8051_v31 = vmul.f32 %v8017_v4, %v8017_v4  ;;  %v10035_v61 = vld [vmem:[#allocation86_spill] sm:$0xff] }
 0x2eb   :  { %v3113_v51 = vmul.f32 0.5, %v7898_v50  ;;  %v3303_v0 = vmul.f32 %v8001_v36, %v3279_v20  ;;  %4399 = vpow2.f32 %v3318_v21  ;;  %v3326_v3 = vmul.f32 1.442695, %v3299_v24  ;;  %v10037_v20 = vld [vmem:[#allocation101_spill] sm:$0xff] }
 0x2ec   :  { %v8056_v16 = vmul.f32 %v3109_v35, %v7843_v48  ;;  %v3304_v19 = vmul.f32 %v8001_v36, %v3281_v39  ;;  %4401 = vpow2.f32 %v3320_v43  ;;  %v3328_v18 = vmul.f32 1.442695, %v3300_v45 }
 0x2ed   :  { %v3305_v33 = vmul.f32 %v8001_v36, %v3283_v62  ;;  %4403 = vpow2.f32 %v3322_v9  ;;  %v3330_v14 = vmul.f32 1.442695, %v3301_v23  ;;  %v8062_v15 = vmul.f32 %v8027_v25, %v8027_v25  ;;  %v10041_v9 = vld [vmem:[#allocation102_spill] sm:$0xff] }
 0x2ee   :  { %v3115_v50 = vmul.f32 0.5, %v7904_v8  ;;  %v8066_v2 = vmul.f32 %v3111_v56, %v7846_v40  ;;  %4405 = vpow2.f32 %v3324_v13  ;;  %v3332_v48 = vmul.f32 1.442695, %v3302_v26 }
 0x2ef   :  { %v8068_v35 = vpop.eup %4387  ;;  %v8071_v46 = vmul.f32 %v3113_v51, %v10031_v32  ;;  %4407 = vpow2.f32 %v3326_v3  ;;  %v3334_v17 = vmul.f32 1.442695, %v3303_v0  ;;  %v8075_v42 = vmul.f32 %v8038_v10, %v8038_v10  ;;  %v10043_v51 = vld [vmem:[#allocation103_spill] sm:$0xff] }
 0x2f0   :  { %10030 = vst [vmem:[#allocation110_spill] sm:$0xff] %v8068_v35  ;;  %v8077_v28 = vpop.eup %4389  ;;  %v3117_v8 = vmul.f32 0.5, %v10033_v7  ;;  %4409 = vpow2.f32 %v3328_v18  ;;  %v3336_v40 = vmul.f32 1.442695, %v3304_v19  ;;  %v8082_v56 = vmul.f32 %v8056_v16, %v8056_v16 }
 0x2f1   :  { %10032 = vst [vmem:[#allocation22_spill] sm:$0xff] %v8077_v28  ;;  %v8084_v5 = vpop.eup %4391  ;;  %v3119_v60 = vmul.f32 0.5, %v7916_v6  ;;  %v8088_v11 = vmul.f32 %v3115_v50, %v10035_v61  ;;  %4411 = vpow2.f32 %v3330_v14  ;;  %v3338_v12 = vmul.f32 1.442695, %v3305_v33 }
 0x2f2   :  { %10034 = vst [vmem:[#allocation108_spill] sm:$0xff] %v8084_v5  ;;  %v8090_v22 = vpop.eup %4393  ;;  %v8093_v24 = vmul.f32 %v3117_v8, %v10037_v20  ;;  %4413 = vpow2.f32 %v3332_v48  ;;  %v8097_v21 = vmul.f32 %v8068_v35, %v8068_v35  ;;  %v8101_v54 = vmul.f32 %v8066_v2, %v8066_v2 }
 0x2f3   :  { %10036 = vst [vmem:[#allocation86_spill] sm:$0xff] %v8090_v22  ;;  %v8103_v6 = vpop.eup %4395  ;;  %v3121_v39 = vmul.f32 0.5, %v7922_v37  ;;  %4415 = vpow2.f32 %v3334_v17  ;;  %v8108_v45 = vmul.f32 %v8077_v28, %v8077_v28  ;;  %v8112_v43 = vmul.f32 %v8071_v46, %v8071_v46  ;;  %v10048_v17 = vld [vmem:[#allocation104_spill] sm:$0xff] }
 0x2f4   :  { %10038 = vst [vmem:[#allocation101_spill] sm:$0xff] %v8103_v6  ;;  %v8114_v62 = vpop.eup %4397  ;;  %v3123_v23 = vmul.f32 0.5, %v7928_v44  ;;  %v8118_v26 = vmul.f32 %v3119_v60, %v10041_v9  ;;  %4417 = vpow2.f32 %v3336_v40  ;;  %v8122_v37 = vmul.f32 %v8084_v5, %v8084_v5 }
 0x2f5   :  { %10039 = vst [vmem:[#allocation111_spill] sm:$0xff] %v8112_v43  ;;  %10040 = vst [vmem:[#allocation112_spill] sm:$0xff] %v8114_v62  ;;  %v8124_v13 = vpop.eup %4399  ;;  %v8127_v0 = vmul.f32 %v3121_v39, %v10043_v51  ;;  %4419 = vpow2.f32 %v3338_v12  ;;  %v8131_v3 = vmul.f32 %v8090_v22, %v8090_v22  ;;  %v8135_v44 = vmul.f32 %v8088_v11, %v8088_v11  ;;  %v10052_v39 = vld [vmem:[#allocation105_spill] sm:$0xff] }
 0x2f6   :  { %10042 = vst [vmem:[#allocation102_spill] sm:$0xff] %v8124_v13  ;;  %v8137_v19 = vpop.eup %4401  ;;  %v3125_v18 = vmul.f32 0.5, %v7936_v27  ;;  %v8142_v33 = vmul.f32 %v8103_v6, %v8103_v6  ;;  %v8146_v14 = vmul.f32 %v8093_v24, %v8093_v24  ;;  %v3374_v50 = vmul.f32 %v8010_v58, %v8097_v21 }
 0x2f7   :  { %10044 = vst [vmem:[#allocation103_spill] sm:$0xff] %v8135_v44  ;;  %10045 = vst [vmem:[#allocation113_spill] sm:$0xff] %v8137_v19  ;;  %v8150_v48 = vpop.eup %4403  ;;  %v3127_v32 = vmul.f32 0.5, %v7948_v1  ;;  %v8154_v7 = vmul.f32 %v3123_v23, %v10048_v17  ;;  %v8158_v27 = vmul.f32 %v8114_v62, %v8114_v62  ;;  %v3375_v8 = vmul.f32 %v8024_v41, %v8108_v45 }
 0x2f8   :  { %10046 = vst [vmem:[#allocation114_spill] sm:$0xff] %v8146_v14  ;;  %10047 = vst [vmem:[#allocation115_spill] sm:$0xff] %v8150_v48  ;;  %v8162_v40 = vpop.eup %4405  ;;  %v3129_v60 = vmul.f32 0.5, %v8045_v30  ;;  %v8167_v61 = vmul.f32 %v8124_v13, %v8124_v13  ;;  %v8171_v1 = vmul.f32 %v8118_v26, %v8118_v26  ;;  %v3376_v12 = vmul.f32 %v8033_v49, %v8122_v37 }
 0x2f9   :  { %10049 = vst [vmem:[#allocation104_spill] sm:$0xff] %v8162_v40  ;;  %v8175_v20 = vpop.eup %4407  ;;  %v8178_v23 = vmul.f32 %v3125_v18, %v10052_v39  ;;  %v8182_v9 = vmul.f32 %v8137_v19, %v8137_v19  ;;  %v8186_v30 = vmul.f32 %v8127_v0, %v8127_v0  ;;  %v3377_v51 = vmul.f32 %v8051_v31, %v8131_v3  ;;  %v10059_v19 = vld [vmem:[#allocation107_spill] sm:$0xff] }
 0x2fa   :  { %10050 = vst [vmem:[#allocation116_spill] sm:$0xff] %v8171_v1  ;;  %10051 = vst [vmem:[#allocation117_spill] sm:$0xff] %v8175_v20  ;;  %v8190_v17 = vpop.eup %4409  ;;  %v8193_v29 = vmul.f32 %v3127_v32, %v10055_v47  ;;  %v8197_v18 = vmul.f32 %v8150_v48, %v8150_v48  ;;  %v3378_v39 = vmul.f32 %v8062_v15, %v8142_v33  ;;  %v3971_v53 = vadd.f32 -1.0, %v3374_v50 }
 0x2fb   :  { %10053 = vst [vmem:[#allocation105_spill] sm:$0xff] %v8186_v30  ;;  %10054 = vst [vmem:[#allocation118_spill] sm:$0xff] %v8190_v17  ;;  %v8201_v63 = vpop.eup %4411  ;;  %v8205_v52 = vmul.f32 %v8162_v40, %v8162_v40  ;;  %v8209_v55 = vmul.f32 %v8154_v7, %v8154_v7  ;;  %v3379_v47 = vmul.f32 %v8075_v42, %v8158_v27  ;;  %v3972_v32 = vadd.f32 -1.0, %v3375_v8 }
 0x2fc   :  { %10056 = vst [vmem:[#allocation106_spill] sm:$0xff] %v8201_v63  ;;  %v8213_v48 = vpop.eup %4413  ;;  %v8216_v57 = vmul.f32 %v3129_v60, %v10059_v19  ;;  %v8220_v50 = vmul.f32 %v8175_v20, %v8175_v20  ;;  %v3380_v40 = vmul.f32 %v8082_v56, %v8167_v61  ;;  %v3973_v13 = vadd.f32 -1.0, %v3376_v12 }
 0x2fd   :  { %10057 = vst [vmem:[#allocation119_spill] sm:$0xff] %v8209_v55  ;;  %10058 = vst [vmem:[#allocation120_spill] sm:$0xff] %v8213_v48  ;;  %v8224_v62 = vpop.eup %4415  ;;  %v8228_v36 = vmul.f32 %v8190_v17, %v8190_v17  ;;  %v8232_v8 = vmul.f32 %v8178_v23, %v8178_v23  ;;  %v3381_v19 = vmul.f32 %v8101_v54, %v8182_v9  ;;  %v3974_v60 = vadd.f32 -1.0, %v3377_v51 }
 0x2fe   :  { %10060 = vst [vmem:[#allocation107_spill] sm:$0xff] %v8224_v62  ;;  %v8236_v20 = vpop.eup %4417  ;;  %v8240_v6 = vmul.f32 %v8201_v63, %v8201_v63  ;;  %v3382_v12 = vmul.f32 %v8112_v43, %v8197_v18  ;;  %v3975_v22 = vadd.f32 -1.0, %v3378_v39  ;;  %4421 = vrcp.f32 %v3971_v53 }
 0x2ff   :  { %10061 = vst [vmem:[#allocation121_spill] sm:$0xff] %v8232_v8  ;;  %10062 = vst [vmem:[#allocation122_spill] sm:$0xff] %v8236_v20  ;;  %v8244_v17 = vpop.eup %4419  ;;  %v8248_v5 = vmul.f32 %v8213_v48, %v8213_v48  ;;  %v3383_v51 = vmul.f32 %v8135_v44, %v8205_v52  ;;  %v3976_v28 = vadd.f32 -1.0, %v3379_v47  ;;  %4423 = vrcp.f32 %v3972_v32 }
 0x300   :  { %10063 = vst [vmem:[#allocation123_spill] sm:$0xff] %v8244_v17  ;;  %v8254_v63 = vmul.f32 %v8224_v62, %v8224_v62  ;;  %v3384_v35 = vmul.f32 %v8146_v14, %v8220_v50  ;;  %v3977_v39 = vadd.f32 -1.0, %v3380_v40  ;;  %4425 = vrcp.f32 %v3973_v13 }
 0x301   :  { %v8260_v53 = vmul.f32 %v8236_v20, %v8236_v20  ;;  %v3385_v48 = vmul.f32 %v8171_v1, %v8228_v36  ;;  %v3978_v43 = vadd.f32 -1.0, %v3381_v19  ;;  %4427 = vrcp.f32 %v3974_v60 }
 0x302   :  { %v3356_v47 = vmul.f32 %v8244_v17, %v8244_v17  ;;  %v3386_v32 = vmul.f32 %v8186_v30, %v8240_v6  ;;  %v3979_v62 = vadd.f32 -1.0, %v3382_v12  ;;  %4429 = vrcp.f32 %v3975_v22 }
 0x303   :  { %v8270_v13 = vmul.f32 %v8193_v29, %v8193_v29  ;;  %v3387_v40 = vmul.f32 %v8209_v55, %v8248_v5  ;;  %v3980_v20 = vadd.f32 -1.0, %v3383_v51  ;;  %4431 = vrcp.f32 %v3976_v28 }
 0x304   :  { %v8276_v19 = vmul.f32 %v8216_v57, %v8216_v57  ;;  %v3388_v60 = vmul.f32 %v8232_v8, %v8254_v63  ;;  %v3981_v17 = vadd.f32 -1.0, %v3384_v35  ;;  %4433 = vrcp.f32 %v3977_v39 }
 0x305   :  { %10064 = vst [vmem:[#allocation124_spill] sm:$0xff] %v8270_v13  ;;  %v3389_v22 = vmul.f32 %v8270_v13, %v8260_v53  ;;  %v3982_v12 = vadd.f32 -1.0, %v3385_v48  ;;  %4435 = vrcp.f32 %v3978_v43  ;;  %v3983_v1 = vadd.f32 -1.0, %v3386_v32 }
 0x306   :  { %10065 = vst [vmem:[#allocation125_spill] sm:$0xff] %v8276_v19  ;;  %v3390_v30 = vmul.f32 %v8276_v19, %v3356_v47  ;;  %4437 = vrcp.f32 %v3979_v62  ;;  %v3984_v51 = vadd.f32 -1.0, %v3387_v40  ;;  %v3985_v55 = vadd.f32 -1.0, %v3388_v60 }
 0x307   :  { %4439 = vrcp.f32 %v3980_v20  ;;  %v3986_v8 = vadd.f32 -1.0, %v3389_v22  ;;  %v3990_v20 = vadd.f32 -1.0, %v8122_v37  ;;  %v3992_v40 = vadd.f32 -1.0, %v8142_v33 }
 0x308   :  { %v8283_v28 = vpop.eup %4421  ;;  %4441 = vrcp.f32 %v3981_v17  ;;  %v3987_v39 = vadd.f32 -1.0, %v3390_v30  ;;  %v3989_v30 = vadd.f32 -1.0, %v8108_v45  ;;  %v3993_v22 = vadd.f32 -1.0, %v8158_v27 }
 0x309   :  { %v8285_v14 = vpop.eup %4423  ;;  %4443 = vrcp.f32 %v3982_v12  ;;  %v3996_v45 = vadd.f32 -1.0, %v8197_v18  ;;  %v3998_v37 = vadd.f32 -1.0, %v8220_v50  ;;  %v4000_v33 = vadd.f32 -1.0, %v8240_v6 }
 0x30a   :  { %v8287_v35 = vpop.eup %4425  ;;  %4445 = vrcp.f32 %v3983_v1  ;;  %v3988_v1 = vadd.f32 -1.0, %v8097_v21  ;;  %v3995_v21 = vadd.f32 -1.0, %v8182_v9  ;;  %v4001_v27 = vadd.f32 -1.0, %v8248_v5 }
 0x30b   :  { %v8289_v48 = vpop.eup %4427  ;;  %4447 = vrcp.f32 %v3984_v51  ;;  %v4003_v9 = vadd.f32 -1.0, %v8260_v53  ;;  %v4004_v60 = vadd.f32 -1.0, %v3356_v47  ;;  %v3460_v17 = vmul.f32 %v3989_v30, %v7985_v59 }
 0x30c   :  { %v8291_v43 = vpop.eup %4429  ;;  %4449 = vrcp.f32 %v3985_v55  ;;  %v3997_v55 = vadd.f32 -1.0, %v8205_v52  ;;  %v3459_v18 = vmul.f32 %v3988_v1, %v7977_v38  ;;  %v3461_v50 = vmul.f32 %v3990_v20, %v8005_v34 }
 0x30d   :  { %v8294_v32 = vpop.eup %4431  ;;  %4451 = vrcp.f32 %v3986_v8  ;;  %v3991_v8 = vadd.f32 -1.0, %v8131_v3  ;;  %v3999_v3 = vadd.f32 -1.0, %v8228_v36  ;;  %v3463_v6 = vmul.f32 %v3992_v40, %v8027_v25 }
 0x30e   :  { %v8299_v13 = vpop.eup %4433  ;;  %4453 = vrcp.f32 %v3987_v39  ;;  %v3994_v39 = vadd.f32 -1.0, %v8167_v61  ;;  %v4002_v61 = vadd.f32 -1.0, %v8254_v63  ;;  %v3464_v62 = vmul.f32 %v3993_v22, %v8038_v10 }
 0x30f   :  { %v8304_v44 = vpop.eup %4435  ;;  %v3462_v36 = vmul.f32 %v3991_v8, %v8017_v4  ;;  %v3466_v53 = vmul.f32 %v3995_v21, %v8066_v2  ;;  %v3467_v38 = vmul.f32 %v3996_v45, %v8071_v46  ;;  %v3468_v59 = vmul.f32 %v3997_v55, %v8088_v11 }
 0x310   :  { %v8310_v19 = vpop.eup %4437  ;;  %v3465_v63 = vmul.f32 %v3994_v39, %v8056_v16  ;;  %v3469_v34 = vmul.f32 %v3998_v37, %v8093_v24  ;;  %v3470_v4 = vmul.f32 %v3999_v3, %v8118_v26  ;;  %v3471_v25 = vmul.f32 %v4000_v33, %v8127_v0 }
 0x311   :  { %v8316_v51 = vpop.eup %4439  ;;  %v3472_v10 = vmul.f32 %v4001_v27, %v8154_v7  ;;  %v3473_v16 = vmul.f32 %v4002_v61, %v8178_v23  ;;  %v3474_v2 = vmul.f32 %v4003_v9, %v8193_v29  ;;  %v3475_v46 = vmul.f32 %v4004_v60, %v8216_v57 }
 0x312   :  { %v8322_v12 = vpop.eup %4441  ;;  %v8354_v11 = vmul.f32 %v8283_v28, %v3459_v18  ;;  %v8357_v24 = vmul.f32 %v8285_v14, %v3460_v17  ;;  %v8360_v26 = vmul.f32 %v8287_v35, %v3461_v50  ;;  %v8363_v0 = vmul.f32 %v8289_v48, %v3462_v36  ;;  %v10092_v50 = vld [vmem:[#allocation111_spill] sm:$0xff] }
 0x313   :  { %v8327_v52 = vpop.eup %4443  ;;  %v8368_v29 = vmul.f32 %v8291_v43, %v3463_v6  ;;  %v8371_v57 = vmul.f32 %v8294_v32, %v3464_v62  ;;  %v8374_v23 = vmul.f32 %v8299_v13, %v3465_v63  ;;  %v8377_v17 = vmul.f32 %v8304_v44, %v3466_v53  ;;  %v10093_v6 = vld [vmem:[#allocation103_spill] sm:$0xff]  ;;  %v10094_v53 = vld [vmem:[#allocation114_spill] sm:$0xff] }
 0x314   :  { %v8333_v5 = vpop.eup %4445  ;;  %10074 = vst [vmem:[#allocation129_spill] sm:$0xff] %v8354_v11  ;;  %10075 = vst [vmem:[#allocation130_spill] sm:$0xff] %v8357_v24  ;;  %v8380_v60 = vmul.f32 %v8310_v19, %v3467_v38  ;;  %v8383_v22 = vmul.f32 %v8316_v51, %v3468_v59  ;;  %v8386_v1 = vmul.f32 %v8322_v12, %v3469_v34  ;;  %v4005_v45 = vadd.f32 -1.0, %v8010_v58  ;;  %v10095_v38 = vld [vmem:[#allocation116_spill] sm:$0xff]  ;;  %v10096_v59 = vld [vmem:[#allocation105_spill] sm:$0xff] }
 0x315   :  { %v8339_v47 = vpop.eup %4447  ;;  %10076 = vst [vmem:[#allocation131_spill] sm:$0xff] %v8360_v26  ;;  %10077 = vst [vmem:[#allocation132_spill] sm:$0xff] %v8363_v0  ;;  %v8389_v30 = vmul.f32 %v8327_v52, %v3470_v4  ;;  %v8392_v62 = vmul.f32 %v8333_v5, %v3471_v25  ;;  %v4006_v37 = vadd.f32 -1.0, %v8024_v41  ;;  %v4007_v3 = vadd.f32 -1.0, %v8033_v49  ;;  %v10097_v34 = vld [vmem:[#allocation119_spill] sm:$0xff]  ;;  %v10098_v4 = vld [vmem:[#allocation121_spill] sm:$0xff] }
 0x316   :  { %10071 = vst [vmem:[#allocation126_spill] sm:$0xff] %v8339_v47  ;;  %v8345_v20 = vpop.eup %4449  ;;  %10079 = vst [vmem:[#allocation134_spill] sm:$0xff] %v8368_v29  ;;  %v8395_v55 = vmul.f32 %v8339_v47, %v3472_v10  ;;  %v4008_v33 = vadd.f32 -1.0, %v8051_v31  ;;  %v4009_v27 = vadd.f32 -1.0, %v8062_v15  ;;  %v4010_v61 = vadd.f32 -1.0, %v8075_v42  ;;  %v10099_v25 = vld [vmem:[#allocation124_spill] sm:$0xff] }
 0x317   :  { %10072 = vst [vmem:[#allocation127_spill] sm:$0xff] %v8345_v20  ;;  %v8351_v40 = vpop.eup %4451  ;;  %10080 = vst [vmem:[#allocation135_spill] sm:$0xff] %v8371_v57  ;;  %v8398_v8 = vmul.f32 %v8345_v20, %v3473_v16  ;;  %v4011_v9 = vadd.f32 -1.0, %v8082_v56  ;;  %v4012_v18 = vadd.f32 -1.0, %v8101_v54  ;;  %v4013_v36 = vadd.f32 -1.0, %v10092_v50  ;;  %v10100_v10 = vld [vmem:[#allocation125_spill] sm:$0xff] }
 0x318   :  { %10073 = vst [vmem:[#allocation128_spill] sm:$0xff] %v8351_v40  ;;  %v8365_v7 = vpop.eup %4453  ;;  %10081 = vst [vmem:[#allocation136_spill] sm:$0xff] %v8374_v23  ;;  %v8401_v39 = vmul.f32 %v8351_v40, %v3474_v2  ;;  %v4014_v63 = vadd.f32 -1.0, %v10093_v6  ;;  %v4015_v58 = vadd.f32 -1.0, %v10094_v53  ;;  %v4016_v41 = vadd.f32 -1.0, %v10095_v38  ;;  %v10101_v16 = vld [vmem:[#allocation110_spill] sm:$0xff] }
 0x319   :  { %10078 = vst [vmem:[#allocation133_spill] sm:$0xff] %v8365_v7  ;;  %10082 = vst [vmem:[#allocation137_spill] sm:$0xff] %v8377_v17  ;;  %v8404_v21 = vmul.f32 %v8365_v7, %v3475_v46  ;;  %v4017_v49 = vadd.f32 -1.0, %v10096_v59  ;;  %v4018_v31 = vadd.f32 -1.0, %v10097_v34  ;;  %v4019_v15 = vadd.f32 -1.0, %v10098_v4  ;;  %v10102_v2 = vld [vmem:[#allocation22_spill] sm:$0xff] }
 0x31a   :  { %10083 = vst [vmem:[#allocation138_spill] sm:$0xff] %v8380_v60  ;;  %10084 = vst [vmem:[#allocation139_spill] sm:$0xff] %v8383_v22  ;;  %v4020_v42 = vadd.f32 -1.0, %v10099_v25  ;;  %v4021_v56 = vadd.f32 -1.0, %v10100_v10  ;;  %v3510_v54 = vmul.f32 %v10101_v16, %v4005_v45  ;;  %v3511_v46 = vmul.f32 %v10102_v2, %v4006_v37  ;;  %v10103_v50 = vld [vmem:[#allocation108_spill] sm:$0xff]  ;;  %v10104_v53 = vld [vmem:[#allocation86_spill] sm:$0xff] }
 0x31b   :  { %10085 = vst [vmem:[#allocation140_spill] sm:$0xff] %v8386_v1  ;;  %10086 = vst [vmem:[#allocation141_spill] sm:$0xff] %v8389_v30  ;;  %v8426_v6 = vmul.f32 %v10103_v50, %v4007_v3  ;;  %v10105_v38 = vld [vmem:[#allocation101_spill] sm:$0xff]  ;;  %v10109_v25 = vld [vmem:[#allocation112_spill] sm:$0xff] }
 0x31c   :  { %10087 = vst [vmem:[#allocation142_spill] sm:$0xff] %v8392_v62  ;;  %10088 = vst [vmem:[#allocation143_spill] sm:$0xff] %v8395_v55  ;;  %v8432_v59 = vmul.f32 %v10105_v38, %v4009_v27  ;;  %v10106_v34 = vld [vmem:[#allocation109_spill] sm:$0xff]  ;;  %v8438_v55 = vmul.f32 %v10109_v25, %v4010_v61  ;;  %v10110_v10 = vld [vmem:[#allocation102_spill] sm:$0xff] }
 0x31d   :  { %10089 = vst [vmem:[#allocation144_spill] sm:$0xff] %v8398_v8  ;;  %10090 = vst [vmem:[#allocation145_spill] sm:$0xff] %v8401_v39  ;;  %v10107_v39 = vld [vmem:[#allocation17_spill] sm:$0xff]  ;;  %v8441_v45 = vmul.f32 %v10110_v10, %v4011_v9  ;;  %v10111_v37 = vld [vmem:[#allocation91_spill] sm:$0xff] }
 0x31e   :  { %10091 = vst [vmem:[#allocation146_spill] sm:$0xff] %v8404_v21  ;;  %v8429_v21 = vmul.f32 %v10104_v53, %v4008_v33  ;;  %v10108_v4 = vsub.f32 1.0, %v10107_v39  ;;  %v3549_v16 = vsub.f32 1.0, %v10111_v37  ;;  %v10112_v3 = vld [vmem:[#allocation18_spill] sm:$0xff]  ;;  %v10114_v50 = vld [vmem:[#allocation113_spill] sm:$0xff]  ;;  %v10115_v27 = vld [vmem:[#allocation115_spill] sm:$0xff] }
 0x31f   :  { %v10113_v2 = vsub.f32 1.0, %v10112_v3  ;;  %v8448_v53 = vmul.f32 %v10114_v50, %v4012_v18  ;;  %v8451_v38 = vmul.f32 %v10115_v27, %v4013_v36  ;;  %v10116_v62 = vld [vmem:[#allocation92_spill] sm:$0xff]  ;;  %v10117_v61 = vld [vmem:[#allocation19_spill] sm:$0xff]  ;;  %v10120_v1 = vld [vmem:[#allocation117_spill] sm:$0xff] }
 0x320   :  { %v3561_v8 = vmul.f32 %v10108_v4, %v10106_v34  ;;  %v3550_v4 = vsub.f32 1.0, %v10116_v62  ;;  %v10118_v25 = vsub.f32 1.0, %v10117_v61  ;;  %v10119_v9 = vld [vmem:[#allocation104_spill] sm:$0xff]  ;;  %v8461_v22 = vmul.f32 %v10120_v1, %v4015_v58  ;;  %v10121_v60 = vld [vmem:[#allocation27_spill] sm:$0xff]  ;;  %v10124_v36 = vld [vmem:[#allocation118_spill] sm:$0xff] }
 0x321   :  { %v3562_v33 = vmul.f32 %v10113_v2, %v10106_v34  ;;  %v8458_v10 = vmul.f32 %v10119_v9, %v4014_v63  ;;  %v3551_v2 = vsub.f32 1.0, %v10121_v60  ;;  %v10122_v18 = vld [vmem:[#allocation20_spill] sm:$0xff]  ;;  %v8468_v27 = vmul.f32 %v10124_v36, %v4016_v41  ;;  %v10125_v23 = vld [vmem:[#allocation93_spill] sm:$0xff]  ;;  %v10128_v9 = vld [vmem:[#allocation106_spill] sm:$0xff] }
 0x322   :  { %v3563_v30 = vmul.f32 %v10118_v25, %v10106_v34  ;;  %v10123_v50 = vsub.f32 1.0, %v10122_v18  ;;  %v3552_v57 = vsub.f32 1.0, %v10125_v23  ;;  %v10126_v29 = vld [vmem:[#allocation21_spill] sm:$0xff]  ;;  %v3578_v63 = vadd.f32 %v3561_v8, %v10107_v39  ;;  %v10129_v58 = vld [vmem:[#allocation47_spill] sm:$0xff]  ;;  %v10130_v11 = vld [vmem:[#allocation120_spill] sm:$0xff] }
 0x323   :  { %v10127_v25 = vsub.f32 1.0, %v10126_v29  ;;  %v8476_v1 = vmul.f32 %v10128_v9, %v4017_v49  ;;  %v3553_v26 = vsub.f32 1.0, %v10129_v58  ;;  %v3566_v24 = vmul.f32 %v3549_v16, %v10106_v34  ;;  %v10131_v36 = vld [vmem:[#allocation51_spill] sm:$0xff]  ;;  %v10135_v47 = vld [vmem:[#allocation57_spill] sm:$0xff] }
 0x324   :  { %v3564_v17 = vmul.f32 %v10123_v50, %v10106_v34  ;;  %v3579_v50 = vadd.f32 %v3562_v33, %v10112_v3  ;;  %v8482_v41 = vmul.f32 %v10130_v11, %v4018_v31  ;;  %v3554_v7 = vsub.f32 1.0, %v10131_v36  ;;  %v10132_v20 = vld [vmem:[#allocation107_spill] sm:$0xff]  ;;  %v10136_v3 = vld [vmem:[#allocation78_spill] sm:$0xff] }
 0x325   :  { %v3565_v0 = vmul.f32 %v10127_v25, %v10106_v34  ;;  %v3567_v40 = vmul.f32 %v3550_v4, %v10106_v34  ;;  %v3580_v25 = vadd.f32 %v3563_v30, %v10117_v61  ;;  %v8488_v8 = vmul.f32 %v10132_v20, %v4019_v15  ;;  %v10134_v49 = vld [vmem:[#allocation55_spill] sm:$0xff]  ;;  %v10137_v15 = vld [vmem:[#allocation122_spill] sm:$0xff] }
 0x326   :  { %v3555_v9 = vsub.f32 1.0, %v10134_v49  ;;  %v3568_v39 = vmul.f32 %v3551_v2, %v10106_v34  ;;  %v3581_v16 = vadd.f32 %v3564_v17, %v10122_v18  ;;  %v3556_v33 = vsub.f32 1.0, %v10135_v47  ;;  %v10138_v18 = vld [vmem:[#allocation79_spill] sm:$0xff] }
 0x327   :  { %10133 = vst [vmem:[#allocation111_spill] sm:$0xff] %v8488_v8  ;;  %v3569_v11 = vmul.f32 %v3552_v57, %v10106_v34  ;;  %v3582_v31 = vadd.f32 %v3565_v0, %v10126_v29  ;;  %4455 = vrcp.f32 %v3578_v63  ;;  %v3557_v4 = vsub.f32 1.0, %v10136_v3  ;;  %v10139_v63 = vld [vmem:[#allocation81_spill] sm:$0xff] }
 0x328   :  { %v3570_v30 = vmul.f32 %v3553_v26, %v10106_v34  ;;  %v3583_v20 = vadd.f32 %v3566_v24, %v10111_v37  ;;  %4457 = vrcp.f32 %v3579_v50  ;;  %v3525_v61 = vmul.f32 %v10137_v15, %v4020_v42  ;;  %v10140_v42 = vld [vmem:[#allocation123_spill] sm:$0xff]  ;;  %v10146_v15 = vld [vmem:[#allocation133_spill] sm:$0xff] }
 0x329   :  { %v3571_v2 = vmul.f32 %v3554_v7, %v10106_v34  ;;  %v3584_v17 = vadd.f32 %v3567_v40, %v10116_v62  ;;  %4459 = vrcp.f32 %v3580_v25  ;;  %v3558_v8 = vsub.f32 1.0, %v10138_v18 }
 0x32a   :  { %v3572_v57 = vmul.f32 %v3555_v9, %v10106_v34  ;;  %v3585_v0 = vadd.f32 %v3568_v39, %v10121_v60  ;;  %4461 = vrcp.f32 %v3581_v16  ;;  %v3559_v29 = vsub.f32 1.0, %v10139_v63  ;;  %v10141_v9 = vld [vmem:[#allocation48_spill] sm:$0xff] }
 0x32b   :  { %v3573_v26 = vmul.f32 %v3556_v33, %v10106_v34  ;;  %v3586_v24 = vadd.f32 %v3569_v11, %v10125_v23  ;;  %4463 = vrcp.f32 %v3582_v31  ;;  %v3526_v50 = vmul.f32 %v10140_v42, %v4021_v56 }
 0x32c   :  { %v3574_v7 = vmul.f32 %v3557_v4, %v10106_v34  ;;  %v3587_v40 = vadd.f32 %v3570_v30, %v10129_v58  ;;  %4465 = vrcp.f32 %v3583_v20  ;;  %v8512_v25 = vmul.f32 %v8283_v28, %v3510_v54  ;;  %v10145_v30 = vld [vmem:[#allocation128_spill] sm:$0xff] }
 0x32d   :  { %v3560_v39 = vsub.f32 1.0, %v10141_v9  ;;  %v3588_v16 = vadd.f32 %v3571_v2, %v10131_v36  ;;  %4467 = vrcp.f32 %v3584_v17  ;;  %v3528_v33 = vmul.f32 %v8285_v14, %v3511_v46  ;;  %v10149_v17 = vld [vmem:[#allocation95_spill] sm:$0xff] }
 0x32e   :  { %v3575_v11 = vmul.f32 %v3558_v8, %v10106_v34  ;;  %v3589_v31 = vadd.f32 %v3572_v57, %v10134_v49  ;;  %4469 = vrcp.f32 %v3585_v0  ;;  %v3529_v56 = vmul.f32 %v8287_v35, %v8426_v6  ;;  %v10150_v0 = vld [vmem:[#allocation18_spill] sm:$0xff] }
 0x32f   :  { %v3576_v4 = vmul.f32 %v3559_v29, %v10106_v34  ;;  %v3590_v28 = vadd.f32 %v3573_v26, %v10135_v47  ;;  %4471 = vrcp.f32 %v3586_v24  ;;  %v8525_v54 = vmul.f32 %v8289_v48, %v8429_v21  ;;  %v10151_v24 = vld [vmem:[#allocation19_spill] sm:$0xff] }
 0x330   :  { %v8529_v14 = vmul.f32 %v8291_v43, %v8432_v59  ;;  %v3591_v46 = vadd.f32 %v3574_v7, %v10136_v3  ;;  %4473 = vrcp.f32 %v3587_v40  ;;  %v8534_v35 = vmul.f32 %v8294_v32, %v8438_v55  ;;  %v10153_v7 = vld [vmem:[#allocation20_spill] sm:$0xff] }
 0x331   :  { %v4456_v8 = vpop.eup %4455  ;;  %v8538_v29 = vmul.f32 %v8299_v13, %v8441_v45  ;;  %v3577_v6 = vmul.f32 %v3560_v39, %v10106_v34  ;;  %4475 = vrcp.f32 %v3588_v16  ;;  %v8543_v43 = vmul.f32 %v8304_v44, %v8448_v53  ;;  %v10142_v53 = vld [vmem:[#allocation126_spill] sm:$0xff]  ;;  %v10155_v16 = vld [vmem:[#allocation65_spill] sm:$0xff] }
 0x332   :  { %v4458_v48 = vpop.eup %4457  ;;  %v8547_v21 = vmul.f32 %v8310_v19, %v8451_v38  ;;  %v3592_v59 = vadd.f32 %v3575_v11, %v10138_v18  ;;  %4477 = vrcp.f32 %v3589_v31  ;;  %v8552_v13 = vmul.f32 %v8316_v51, %v8458_v10  ;;  %v10154_v39 = vld [vmem:[#allocation62_spill] sm:$0xff] }
 0x333   :  { %v4460_v32 = vpop.eup %4459  ;;  %v8556_v55 = vmul.f32 %v8322_v12, %v8461_v22  ;;  %v3593_v34 = vadd.f32 %v3576_v4, %v10139_v63  ;;  %4479 = vrcp.f32 %v3590_v28  ;;  %v8561_v19 = vmul.f32 %v8327_v52, %v8468_v27  ;;  %v10143_v12 = vld [vmem:[#allocation111_spill] sm:$0xff]  ;;  %v10156_v11 = vld [vmem:[#allocation66_spill] sm:$0xff]  ;;  %v10157_v4 = vld [vmem:[#allocation21_spill] sm:$0xff] }
 0x334   :  { %v4462_v44 = vpop.eup %4461  ;;  %v8565_v45 = vmul.f32 %v8333_v5, %v8476_v1  ;;  %v8569_v51 = vmul.f32 %v10142_v53, %v8482_v41  ;;  %4481 = vrcp.f32 %v3591_v46  ;;  %v10144_v22 = vld [vmem:[#allocation127_spill] sm:$0xff]  ;;  %v8576_v20 = vmul.f32 %v10145_v30, %v3525_v61  ;;  %v10147_v1 = vld [vmem:[#allocation17_spill] sm:$0xff]  ;;  %v10148_v41 = vld [vmem:[#allocation58_spill] sm:$0xff] }
 0x335   :  { %v4464_v38 = vpop.eup %4463  ;;  %v8573_v10 = vmul.f32 %v10144_v22, %v10143_v12  ;;  %v8579_v52 = vmul.f32 %v10146_v15, %v3526_v50  ;;  %v3594_v27 = vadd.f32 %v3577_v6, %v10141_v9  ;;  %v3596_v2 = vmul.f32 %v4456_v8, %v10147_v1  ;;  %v10152_v61 = vld [vmem:[#allocation60_spill] sm:$0xff]  ;;  %v10159_v8 = vld [vmem:[#allocation70_spill] sm:$0xff]  ;;  %v10194_v1 = vld [vmem:[#allocation141_spill] sm:$0xff] }
 0x336   :  { %v4466_v5 = vpop.eup %4465  ;;  %4483 = vrcp.f32 %v3592_v59  ;;  %vm3629_vm9 = vcmp.ge.f32.partialorder %v10148_v41, 1.0  ;;  %vm3630_vm11 = vcmp.ge.f32.partialorder %v10149_v17, 1.0  ;;  %v3598_v26 = vmul.f32 %v4458_v48, %v10150_v0  ;;  %v10158_v46 = vld [vmem:[#allocation68_spill] sm:$0xff]  ;;  %v10167_v41 = vld [vmem:[#allocation59_spill] sm:$0xff]  ;;  %v10170_v17 = vld [vmem:[#allocation61_spill] sm:$0xff] }
 0x337   :  { %v4468_v57 = vpop.eup %4467  ;;  %v3600_v42 = vmul.f32 %v4460_v32, %v10151_v24  ;;  %4485 = vrcp.f32 %v3593_v34  ;;  %vm3631_vm8 = vcmp.ge.f32.partialorder %v10152_v61, 1.0  ;;  %v3602_v40 = vmul.f32 %v4462_v44, %v10153_v7  ;;  %v10186_v7 = vld [vmem:[#allocation28_spill] sm:$0xff] }
 0x338   :  { %v4470_v50 = vpop.eup %4469  ;;  %vm3632_vm10 = vcmp.ge.f32.partialorder %v10154_v39, 1.0  ;;  %vm3633_vm12 = vcmp.ge.f32.partialorder %v10155_v16, 1.0  ;;  %vm3634_vm14 = vcmp.ge.f32.partialorder %v10156_v11, 1.0  ;;  %v3604_v28 = vmul.f32 %v4464_v38, %v10157_v4  ;;  %v10183_v4 = vld [vmem:[#allocation26_spill] sm:$0xff] }
 0x339   :  { %v4472_v31 = vpop.eup %4471  ;;  %4487 = vrcp.f32 %v3594_v27  ;;  %vm3635_vm15 = vcmp.ge.f32.partialorder %v10158_v46, 1.0  ;;  %vm3636_vm0 = vcmp.ge.f32.partialorder %v10159_v8, 1.0  ;;  %v3606_v48 = vmul.f32 %v4466_v5, %v10111_v37  ;;  %v10160_v27 = vld [vmem:[#allocation72_spill] sm:$0xff] }
 0x33a   :  { %v4474_v6 = vpop.eup %4473  ;;  %v8599_v59 = vsel %vm3629_vm9, %v3596_v2, %v8512_v25  ;;  %v8603_v32 = vsel %vm3630_vm11, %v3598_v26, %v3528_v33  ;;  %v3663_v34 = vsub.f32 1.0, %v3596_v2  ;;  %v3608_v53 = vmul.f32 %v4468_v57, %v10116_v62  ;;  %v10162_v57 = vld [vmem:[#allocation99_spill] sm:$0xff]  ;;  %v10166_v62 = vld [vmem:[#allocation130_spill] sm:$0xff] }
 0x33b   :  { %v4476_v44 = vpop.eup %4475  ;;  %v8608_v38 = vsel %vm3631_vm8, %v3600_v42, %v3529_v56  ;;  %v3664_v12 = vsub.f32 1.0, %v3598_v26  ;;  %v3665_v22 = vsub.f32 1.0, %v3600_v42  ;;  %v3610_v15 = vmul.f32 %v4470_v50, %v10121_v60 }
 0x33c   :  { %v4478_v30 = vpop.eup %4477  ;;  %vm3637_vm1 = vcmp.ge.f32.partialorder %v10160_v27, 1.0  ;;  %v8615_v25 = vsel %vm3632_vm10, %v3602_v40, %v8525_v54  ;;  %v8620_v33 = vsel %vm3633_vm12, %v3604_v28, %v8529_v14  ;;  %v3666_v5 = vsub.f32 1.0, %v3602_v40  ;;  %v10164_v54 = vld [vmem:[#allocation129_spill] sm:$0xff]  ;;  %v10209_v27 = vld [vmem:[#allocation56_spill] sm:$0xff] }
 0x33d   :  { %10161 = vst [vmem:[#allocation103_spill] sm:$0xff] %v8620_v33  ;;  %v4480_v56 = vpop.eup %4479  ;;  %v8623_v2 = vmul.f32 %v4472_v31, %v10125_v23  ;;  %vm3638_vm13 = vcmp.ge.f32.partialorder %v10162_v57, 1.0  ;;  %v8629_v26 = vsel %vm3634_vm14, %v3606_v48, %v8534_v35  ;;  %v3667_v42 = vsub.f32 1.0, %v3604_v28  ;;  %v10165_v23 = vld [vmem:[#allocation85_spill] sm:$0xff]  ;;  %v10199_v33 = vld [vmem:[#allocation143_spill] sm:$0xff] }
 0x33e   :  { %10163 = vst [vmem:[#allocation114_spill] sm:$0xff] %v8629_v26  ;;  %v8634_v50 = vsel %vm3629_vm9, %v3663_v34, %v10164_v54  ;;  %v4482_v14 = vpop.eup %4481  ;;  %v8637_v40 = vmul.f32 %v4474_v6, %v10129_v58  ;;  %v8640_v31 = vmul.f32 %v4476_v44, %v10131_v36  ;;  %vm3639_vm5 = vcmp.ge.f32.partialorder %v10165_v23, 1.0  ;;  %v10169_v44 = vld [vmem:[#allocation131_spill] sm:$0xff]  ;;  %v10181_v58 = vld [vmem:[#allocation136_spill] sm:$0xff] }
 0x33f   :  { %v3668_v60 = vsub.f32 1.0, %v3606_v48  ;;  %v8646_v35 = vsel %vm3630_vm11, %v3664_v12, %v10166_v62  ;;  %v8649_v28 = vmul.f32 %v4478_v30, %v10134_v49  ;;  %vm3640_vm2 = vcmp.ge.f32.partialorder %v10167_v41, 1.0  ;;  %v10175_v49 = vld [vmem:[#allocation52_spill] sm:$0xff] }
 0x340   :  { %v8655_v6 = vsel %vm3635_vm15, %v3608_v53, %v8538_v29  ;;  %v3669_v34 = vsub.f32 1.0, %v3608_v53  ;;  %v8660_v48 = vsel %vm3631_vm8, %v3665_v22, %v10169_v44  ;;  %v4484_v54 = vpop.eup %4483  ;;  %v8663_v62 = vmul.f32 %v4480_v56, %v10135_v47  ;;  %v10172_v29 = vld [vmem:[#allocation132_spill] sm:$0xff]  ;;  %v10173_v44 = vld [vmem:[#allocation134_spill] sm:$0xff] }
 0x341   :  { %10168 = vst [vmem:[#allocation116_spill] sm:$0xff] %v8655_v6  ;;  %vm3641_vm3 = vcmp.ge.f32.partialorder %v10170_v17, 1.0  ;;  %v8669_v12 = vsel %vm3636_vm0, %v3610_v15, %v8543_v43  ;;  %v3670_v30 = vsub.f32 1.0, %v3610_v15  ;;  %v8674_v53 = vsel %vm3632_vm10, %v3666_v5, %v10172_v29  ;;  %v4486_v61 = vpop.eup %4485  ;;  %v10176_v15 = vld [vmem:[#allocation63_spill] sm:$0xff] }
 0x342   :  { %10171 = vst [vmem:[#allocation105_spill] sm:$0xff] %v8669_v12  ;;  %v8677_v22 = vmul.f32 %v4482_v14, %v10136_v3  ;;  %v3671_v56 = vsub.f32 1.0, %v8623_v2  ;;  %v8683_v47 = vsel %vm3633_vm12, %v3667_v42, %v10173_v44  ;;  %v3697_v43 = vmul.f32 %v8634_v50, %v10175_v49  ;;  %v10177_v29 = vld [vmem:[#allocation135_spill] sm:$0xff]  ;;  %v10179_v3 = vld [vmem:[#allocation94_spill] sm:$0xff]  ;;  %v10180_v44 = vld [vmem:[#allocation80_spill] sm:$0xff] }
 0x343   :  { %10174 = vst [vmem:[#allocation119_spill] sm:$0xff] %v8683_v47  ;;  %vm3642_vm4 = vcmp.ge.f32.partialorder %v10176_v15, 1.0  ;;  %v3672_v39 = vsub.f32 1.0, %v8637_v40  ;;  %v3673_v5 = vsub.f32 1.0, %v8640_v31  ;;  %v8693_v14 = vsel %vm3634_vm14, %v3668_v60, %v10177_v29  ;;  %v4488_v16 = vpop.eup %4487  ;;  %v10185_v29 = vld [vmem:[#allocation137_spill] sm:$0xff]  ;;  %v10211_v15 = vld [vmem:[#allocation76_spill] sm:$0xff] }
 0x344   :  { %10178 = vst [vmem:[#allocation121_spill] sm:$0xff] %v8693_v14  ;;  %v3698_v36 = vmul.f32 %v8646_v35, %v10179_v3  ;;  %v8698_v42 = vmul.f32 %v4484_v54, %v10138_v18  ;;  %vm3643_vm6 = vcmp.ge.f32.partialorder %v10180_v44, 1.0  ;;  %v3674_v49 = vsub.f32 1.0, %v8649_v28  ;;  %v10184_v3 = vld [vmem:[#allocation82_spill] sm:$0xff] }
 0x345   :  { %v8705_v37 = vsel %vm3635_vm15, %v3669_v34, %v10181_v58  ;;  %v3699_v60 = vmul.f32 %v8660_v48, %v10183_v4  ;;  %v8710_v11 = vmul.f32 %v4486_v61, %v10139_v63  ;;  %vm3644_vm7 = vcmp.ge.f32.partialorder %v10184_v3, 1.0  ;;  %v10187_v58 = vld [vmem:[#allocation43_spill] sm:$0xff]  ;;  %v10188_v4 = vld [vmem:[#allocation138_spill] sm:$0xff]  ;;  %v10189_v63 = vld [vmem:[#allocation29_spill] sm:$0xff] }
 0x346   :  { %10182 = vst [vmem:[#allocation124_spill] sm:$0xff] %v8705_v37  ;;  %v3675_v54 = vsub.f32 1.0, %v8663_v62  ;;  %v8717_v18 = vsel %vm3636_vm0, %v3670_v30, %v10185_v29  ;;  %v3700_v46 = vmul.f32 %v8674_v53, %v10186_v7  ;;  %vm3645_vm9 = vcmp.ge.f32.partialorder %v10187_v58, 1.0  ;;  %v10190_v30 = vld [vmem:[#allocation139_spill] sm:$0xff]  ;;  %v10191_v29 = vld [vmem:[#allocation84_spill] sm:$0xff]  ;;  %v10212_v3 = vld [vmem:[#allocation45_spill] sm:$0xff] }
 0x347   :  { %v3676_v34 = vsub.f32 1.0, %v8677_v22  ;;  %v8726_v61 = vsel %vm3637_vm1, %v3671_v56, %v10188_v4  ;;  %v3701_v12 = vmul.f32 %v8683_v47, %v10189_v63  ;;  %v3714_v24 = vsub.f32 1.0, %v3697_v43  ;;  %v10192_v56 = vld [vmem:[#allocation140_spill] sm:$0xff]  ;;  %v10193_v63 = vld [vmem:[#allocation30_spill] sm:$0xff]  ;;  %v10198_v47 = vld [vmem:[#allocation37_spill] sm:$0xff] }
 0x348   :  { %v8731_v8 = vmul.f32 %v4488_v16, %v10141_v9  ;;  %v8736_v7 = vsel %vm3638_vm13, %v3672_v39, %v10190_v30  ;;  %v3702_v6 = vmul.f32 %v8693_v14, %v10191_v29  ;;  %v3715_v0 = vsub.f32 1.0, %v3698_v36  ;;  %v10195_v30 = vld [vmem:[#allocation38_spill] sm:$0xff] }
 0x349   :  { %v3677_v26 = vsub.f32 1.0, %v8698_v42  ;;  %v8744_v4 = vsel %vm3639_vm5, %v3673_v5, %v10192_v56  ;;  %v3703_v43 = vmul.f32 %v8705_v37, %v10193_v63  ;;  %v3716_v16 = vsub.f32 1.0, %v3699_v60  ;;  %v10196_v14 = vld [vmem:[#allocation142_spill] sm:$0xff]  ;;  %v10197_v56 = vld [vmem:[#allocation73_spill] sm:$0xff] }
 0x34a   :  { %v3678_v9 = vsub.f32 1.0, %v8710_v11  ;;  %v8752_v39 = vsel %vm3640_vm2, %v3674_v49, %v10194_v1  ;;  %v3704_v36 = vmul.f32 %v8717_v18, %v10195_v30  ;;  %v3717_v29 = vsub.f32 1.0, %v3700_v46  ;;  %v10200_v30 = vld [vmem:[#allocation34_spill] sm:$0xff] }
 0x34b   :  { %v8759_v5 = vsel %vm3641_vm3, %v3675_v54, %v10196_v14  ;;  %v3705_v63 = vmul.f32 %v8726_v61, %v10197_v56  ;;  %v3718_v60 = vsub.f32 1.0, %v3701_v12  ;;  %4489 = vrcp.f32 %v3714_v24  ;;  %v10201_v56 = vld [vmem:[#allocation144_spill] sm:$0xff] }
 0x34c   :  { %v3679_v37 = vsub.f32 1.0, %v8731_v8  ;;  %v3706_v1 = vmul.f32 %v8736_v7, %v10198_v47  ;;  %v3719_v49 = vsub.f32 1.0, %v3702_v6  ;;  %4491 = vrcp.f32 %v3715_v0  ;;  %v10202_v12 = vld [vmem:[#allocation44_spill] sm:$0xff]  ;;  %v10203_v0 = vld [vmem:[#allocation145_spill] sm:$0xff] }
 0x34d   :  { %v8769_v46 = vsel %vm3642_vm4, %v3676_v34, %v10199_v33  ;;  %v3707_v14 = vmul.f32 %v8744_v4, %v10200_v30  ;;  %v3720_v54 = vsub.f32 1.0, %v3703_v43  ;;  %4493 = vrcp.f32 %v3716_v16  ;;  %v10204_v34 = vld [vmem:[#allocation36_spill] sm:$0xff]  ;;  %v10205_v16 = vld [vmem:[#allocation146_spill] sm:$0xff] }
 0x34e   :  { %v8776_v24 = vsel %vm3643_vm6, %v3677_v26, %v10201_v56  ;;  %v3708_v47 = vmul.f32 %v8752_v39, %v10202_v12  ;;  %v3721_v6 = vsub.f32 1.0, %v3704_v36  ;;  %4495 = vrcp.f32 %v3717_v29  ;;  %v10206_v56 = vld [vmem:[#allocation74_spill] sm:$0xff]  ;;  %v10207_v29 = vld [vmem:[#allocation41_spill] sm:$0xff] }
 0x34f   :  { %v8783_v33 = vsel %vm3644_vm7, %v3678_v9, %v10203_v0  ;;  %v3709_v30 = vmul.f32 %v8759_v5, %v10204_v34  ;;  %v3722_v43 = vsub.f32 1.0, %v3705_v63  ;;  %4497 = vrcp.f32 %v3718_v60  ;;  %v10208_v0 = vld [vmem:[#allocation75_spill] sm:$0xff] }
 0x350   :  { %v8790_v26 = vsel %vm3645_vm9, %v3679_v37, %v10205_v16  ;;  %v3710_v12 = vmul.f32 %v8769_v46, %v10206_v56  ;;  %v3723_v36 = vsub.f32 1.0, %v3706_v1  ;;  %4499 = vrcp.f32 %v3719_v49 }
 0x351   :  { %v8798_v9 = vsel %vm3637_vm1, %v8623_v2, %v8547_v21  ;;  %v3711_v63 = vmul.f32 %v8776_v24, %v10207_v29  ;;  %v3724_v60 = vsub.f32 1.0, %v3707_v14  ;;  %4501 = vrcp.f32 %v3720_v54 }
 0x352   :  { %v8806_v37 = vsel %vm3638_vm13, %v8637_v40, %v8552_v13  ;;  %v3712_v1 = vmul.f32 %v8783_v33, %v10208_v0  ;;  %v3725_v49 = vsub.f32 1.0, %v3708_v47  ;;  %4503 = vrcp.f32 %v3721_v6  ;;  %v10213_v6 = vld [vmem:[#allocation46_spill] sm:$0xff] }
 0x353   :  { %v8814_v21 = vsel %vm3639_vm5, %v8640_v31, %v8556_v55  ;;  %v3713_v2 = vmul.f32 %v8790_v26, %v10209_v27  ;;  %v3726_v14 = vsub.f32 1.0, %v3709_v30  ;;  %4505 = vrcp.f32 %v3722_v43  ;;  %v10214_v30 = vld [vmem:[#allocation77_spill] sm:$0xff] }
 0x354   :  { %v8822_v13 = vsel %vm3640_vm2, %v8649_v28, %v8561_v19  ;;  %v8828_v57 = vsel %vm3641_vm3, %v8663_v62, %v8565_v45  ;;  %v3727_v23 = vsub.f32 1.0, %v3710_v12  ;;  %4507 = vrcp.f32 %v3723_v36  ;;  %v10210_v62 = vld [vmem:[#allocation42_spill] sm:$0xff] }
 0x355   :  { %v4490_v55 = vpop.eup %4489  ;;  %v8834_v40 = vsel %vm3642_vm4, %v8677_v22, %v8569_v51  ;;  %v8840_v19 = vsel %vm3643_vm6, %v8698_v42, %v8573_v10  ;;  %v3728_v31 = vsub.f32 1.0, %v3711_v63  ;;  %4509 = vrcp.f32 %v3724_v60  ;;  %v10217_v60 = vld [vmem:[#allocation103_spill] sm:$0xff] }
 0x356   :  { %v4492_v28 = vpop.eup %4491  ;;  %v8846_v45 = vsel %vm3644_vm7, %v8710_v11, %v8576_v20  ;;  %v3729_v41 = vsub.f32 1.0, %v3712_v1  ;;  %4511 = vrcp.f32 %v3725_v49  ;;  %v3765_v51 = vmul.f32 %v4490_v55, %v10210_v62  ;;  %v10218_v1 = vld [vmem:[#allocation119_spill] sm:$0xff]  ;;  %v10219_v49 = vld [vmem:[#allocation17_spill] sm:$0xff] }
 0x357   :  { %v4494_v17 = vpop.eup %4493  ;;  %v8853_v10 = vsel %vm3645_vm9, %v8731_v8, %v8579_v52  ;;  %v3730_v22 = vsub.f32 1.0, %v3713_v2  ;;  %4513 = vrcp.f32 %v3726_v14  ;;  %v3766_v42 = vmul.f32 %v4492_v28, %v10211_v15  ;;  %v10220_v2 = vld [vmem:[#allocation50_spill] sm:$0xff]  ;;  %v10224_v62 = vld [vmem:[#allocation53_spill] sm:$0xff]  ;;  %v10226_v15 = vld [vmem:[#allocation124_spill] sm:$0xff] }
 0x358   :  { %v4496_v44 = vpop.eup %4495  ;;  %4515 = vrcp.f32 %v3727_v23  ;;  %v3767_v20 = vmul.f32 %v4494_v17, %v10212_v3  ;;  %v8858_v11 = vmul.f32 %v3765_v51, %v8599_v59  ;;  %v3799_v54 = vmul.f32 %v3765_v51, %v8634_v50  ;;  %v10215_v50 = vld [vmem:[#allocation49_spill] sm:$0xff]  ;;  %v10221_v23 = vld [vmem:[#allocation114_spill] sm:$0xff]  ;;  %v10225_v17 = vld [vmem:[#allocation116_spill] sm:$0xff] }
 0x359   :  { %v4498_v47 = vpop.eup %4497  ;;  %4517 = vrcp.f32 %v3728_v31  ;;  %v3768_v34 = vmul.f32 %v4496_v44, %v10213_v6  ;;  %v8863_v52 = vmul.f32 %v3766_v42, %v8603_v32  ;;  %v3800_v58 = vmul.f32 %v3766_v42, %v8646_v35  ;;  %v10216_v35 = vld [vmem:[#allocation64_spill] sm:$0xff]  ;;  %v10223_v28 = vld [vmem:[#allocation18_spill] sm:$0xff]  ;;  %v10227_v44 = vld [vmem:[#allocation19_spill] sm:$0xff] }
 0x35a   :  { %v4500_v8 = vpop.eup %4499  ;;  %4519 = vrcp.f32 %v3729_v41  ;;  %v3769_v43 = vmul.f32 %v4498_v47, %v10214_v30  ;;  %v8868_v16 = vmul.f32 %v3767_v20, %v8608_v38  ;;  %v3801_v59 = vmul.f32 %v3767_v20, %v8660_v48  ;;  %v10229_v6 = vld [vmem:[#allocation105_spill] sm:$0xff]  ;;  %v10230_v30 = vld [vmem:[#allocation20_spill] sm:$0xff] }
 0x35b   :  { %v4502_v56 = vpop.eup %4501  ;;  %4521 = vrcp.f32 %v3730_v22  ;;  %v3770_v12 = vmul.f32 %v4500_v8, %v10215_v50  ;;  %v8873_v36 = vmul.f32 %v3768_v34, %v8615_v25  ;;  %v3802_v32 = vmul.f32 %v3768_v34, %v8674_v53  ;;  %v10222_v25 = vld [vmem:[#allocation121_spill] sm:$0xff] }
 0x35c   :  { %v4504_v29 = vpop.eup %4503  ;;  %v3771_v63 = vmul.f32 %v4502_v56, %v10216_v35  ;;  %v8878_v0 = vmul.f32 %v3769_v43, %v10217_v60  ;;  %v3803_v38 = vmul.f32 %v3769_v43, %v10218_v1  ;;  %v3816_v27 = vmul.f32 %v3799_v54, %v10219_v49  ;;  %v10228_v54 = vld [vmem:[#allocation54_spill] sm:$0xff]  ;;  %v10231_v56 = vld [vmem:[#allocation67_spill] sm:$0xff]  ;;  %v10232_v35 = vld [vmem:[#allocation21_spill] sm:$0xff] }
 0x35d   :  { %v4506_v48 = vpop.eup %4505  ;;  %v3772_v14 = vmul.f32 %v4504_v29, %v10220_v2  ;;  %v8884_v55 = vmul.f32 %v3770_v12, %v10221_v23  ;;  %v3804_v31 = vmul.f32 %v3770_v12, %v10222_v25  ;;  %v3817_v53 = vmul.f32 %v3800_v58, %v10223_v28  ;;  %v10233_v60 = vld [vmem:[#allocation69_spill] sm:$0xff]  ;;  %v10236_v25 = vld [vmem:[#allocation92_spill] sm:$0xff] }
 0x35e   :  { %v4508_v41 = vpop.eup %4507  ;;  %v3773_v51 = vmul.f32 %v4506_v48, %v10224_v62  ;;  %v8890_v22 = vmul.f32 %v3771_v63, %v10225_v17  ;;  %v3805_v42 = vmul.f32 %v3771_v63, %v10226_v15  ;;  %v3818_v3 = vmul.f32 %v3801_v59, %v10227_v44  ;;  %v10234_v48 = vld [vmem:[#allocation91_spill] sm:$0xff]  ;;  %v10239_v15 = vld [vmem:[#allocation100_spill] sm:$0xff] }
 0x35f   :  { %v4510_v20 = vpop.eup %4509  ;;  %v3774_v47 = vmul.f32 %v4508_v41, %v10228_v54  ;;  %v8896_v34 = vmul.f32 %v3772_v14, %v10229_v6  ;;  %v3806_v8 = vmul.f32 %v3772_v14, %v8717_v18  ;;  %v3819_v58 = vmul.f32 %v3802_v32, %v10230_v30  ;;  %v10235_v14 = vld [vmem:[#allocation71_spill] sm:$0xff]  ;;  %v10237_v41 = vld [vmem:[#allocation98_spill] sm:$0xff] }
 0x360   :  { %v4512_v43 = vpop.eup %4511  ;;  %v3775_v50 = vmul.f32 %v4510_v20, %v10231_v56  ;;  %v8902_v12 = vmul.f32 %v3773_v51, %v8798_v9  ;;  %v3807_v29 = vmul.f32 %v3773_v51, %v8726_v61  ;;  %v3820_v59 = vmul.f32 %v3803_v38, %v10232_v35  ;;  %v10238_v51 = vld [vmem:[#allocation27_spill] sm:$0xff]  ;;  %v10240_v20 = vld [vmem:[#allocation93_spill] sm:$0xff] }
 0x361   :  { %v4514_v63 = vpop.eup %4513  ;;  %v3776_v1 = vmul.f32 %v4512_v43, %v10233_v60  ;;  %v8908_v49 = vmul.f32 %v3774_v47, %v8806_v37  ;;  %v3808_v18 = vmul.f32 %v3774_v47, %v8736_v7  ;;  %v3821_v32 = vmul.f32 %v3804_v31, %v10234_v48  ;;  %v10241_v47 = vld [vmem:[#allocation35_spill] sm:$0xff] }
 0x362   :  { %v4516_v2 = vpop.eup %4515  ;;  %v3777_v23 = vmul.f32 %v4514_v63, %v10235_v14  ;;  %v8914_v9 = vmul.f32 %v3775_v50, %v8814_v21  ;;  %v3809_v61 = vmul.f32 %v3775_v50, %v8744_v4  ;;  %v3822_v38 = vmul.f32 %v3805_v42, %v10236_v25  ;;  %v10242_v30 = vld [vmem:[#allocation47_spill] sm:$0xff] }
 0x363   :  { %v4518_v28 = vpop.eup %4517  ;;  %v3778_v62 = vmul.f32 %v4516_v2, %v10237_v41  ;;  %v8920_v37 = vmul.f32 %v3776_v1, %v8822_v13  ;;  %v3810_v7 = vmul.f32 %v3776_v1, %v8752_v39  ;;  %v3823_v31 = vmul.f32 %v3806_v8, %v10238_v51  ;;  %v10243_v43 = vld [vmem:[#allocation31_spill] sm:$0xff]  ;;  %v10246_v1 = vld [vmem:[#allocation57_spill] sm:$0xff]  ;;  %v10247_v2 = vld [vmem:[#allocation78_spill] sm:$0xff] }
 0x364   :  { %v4520_v17 = vpop.eup %4519  ;;  %v3779_v44 = vmul.f32 %v4518_v28, %v10239_v15  ;;  %v8926_v21 = vmul.f32 %v3777_v23, %v8828_v57  ;;  %v3811_v4 = vmul.f32 %v3777_v23, %v8759_v5  ;;  %v3824_v42 = vmul.f32 %v3807_v29, %v10240_v20  ;;  %v10244_v5 = vld [vmem:[#allocation51_spill] sm:$0xff]  ;;  %v10253_v51 = vld [vmem:[#allocation48_spill] sm:$0xff] }
 0x365   :  { %v4522_v54 = vpop.eup %4521  ;;  %v3780_v6 = vmul.f32 %v4520_v17, %v10241_v47  ;;  %v8932_v13 = vmul.f32 %v3778_v62, %v8834_v40  ;;  %v3812_v39 = vmul.f32 %v3778_v62, %v8769_v46  ;;  %v3825_v8 = vmul.f32 %v3808_v18, %v10242_v30  ;;  %v10245_v40 = vld [vmem:[#allocation55_spill] sm:$0xff]  ;;  %v10252_v62 = vld [vmem:[#allocation89_spill] sm:$0xff]  ;;  %v10254_v17 = vld [vmem:[#allocation88_spill] sm:$0xff] }
 0x366   :  { %v3781_v56 = vmul.f32 %v4522_v54, %v10243_v43  ;;  %v8938_v50 = vmul.f32 %v3779_v44, %v8840_v19  ;;  %v3813_v57 = vmul.f32 %v3779_v44, %v8776_v24  ;;  %v3826_v35 = vmul.f32 %v3809_v61, %v10244_v5  ;;  %v10248_v14 = vld [vmem:[#allocation79_spill] sm:$0xff]  ;;  %v10249_v24 = vld [vmem:[#allocation81_spill] sm:$0xff]  ;;  %v10250_v61 = vld [vmem:[#allocation32_spill] sm:$0xff] }
 0x367   :  { %v8943_v29 = vmul.f32 %v3780_v6, %v8846_v45  ;;  %v3814_v63 = vmul.f32 %v3780_v6, %v8783_v33  ;;  %v3827_v60 = vmul.f32 %v3810_v7, %v10245_v40  ;;  %v3828_v46 = vmul.f32 %v3811_v4, %v10246_v1  ;;  %v10251_v45 = vld [vmem:[#allocation23_spill] sm:$0xff]  ;;  %v10255_v44 = vld [vmem:[#allocation25_spill] sm:$0xff]  ;;  %v10256_v4 = vld [vmem:[#allocation90_spill] sm:$0xff] }
 0x368   :  { %v3798_v18 = vmul.f32 %v3781_v56, %v8853_v10  ;;  %v3815_v48 = vmul.f32 %v3781_v56, %v8790_v26  ;;  %v3829_v19 = vmul.f32 %v3812_v39, %v10247_v2  ;;  %v3830_v23 = vmul.f32 %v3813_v57, %v10248_v14  ;;  %v10257_v20 = vld [vmem:[#allocation24_spill] sm:$0xff]  ;;  %v10259_v39 = vld [vmem:[#allocation83_spill] sm:$0xff] }
 0x369   :  { %v3831_v25 = vmul.f32 %v3814_v63, %v10249_v24  ;;  %v3833_v28 = vadd.f32 %v3816_v27, %v10250_v61  ;;  %v3834_v41 = vadd.f32 %v3817_v53, %v10251_v45  ;;  %v3835_v33 = vadd.f32 %v3818_v3, %v10252_v62  ;;  %v10258_v47 = vld [vmem:[#allocation40_spill] sm:$0xff]  ;;  %v10261_v53 = vld [vmem:[#allocation33_spill] sm:$0xff]  ;;  %v10263_v5 = vld [vmem:[#allocation39_spill] sm:$0xff] }
 0x36a   :  { %v3832_v7 = vmul.f32 %v3815_v48, %v10253_v51  ;;  %v3836_v15 = vadd.f32 %v3819_v58, %v10254_v17  ;;  %v3837_v10 = vadd.f32 %v3820_v59, %v10255_v44  ;;  %v3838_v26 = vadd.f32 %v3821_v32, %v10256_v4  ;;  %3931 = vst [vmem:[#allocation8 + $0x40] sm:$0x7] %v3798_v18  ;;  %v10260_v27 = vld [vmem:[#allocation96_spill] sm:$0xff]  ;;  %v10262_v3 = vld [vmem:[#allocation97_spill] sm:$0xff]  ;;  %v10264_v58 = vld [vmem:[#allocation87_spill] sm:$0xff] }
 0x36b   :  { %v3839_v54 = vadd.f32 %v3822_v38, %v10257_v20  ;;  %v3840_v6 = vadd.f32 %v3823_v31, %v10258_v47  ;;  %v3841_v30 = vadd.f32 %v3824_v42, %v10259_v39  ;;  %v3842_v43 = vadd.f32 %v3825_v8, %v10260_v27  ;;  %v10265_v59 = vld [vmem:[#allocation14_spill] sm:$0xff]  ;;  %v10266_v1 = vld [vmem:[#allocation15_spill] sm:$0xff]  ;;  %v10267_v18 = vld [vmem:[#allocation16_spill] sm:$0xff] }
 0x36c   :  { %v3843_v56 = vadd.f32 %v3826_v35, %v10261_v53  ;;  %v3844_v57 = vadd.f32 %v3827_v60, %v10262_v3  ;;  %v3845_v63 = vadd.f32 %v3828_v46, %v10263_v5  ;;  %v3846_v40 = vadd.f32 %v3829_v19, %v10264_v58 }
 0x36d   :  { %v3847_v32 = vadd.f32 %v3830_v23, %v10265_v59  ;;  %v3848_v38 = vadd.f32 %v3831_v25, %v10266_v1  ;;  %v3849_v31 = vadd.f32 %v3832_v7, %v10267_v18  ;;  %v3866_v48 = vcombine.low %v3833_v28, %v3834_v41 }
 0x36e   :  { %v3867_v42 = vcombine.low %v3835_v33, %v3836_v15  ;;  %v3868_v2 = vcombine.low %v3837_v10, %v3838_v26  ;;  %v3869_v8 = vcombine.low %v3839_v54, %v3840_v6  ;;  %v3870_v14 = vcombine.low %v3841_v30, %v3842_v43 }
 0x36f   :  { %v3871_v35 = vcombine.low %v3843_v56, %v3844_v57  ;;  %v3872_v60 = vcombine.low %v3845_v63, %v3846_v40  ;;  %v3873_v46 = vcombine.low %v3847_v32, %v3848_v38  ;;  %3882 = vst [vmem:[#allocation7] sm:$0x77] %v3866_v48  ;;  %3890 = vst [vmem:[#allocation7 + $0x40] sm:$0x7] %v3849_v31 }
 0x370   :  { %v3907_v19 = vcombine.low %v8858_v11, %v8863_v52  ;;  %3883 = vst [vmem:[#allocation7 + $0x8] sm:$0x77] %v3867_v42  ;;  %3884 = vst [vmem:[#allocation7 + $0x10] sm:$0x77] %v3868_v2  ;;  %v3908_v23 = vcombine.low %v8868_v16, %v8873_v36  ;;  %v3909_v24 = vcombine.low %v8878_v0, %v8884_v55 }
 0x371   :  { %3885 = vst [vmem:[#allocation7 + $0x18] sm:$0x77] %v3869_v8  ;;  %3886 = vst [vmem:[#allocation7 + $0x20] sm:$0x77] %v3870_v14  ;;  %v3910_v25 = vcombine.low %v8890_v22, %v8896_v34  ;;  %v3911_v11 = vcombine.low %v8902_v12, %v8908_v49  ;;  %v3912_v52 = vcombine.low %v8914_v9, %v8920_v37 }
 0x372   :  { %3887 = vst [vmem:[#allocation7 + $0x28] sm:$0x77] %v3871_v35  ;;  %3888 = vst [vmem:[#allocation7 + $0x30] sm:$0x77] %v3872_v60  ;;  %v3913_v16 = vcombine.low %v8926_v21, %v8932_v13  ;;  %v3914_v36 = vcombine.low %v8938_v50, %v8943_v29 }
 0x373   :  { %3889 = vst [vmem:[#allocation7 + $0x38] sm:$0x77] %v3873_v46  ;;  %3923 = vst [vmem:[#allocation8] sm:$0x77] %v3907_v19 }
 0x374   :  { %3924 = vst [vmem:[#allocation8 + $0x8] sm:$0x77] %v3908_v23  ;;  %3925 = vst [vmem:[#allocation8 + $0x10] sm:$0x77] %v3909_v24 }
 0x375   :  { %3926 = vst [vmem:[#allocation8 + $0x18] sm:$0x77] %v3910_v25  ;;  %3927 = vst [vmem:[#allocation8 + $0x20] sm:$0x77] %v3911_v11 }
 0x376   :  { %4578 = shalt.err (!%p4575_p6)
}
 0x377   :  { %s4579_s2 = scalar_lea.hbm %s9037_s12, 1088 }
 0x378   :  { %p4580_p7 = scmp.ne.s32.totalorder %s9037_s12, %s4579_s2  ;;  %p4583_p8 = scmp.lt.u32.totalorder %s4579_s2, %s9037_s12 }
 0x37a   :  { %p4585_p9 = pnand %p4583_p8, %p4580_p7 }
 0x37c   :  { %4588 = shalt.err (!%p4585_p9)
}
 0x37d   :  { %3941 = dma.vmem_to_hbm [thread:$0]  %s8973_s23, 1088, %s9037_s12, [#allocation4]   ;;  %3928 = vst [vmem:[#allocation8 + $0x28] sm:$0x77] %v3912_v52  ;;  %3929 = vst [vmem:[#allocation8 + $0x30] sm:$0x77] %v3913_v16 }
 0x37e   :  { %3930 = vst [vmem:[#allocation8 + $0x38] sm:$0x77] %v3914_v36  ;;  %s4589_s15 = scalar_lea.vmem %s8989_s3, 1088  ;;  %p4594_p11 = scmp.lt.s32.totalorder %s8989_s3, %s8989_s3 }
 0x37f   :  { %p4590_p10 = scmp.ne.s32.totalorder %s8989_s3, %s4589_s15  ;;  %p4595_p12 = scmp.lt.s32.totalorder %s4589_s15, %s4589_s15 }
 0x381   :  { %p4596_p13 = por %p4595_p12, %p4594_p11 }
 0x383   :  { %p4597_p0 = pnand %p4596_p13, %p4590_p10 }
 0x385   :  { %4600 = shalt.err (!%p4597_p0)
}
 0x386   :  { %s4601_s26 = scalar_lea.hbm %s9038_s13, 1088 }
 0x387   :  { %p4602_p1 = scmp.ne.s32.totalorder %s9038_s13, %s4601_s26  ;;  %p4605_p2 = scmp.lt.u32.totalorder %s4601_s26, %s9038_s13 }
 0x389   :  { %p4607_p3 = pnand %p4605_p2, %p4602_p1 }
 0x38b   :  { %4610 = shalt.err (!%p4607_p3)
}
 0x38c   :  { %3951 = dma.vmem_to_hbm [thread:$0]  %s8989_s3, 1088, %s9038_s13, [#allocation9]  }
 0x38d   :  { %4615 = dma.done.wait [#allocation4], 1088  }
 0x38e   :  { %4616 = vsyncadd [#allocation4], 4294966208 }
 0x38f   :  { %4617 = dma.done.wait [#allocation9], 1088  }
 0x390   :  { %4618 = vsyncadd [#allocation9], 4294966208 }
 0x391   :  { %3958 = vsyncpa [#allocation3], 1 }
 0x392   :  { %3959 = vsyncpa [#allocation6], 1 }
 0x393   :  { %3960 = vsyncpa [#allocation4], 1 }
 0x394   :  { %3961 = vsyncpa [#allocation9], 1 }

</bundles_post_ra>
